<compile_context>
chip_gen: v7x
topology: tpu7x:2x2x1
jax: 0.10.0
libtpu: 0.0.40
codegen_flags: <defaults>
</compile_context>

<pallas_src>
import functools

import jax
import jax.numpy as jnp
import numpy as np
from jax.experimental import pallas as pl
from jax.experimental.pallas import tpu as pltpu


# ------------------------------ fused model kernel ------------------------------
def _fused_lstm_kernel(*refs, T, B, H, num_layers):
    """refs = (x_flat, [wih_t, whh_t, bias] * num_layers, w1_t, b1, w2_t_pad, b2_pad, out)."""
    x_ref = refs[0]
    layer_refs = [refs[1 + 3 * l: 1 + 3 * (l + 1)] for l in range(num_layers)]
    w1t_ref, bh1_ref, w2t_ref, bh2_ref = refs[1 + 3 * num_layers: 5 + 3 * num_layers]
    out_ref = refs[5 + 3 * num_layers]

    def run_layer(gates_all, whh_t):
        # gates_all: (T*B, 4H) precomputed x-projection + (b_ih + b_hh).
        # Serial part per step is only h_prev @ W_hh^T.
        h = jnp.zeros((B, H), jnp.float32)
        c = jnp.zeros((B, H), jnp.float32)
        outs = []
        for t in range(T):  # static, fully unrolled
            g = gates_all[t * B:(t + 1) * B, :] + jnp.dot(
                h, whh_t, preferred_element_type=jnp.float32)
            i_g = jax.nn.sigmoid(g[:, 0 * H:1 * H])
            f_g = jax.nn.sigmoid(g[:, 1 * H:2 * H])
            g_g = jnp.tanh(g[:, 2 * H:3 * H])
            o_g = jax.nn.sigmoid(g[:, 3 * H:4 * H])
            c = f_g * c + i_g * g_g
            h = o_g * jnp.tanh(c)
            outs.append(h)
        return jnp.concatenate(outs, axis=0), h  # ((T*B, H) sequence, (B, H) final h)

    seq = x_ref[...]                              # current layer input, (T*B, in_feat)
    hn_parts = []
    for l in range(num_layers):
        wih_t_ref, whh_t_ref, b_ref = layer_refs[l]
        # Batched (non-recurrent) half: one matmul with M = T*B instead of T tiny ones.
        gates = jnp.dot(seq, wih_t_ref[...],
                        preferred_element_type=jnp.float32) + b_ref[...]
        seq, h_final = run_layer(gates, whh_t_ref[...])
        hn_parts.append(h_final)

    # hn stacked layer-major -> (num_layers*B, H), matching hn.view(-1, hidden_size).
    hn = jnp.concatenate(hn_parts, axis=0)

    # Head fused in: relu -> fc_1 -> relu -> fc (class dim padded to 128 => lane-dense store).
    z = jnp.maximum(hn, 0.0)
    z = jnp.dot(z, w1t_ref[...], preferred_element_type=jnp.float32) + bh1_ref[...]
    z = jnp.maximum(z, 0.0)
    logits = jnp.dot(z, w2t_ref[...], preferred_element_type=jnp.float32) + bh2_ref[...]
    out_ref[...] = logits.astype(out_ref.dtype)


# --------------------------- parameter prep (one time) --------------------------
def prepare_params(params, num_layers, num_classes):
    """Pre-transpose weights / pre-sum biases / pre-pad head ONCE, outside the forward path."""
    nc_pad = max(128, ((num_classes + 127) // 128) * 128)
    prep = {"layers": [], "nc_pad": nc_pad}
    for l in range(num_layers):
        w_ih, w_hh, b_ih, b_hh = params["lstm"][l]
        prep["layers"].append((jnp.transpose(w_ih),               # (in_feat, 4H)
                               jnp.transpose(w_hh),               # (H, 4H)
                               (b_ih + b_hh).reshape(1, -1)))     # (1, 4H)
    w1, b1 = params["fc_1"]
    w2, b2 = params["fc"]
    pad = nc_pad - num_classes
    prep["w1_t"] = jnp.transpose(w1)                                      # (H, 128)
    prep["b1"] = b1.reshape(1, -1)                                        # (1, 128)
    prep["w2_t_pad"] = jnp.pad(jnp.transpose(w2), ((0, 0), (0, pad)))     # (128, nc_pad)
    prep["b2_pad"] = jnp.pad(b2.reshape(1, -1), ((0, 0), (0, pad)))       # (1, nc_pad)
    return prep


# ------------------------------- full forward -----------------------------------
def lstm_model_forward(x_btf, prep, num_layers, num_classes):
    """x_btf: (B, T, input_size), batch_first like the PyTorch module."""
    B, T, IN = x_btf.shape
    H = prep["layers"][0][1].shape[0]
    nc_pad = prep["nc_pad"]

    # batch-first -> time-major, flattened so row t*B + b corresponds to (time t, batch b)
    x_flat = jnp.transpose(x_btf, (1, 0, 2)).reshape(T * B, IN)

    args = [x_flat]
    for l in range(num_layers):
        args.extend(prep["layers"][l])
    args.extend([prep["w1_t"], prep["b1"], prep["w2_t_pad"], prep["b2_pad"]])

    kernel = functools.partial(_fused_lstm_kernel, T=T, B=B, H=H, num_layers=num_layers)
    out_pad = pl.pallas_call(
        kernel,
        out_shape=jax.ShapeDtypeStruct((num_layers * B, nc_pad), jnp.float32),
        # Fused working set (weights + sequences + activations) is < 1 MiB at these
        # shapes; 32 MiB gives headroom and stays within v7x's 64 MiB physical VMEM.
        compiler_params=pltpu.CompilerParams(vmem_limit_bytes=32 * 1024 * 1024),
    )(*args)
    return out_pad[:, :num_classes]


# --------------------------- pure-JAX reference --------------------------------
def reference_forward(x_btf, params, num_layers, hidden_size):
    B = x_btf.shape[0]
    inp = x_btf
    hn_layers = []
    for layer in range(num_layers):
        w_ih, w_hh, b_ih, b_hh = params["lstm"][layer]
        h = jnp.zeros((B, hidden_size), jnp.float32)
        c = jnp.zeros((B, hidden_size), jnp.float32)
        outs = []
        for t in range(inp.shape[1]):
            g = inp[:, t] @ w_ih.T + h @ w_hh.T + b_ih + b_hh
            i_g, f_g, g_g, o_g = jnp.split(g, 4, axis=-1)
            i_g = jax.nn.sigmoid(i_g); f_g = jax.nn.sigmoid(f_g)
            g_g = jnp.tanh(g_g); o_g = jax.nn.sigmoid(o_g)
            c = f_g * c + i_g * g_g
            h = o_g * jnp.tanh(c)
            outs.append(h)
        inp = jnp.stack(outs, axis=1)
        hn_layers.append(h)
    hn = jnp.concatenate(hn_layers, axis=0)
    w1, b1 = params["fc_1"]
    w2, b2 = params["fc"]
    out = jnp.maximum(hn, 0.0) @ w1.T + b1
    out = jnp.maximum(out, 0.0) @ w2.T + b2
    return out


# ---------------------------------- main ---------------------------------------
if __name__ == "__main__":
    # Module hyper-parameters (small, TPU-friendly).
    num_classes = 10
    input_size = 16
    hidden_size = 128
    num_layers = 2
    seq_length = 8
    batch = 2

    key = jax.random.PRNGKey(0)
    keys = iter(jax.random.split(key, 64))

    def uni(k, shape, bound):
        return jax.random.uniform(k, shape, jnp.float32, -bound, bound)

    kb = 1.0 / np.sqrt(hidden_size)
    lstm_params = []
    for layer in range(num_layers):
        in_feat = input_size if layer == 0 else hidden_size
        w_ih = uni(next(keys), (4 * hidden_size, in_feat), kb)
        w_hh = uni(next(keys), (4 * hidden_size, hidden_size), kb)
        b_ih = uni(next(keys), (4 * hidden_size,), kb)
        b_hh = uni(next(keys), (4 * hidden_size,), kb)
        lstm_params.append((w_ih, w_hh, b_ih, b_hh))

    k1 = 1.0 / np.sqrt(hidden_size)
    w1 = uni(next(keys), (128, hidden_size), k1)
    b1 = uni(next(keys), (128,), k1)
    k2 = 1.0 / np.sqrt(128)
    w2 = uni(next(keys), (num_classes, 128), k2)
    b2 = uni(next(keys), (num_classes,), k2)

    params = {"lstm": lstm_params, "fc_1": [w1, b1], "fc": [w2, b2]}
    prep = prepare_params(params, num_layers, num_classes)   # one-time weight prep

    # Input: batch_first (B, T, input_size), as nn.LSTM(batch_first=True) expects.
    x = jax.random.normal(next(keys), (batch, seq_length, input_size), jnp.float32)

    out = lstm_model_forward(x, prep, num_layers, num_classes)
    out = jax.block_until_ready(out)

    ref = reference_forward(x, params, num_layers, hidden_size)
    np.testing.assert_allclose(np.asarray(out), np.asarray(ref), rtol=1e-4, atol=1e-4)
    assert out.shape == (num_layers * batch, num_classes)

    print("KERNEL_OK")
</pallas_src>

<mosaic_0001>
module attributes {stable_mosaic.version = 11 : i64} {
  func.func @_fused_lstm_kernel(%arg0: memref<16x16xf32, #tpu.memory_space<vmem>>, %arg1: memref<16x512xf32, #tpu.memory_space<vmem>>, %arg2: memref<128x512xf32, #tpu.memory_space<vmem>>, %arg3: memref<1x512xf32, #tpu.memory_space<vmem>>, %arg4: memref<128x512xf32, #tpu.memory_space<vmem>>, %arg5: memref<128x512xf32, #tpu.memory_space<vmem>>, %arg6: memref<1x512xf32, #tpu.memory_space<vmem>>, %arg7: memref<128x128xf32, #tpu.memory_space<vmem>>, %arg8: memref<1x128xf32, #tpu.memory_space<vmem>>, %arg9: memref<128x128xf32, #tpu.memory_space<vmem>>, %arg10: memref<1x128xf32, #tpu.memory_space<vmem>>, %arg11: memref<4x128xf32, #tpu.memory_space<vmem>>) attributes {dimension_semantics = [], scalar_prefetch = 0 : i64, scratch_operands = 0 : i64, tpu.core_type = #tpu.core_type<tc>} {
    %c0 = arith.constant 0 : index
    %c0_0 = arith.constant 0 : index
    %0 = vector.load %arg0[%c0, %c0_0] : memref<16x16xf32, #tpu.memory_space<vmem>>, vector<16x16xf32>
    %c0_1 = arith.constant 0 : index
    %c0_2 = arith.constant 0 : index
    %1 = vector.load %arg1[%c0_1, %c0_2] : memref<16x512xf32, #tpu.memory_space<vmem>>, vector<16x512xf32>
    %cst = arith.constant dense<0.000000e+00> : vector<16x512xf32>
    %2 = tpu.matmul %0, %1, %cst {dimension_numbers = #tpu.dot_dimension_numbers<[1], [0], [0], [1], [0, 0, 1, 1], [], []>} : vector<16x16xf32>, vector<16x512xf32>, vector<16x512xf32> -> vector<16x512xf32>
    %c0_3 = arith.constant 0 : index
    %c0_4 = arith.constant 0 : index
    %3 = vector.load %arg3[%c0_3, %c0_4] : memref<1x512xf32, #tpu.memory_space<vmem>>, vector<1x512xf32>
    %4 = vector.broadcast %3 : vector<1x512xf32> to vector<16x512xf32>
    %5 = arith.addf %2, %4 : vector<16x512xf32>
    %c0_5 = arith.constant 0 : index
    %c0_6 = arith.constant 0 : index
    %6 = vector.load %arg2[%c0_5, %c0_6] : memref<128x512xf32, #tpu.memory_space<vmem>>, vector<128x512xf32>
    %cst_7 = arith.constant 0.000000e+00 : f32
    %7 = vector.broadcast %cst_7 : f32 to vector<2x128xf32>
    %cst_8 = arith.constant 0.000000e+00 : f32
    %8 = vector.broadcast %cst_8 : f32 to vector<2x128xf32>
    %9 = vector.extract_strided_slice %5 {offsets = [0, 0], sizes = [2, 512], strides = [1, 1]} : vector<16x512xf32> to vector<2x512xf32>
    %cst_9 = arith.constant dense<0.000000e+00> : vector<2x512xf32>
    %10 = tpu.matmul %7, %6, %cst_9 {dimension_numbers = #tpu.dot_dimension_numbers<[1], [0], [0], [1], [0, 0, 1, 1], [], []>} : vector<2x128xf32>, vector<128x512xf32>, vector<2x512xf32> -> vector<2x512xf32>
    %11 = arith.addf %9, %10 : vector<2x512xf32>
    %12 = vector.extract_strided_slice %11 {offsets = [0, 0], sizes = [2, 128], strides = [1, 1]} : vector<2x512xf32> to vector<2x128xf32>
    %13 = arith.negf %12 : vector<2x128xf32>
    %14 = math.exp %13 : vector<2x128xf32>
    %cst_10 = arith.constant 1.000000e+00 : f32
    %15 = vector.broadcast %cst_10 : f32 to vector<2x128xf32>
    %16 = arith.addf %15, %14 : vector<2x128xf32>
    %17 = arith.divf %15, %16 : vector<2x128xf32>
    %18 = vector.extract_strided_slice %11 {offsets = [0, 128], sizes = [2, 128], strides = [1, 1]} : vector<2x512xf32> to vector<2x128xf32>
    %19 = arith.negf %18 : vector<2x128xf32>
    %20 = math.exp %19 : vector<2x128xf32>
    %cst_11 = arith.constant 1.000000e+00 : f32
    %21 = vector.broadcast %cst_11 : f32 to vector<2x128xf32>
    %22 = arith.addf %21, %20 : vector<2x128xf32>
    %23 = arith.divf %21, %22 : vector<2x128xf32>
    %24 = vector.extract_strided_slice %11 {offsets = [0, 256], sizes = [2, 128], strides = [1, 1]} : vector<2x512xf32> to vector<2x128xf32>
    %25 = math.tanh %24 : vector<2x128xf32>
    %26 = vector.extract_strided_slice %11 {offsets = [0, 384], sizes = [2, 128], strides = [1, 1]} : vector<2x512xf32> to vector<2x128xf32>
    %27 = arith.negf %26 : vector<2x128xf32>
    %28 = math.exp %27 : vector<2x128xf32>
    %cst_12 = arith.constant 1.000000e+00 : f32
    %29 = vector.broadcast %cst_12 : f32 to vector<2x128xf32>
    %30 = arith.addf %29, %28 : vector<2x128xf32>
    %31 = arith.divf %29, %30 : vector<2x128xf32>
    %32 = arith.mulf %23, %8 : vector<2x128xf32>
    %33 = arith.mulf %17, %25 : vector<2x128xf32>
    %34 = arith.addf %32, %33 : vector<2x128xf32>
    %35 = math.tanh %34 : vector<2x128xf32>
    %36 = arith.mulf %31, %35 : vector<2x128xf32>
    %37 = vector.extract_strided_slice %5 {offsets = [2, 0], sizes = [2, 512], strides = [1, 1]} : vector<16x512xf32> to vector<2x512xf32>
    %cst_13 = arith.constant dense<0.000000e+00> : vector<2x512xf32>
    %38 = tpu.matmul %36, %6, %cst_13 {dimension_numbers = #tpu.dot_dimension_numbers<[1], [0], [0], [1], [0, 0, 1, 1], [], []>} : vector<2x128xf32>, vector<128x512xf32>, vector<2x512xf32> -> vector<2x512xf32>
    %39 = arith.addf %37, %38 : vector<2x512xf32>
    %40 = vector.extract_strided_slice %39 {offsets = [0, 0], sizes = [2, 128], strides = [1, 1]} : vector<2x512xf32> to vector<2x128xf32>
    %41 = arith.negf %40 : vector<2x128xf32>
    %42 = math.exp %41 : vector<2x128xf32>
    %cst_14 = arith.constant 1.000000e+00 : f32
    %43 = vector.broadcast %cst_14 : f32 to vector<2x128xf32>
    %44 = arith.addf %43, %42 : vector<2x128xf32>
    %45 = arith.divf %43, %44 : vector<2x128xf32>
    %46 = vector.extract_strided_slice %39 {offsets = [0, 128], sizes = [2, 128], strides = [1, 1]} : vector<2x512xf32> to vector<2x128xf32>
    %47 = arith.negf %46 : vector<2x128xf32>
    %48 = math.exp %47 : vector<2x128xf32>
    %cst_15 = arith.constant 1.000000e+00 : f32
    %49 = vector.broadcast %cst_15 : f32 to vector<2x128xf32>
    %50 = arith.addf %49, %48 : vector<2x128xf32>
    %51 = arith.divf %49, %50 : vector<2x128xf32>
    %52 = vector.extract_strided_slice %39 {offsets = [0, 256], sizes = [2, 128], strides = [1, 1]} : vector<2x512xf32> to vector<2x128xf32>
    %53 = math.tanh %52 : vector<2x128xf32>
    %54 = vector.extract_strided_slice %39 {offsets = [0, 384], sizes = [2, 128], strides = [1, 1]} : vector<2x512xf32> to vector<2x128xf32>
    %55 = arith.negf %54 : vector<2x128xf32>
    %56 = math.exp %55 : vector<2x128xf32>
    %cst_16 = arith.constant 1.000000e+00 : f32
    %57 = vector.broadcast %cst_16 : f32 to vector<2x128xf32>
    %58 = arith.addf %57, %56 : vector<2x128xf32>
    %59 = arith.divf %57, %58 : vector<2x128xf32>
    %60 = arith.mulf %51, %34 : vector<2x128xf32>
    %61 = arith.mulf %45, %53 : vector<2x128xf32>
    %62 = arith.addf %60, %61 : vector<2x128xf32>
    %63 = math.tanh %62 : vector<2x128xf32>
    %64 = arith.mulf %59, %63 : vector<2x128xf32>
    %65 = vector.extract_strided_slice %5 {offsets = [4, 0], sizes = [2, 512], strides = [1, 1]} : vector<16x512xf32> to vector<2x512xf32>
    %cst_17 = arith.constant dense<0.000000e+00> : vector<2x512xf32>
    %66 = tpu.matmul %64, %6, %cst_17 {dimension_numbers = #tpu.dot_dimension_numbers<[1], [0], [0], [1], [0, 0, 1, 1], [], []>} : vector<2x128xf32>, vector<128x512xf32>, vector<2x512xf32> -> vector<2x512xf32>
    %67 = arith.addf %65, %66 : vector<2x512xf32>
    %68 = vector.extract_strided_slice %67 {offsets = [0, 0], sizes = [2, 128], strides = [1, 1]} : vector<2x512xf32> to vector<2x128xf32>
    %69 = arith.negf %68 : vector<2x128xf32>
    %70 = math.exp %69 : vector<2x128xf32>
    %cst_18 = arith.constant 1.000000e+00 : f32
    %71 = vector.broadcast %cst_18 : f32 to vector<2x128xf32>
    %72 = arith.addf %71, %70 : vector<2x128xf32>
    %73 = arith.divf %71, %72 : vector<2x128xf32>
    %74 = vector.extract_strided_slice %67 {offsets = [0, 128], sizes = [2, 128], strides = [1, 1]} : vector<2x512xf32> to vector<2x128xf32>
    %75 = arith.negf %74 : vector<2x128xf32>
    %76 = math.exp %75 : vector<2x128xf32>
    %cst_19 = arith.constant 1.000000e+00 : f32
    %77 = vector.broadcast %cst_19 : f32 to vector<2x128xf32>
    %78 = arith.addf %77, %76 : vector<2x128xf32>
    %79 = arith.divf %77, %78 : vector<2x128xf32>
    %80 = vector.extract_strided_slice %67 {offsets = [0, 256], sizes = [2, 128], strides = [1, 1]} : vector<2x512xf32> to vector<2x128xf32>
    %81 = math.tanh %80 : vector<2x128xf32>
    %82 = vector.extract_strided_slice %67 {offsets = [0, 384], sizes = [2, 128], strides = [1, 1]} : vector<2x512xf32> to vector<2x128xf32>
    %83 = arith.negf %82 : vector<2x128xf32>
    %84 = math.exp %83 : vector<2x128xf32>
    %cst_20 = arith.constant 1.000000e+00 : f32
    %85 = vector.broadcast %cst_20 : f32 to vector<2x128xf32>
    %86 = arith.addf %85, %84 : vector<2x128xf32>
    %87 = arith.divf %85, %86 : vector<2x128xf32>
    %88 = arith.mulf %79, %62 : vector<2x128xf32>
    %89 = arith.mulf %73, %81 : vector<2x128xf32>
    %90 = arith.addf %88, %89 : vector<2x128xf32>
    %91 = math.tanh %90 : vector<2x128xf32>
    %92 = arith.mulf %87, %91 : vector<2x128xf32>
    %93 = vector.extract_strided_slice %5 {offsets = [6, 0], sizes = [2, 512], strides = [1, 1]} : vector<16x512xf32> to vector<2x512xf32>
    %cst_21 = arith.constant dense<0.000000e+00> : vector<2x512xf32>
    %94 = tpu.matmul %92, %6, %cst_21 {dimension_numbers = #tpu.dot_dimension_numbers<[1], [0], [0], [1], [0, 0, 1, 1], [], []>} : vector<2x128xf32>, vector<128x512xf32>, vector<2x512xf32> -> vector<2x512xf32>
    %95 = arith.addf %93, %94 : vector<2x512xf32>
    %96 = vector.extract_strided_slice %95 {offsets = [0, 0], sizes = [2, 128], strides = [1, 1]} : vector<2x512xf32> to vector<2x128xf32>
    %97 = arith.negf %96 : vector<2x128xf32>
    %98 = math.exp %97 : vector<2x128xf32>
    %cst_22 = arith.constant 1.000000e+00 : f32
    %99 = vector.broadcast %cst_22 : f32 to vector<2x128xf32>
    %100 = arith.addf %99, %98 : vector<2x128xf32>
    %101 = arith.divf %99, %100 : vector<2x128xf32>
    %102 = vector.extract_strided_slice %95 {offsets = [0, 128], sizes = [2, 128], strides = [1, 1]} : vector<2x512xf32> to vector<2x128xf32>
    %103 = arith.negf %102 : vector<2x128xf32>
    %104 = math.exp %103 : vector<2x128xf32>
    %cst_23 = arith.constant 1.000000e+00 : f32
    %105 = vector.broadcast %cst_23 : f32 to vector<2x128xf32>
    %106 = arith.addf %105, %104 : vector<2x128xf32>
    %107 = arith.divf %105, %106 : vector<2x128xf32>
    %108 = vector.extract_strided_slice %95 {offsets = [0, 256], sizes = [2, 128], strides = [1, 1]} : vector<2x512xf32> to vector<2x128xf32>
    %109 = math.tanh %108 : vector<2x128xf32>
    %110 = vector.extract_strided_slice %95 {offsets = [0, 384], sizes = [2, 128], strides = [1, 1]} : vector<2x512xf32> to vector<2x128xf32>
    %111 = arith.negf %110 : vector<2x128xf32>
    %112 = math.exp %111 : vector<2x128xf32>
    %cst_24 = arith.constant 1.000000e+00 : f32
    %113 = vector.broadcast %cst_24 : f32 to vector<2x128xf32>
    %114 = arith.addf %113, %112 : vector<2x128xf32>
    %115 = arith.divf %113, %114 : vector<2x128xf32>
    %116 = arith.mulf %107, %90 : vector<2x128xf32>
    %117 = arith.mulf %101, %109 : vector<2x128xf32>
    %118 = arith.addf %116, %117 : vector<2x128xf32>
    %119 = math.tanh %118 : vector<2x128xf32>
    %120 = arith.mulf %115, %119 : vector<2x128xf32>
    %121 = vector.extract_strided_slice %5 {offsets = [8, 0], sizes = [2, 512], strides = [1, 1]} : vector<16x512xf32> to vector<2x512xf32>
    %cst_25 = arith.constant dense<0.000000e+00> : vector<2x512xf32>
    %122 = tpu.matmul %120, %6, %cst_25 {dimension_numbers = #tpu.dot_dimension_numbers<[1], [0], [0], [1], [0, 0, 1, 1], [], []>} : vector<2x128xf32>, vector<128x512xf32>, vector<2x512xf32> -> vector<2x512xf32>
    %123 = arith.addf %121, %122 : vector<2x512xf32>
    %124 = vector.extract_strided_slice %123 {offsets = [0, 0], sizes = [2, 128], strides = [1, 1]} : vector<2x512xf32> to vector<2x128xf32>
    %125 = arith.negf %124 : vector<2x128xf32>
    %126 = math.exp %125 : vector<2x128xf32>
    %cst_26 = arith.constant 1.000000e+00 : f32
    %127 = vector.broadcast %cst_26 : f32 to vector<2x128xf32>
    %128 = arith.addf %127, %126 : vector<2x128xf32>
    %129 = arith.divf %127, %128 : vector<2x128xf32>
    %130 = vector.extract_strided_slice %123 {offsets = [0, 128], sizes = [2, 128], strides = [1, 1]} : vector<2x512xf32> to vector<2x128xf32>
    %131 = arith.negf %130 : vector<2x128xf32>
    %132 = math.exp %131 : vector<2x128xf32>
    %cst_27 = arith.constant 1.000000e+00 : f32
    %133 = vector.broadcast %cst_27 : f32 to vector<2x128xf32>
    %134 = arith.addf %133, %132 : vector<2x128xf32>
    %135 = arith.divf %133, %134 : vector<2x128xf32>
    %136 = vector.extract_strided_slice %123 {offsets = [0, 256], sizes = [2, 128], strides = [1, 1]} : vector<2x512xf32> to vector<2x128xf32>
    %137 = math.tanh %136 : vector<2x128xf32>
    %138 = vector.extract_strided_slice %123 {offsets = [0, 384], sizes = [2, 128], strides = [1, 1]} : vector<2x512xf32> to vector<2x128xf32>
    %139 = arith.negf %138 : vector<2x128xf32>
    %140 = math.exp %139 : vector<2x128xf32>
    %cst_28 = arith.constant 1.000000e+00 : f32
    %141 = vector.broadcast %cst_28 : f32 to vector<2x128xf32>
    %142 = arith.addf %141, %140 : vector<2x128xf32>
    %143 = arith.divf %141, %142 : vector<2x128xf32>
    %144 = arith.mulf %135, %118 : vector<2x128xf32>
    %145 = arith.mulf %129, %137 : vector<2x128xf32>
    %146 = arith.addf %144, %145 : vector<2x128xf32>
    %147 = math.tanh %146 : vector<2x128xf32>
    %148 = arith.mulf %143, %147 : vector<2x128xf32>
    %149 = vector.extract_strided_slice %5 {offsets = [10, 0], sizes = [2, 512], strides = [1, 1]} : vector<16x512xf32> to vector<2x512xf32>
    %cst_29 = arith.constant dense<0.000000e+00> : vector<2x512xf32>
    %150 = tpu.matmul %148, %6, %cst_29 {dimension_numbers = #tpu.dot_dimension_numbers<[1], [0], [0], [1], [0, 0, 1, 1], [], []>} : vector<2x128xf32>, vector<128x512xf32>, vector<2x512xf32> -> vector<2x512xf32>
    %151 = arith.addf %149, %150 : vector<2x512xf32>
    %152 = vector.extract_strided_slice %151 {offsets = [0, 0], sizes = [2, 128], strides = [1, 1]} : vector<2x512xf32> to vector<2x128xf32>
    %153 = arith.negf %152 : vector<2x128xf32>
    %154 = math.exp %153 : vector<2x128xf32>
    %cst_30 = arith.constant 1.000000e+00 : f32
    %155 = vector.broadcast %cst_30 : f32 to vector<2x128xf32>
    %156 = arith.addf %155, %154 : vector<2x128xf32>
    %157 = arith.divf %155, %156 : vector<2x128xf32>
    %158 = vector.extract_strided_slice %151 {offsets = [0, 128], sizes = [2, 128], strides = [1, 1]} : vector<2x512xf32> to vector<2x128xf32>
    %159 = arith.negf %158 : vector<2x128xf32>
    %160 = math.exp %159 : vector<2x128xf32>
    %cst_31 = arith.constant 1.000000e+00 : f32
    %161 = vector.broadcast %cst_31 : f32 to vector<2x128xf32>
    %162 = arith.addf %161, %160 : vector<2x128xf32>
    %163 = arith.divf %161, %162 : vector<2x128xf32>
    %164 = vector.extract_strided_slice %151 {offsets = [0, 256], sizes = [2, 128], strides = [1, 1]} : vector<2x512xf32> to vector<2x128xf32>
    %165 = math.tanh %164 : vector<2x128xf32>
    %166 = vector.extract_strided_slice %151 {offsets = [0, 384], sizes = [2, 128], strides = [1, 1]} : vector<2x512xf32> to vector<2x128xf32>
    %167 = arith.negf %166 : vector<2x128xf32>
    %168 = math.exp %167 : vector<2x128xf32>
    %cst_32 = arith.constant 1.000000e+00 : f32
    %169 = vector.broadcast %cst_32 : f32 to vector<2x128xf32>
    %170 = arith.addf %169, %168 : vector<2x128xf32>
    %171 = arith.divf %169, %170 : vector<2x128xf32>
    %172 = arith.mulf %163, %146 : vector<2x128xf32>
    %173 = arith.mulf %157, %165 : vector<2x128xf32>
    %174 = arith.addf %172, %173 : vector<2x128xf32>
    %175 = math.tanh %174 : vector<2x128xf32>
    %176 = arith.mulf %171, %175 : vector<2x128xf32>
    %177 = vector.extract_strided_slice %5 {offsets = [12, 0], sizes = [2, 512], strides = [1, 1]} : vector<16x512xf32> to vector<2x512xf32>
    %cst_33 = arith.constant dense<0.000000e+00> : vector<2x512xf32>
    %178 = tpu.matmul %176, %6, %cst_33 {dimension_numbers = #tpu.dot_dimension_numbers<[1], [0], [0], [1], [0, 0, 1, 1], [], []>} : vector<2x128xf32>, vector<128x512xf32>, vector<2x512xf32> -> vector<2x512xf32>
    %179 = arith.addf %177, %178 : vector<2x512xf32>
    %180 = vector.extract_strided_slice %179 {offsets = [0, 0], sizes = [2, 128], strides = [1, 1]} : vector<2x512xf32> to vector<2x128xf32>
    %181 = arith.negf %180 : vector<2x128xf32>
    %182 = math.exp %181 : vector<2x128xf32>
    %cst_34 = arith.constant 1.000000e+00 : f32
    %183 = vector.broadcast %cst_34 : f32 to vector<2x128xf32>
    %184 = arith.addf %183, %182 : vector<2x128xf32>
    %185 = arith.divf %183, %184 : vector<2x128xf32>
    %186 = vector.extract_strided_slice %179 {offsets = [0, 128], sizes = [2, 128], strides = [1, 1]} : vector<2x512xf32> to vector<2x128xf32>
    %187 = arith.negf %186 : vector<2x128xf32>
    %188 = math.exp %187 : vector<2x128xf32>
    %cst_35 = arith.constant 1.000000e+00 : f32
    %189 = vector.broadcast %cst_35 : f32 to vector<2x128xf32>
    %190 = arith.addf %189, %188 : vector<2x128xf32>
    %191 = arith.divf %189, %190 : vector<2x128xf32>
    %192 = vector.extract_strided_slice %179 {offsets = [0, 256], sizes = [2, 128], strides = [1, 1]} : vector<2x512xf32> to vector<2x128xf32>
    %193 = math.tanh %192 : vector<2x128xf32>
    %194 = vector.extract_strided_slice %179 {offsets = [0, 384], sizes = [2, 128], strides = [1, 1]} : vector<2x512xf32> to vector<2x128xf32>
    %195 = arith.negf %194 : vector<2x128xf32>
    %196 = math.exp %195 : vector<2x128xf32>
    %cst_36 = arith.constant 1.000000e+00 : f32
    %197 = vector.broadcast %cst_36 : f32 to vector<2x128xf32>
    %198 = arith.addf %197, %196 : vector<2x128xf32>
    %199 = arith.divf %197, %198 : vector<2x128xf32>
    %200 = arith.mulf %191, %174 : vector<2x128xf32>
    %201 = arith.mulf %185, %193 : vector<2x128xf32>
    %202 = arith.addf %200, %201 : vector<2x128xf32>
    %203 = math.tanh %202 : vector<2x128xf32>
    %204 = arith.mulf %199, %203 : vector<2x128xf32>
    %205 = vector.extract_strided_slice %5 {offsets = [14, 0], sizes = [2, 512], strides = [1, 1]} : vector<16x512xf32> to vector<2x512xf32>
    %cst_37 = arith.constant dense<0.000000e+00> : vector<2x512xf32>
    %206 = tpu.matmul %204, %6, %cst_37 {dimension_numbers = #tpu.dot_dimension_numbers<[1], [0], [0], [1], [0, 0, 1, 1], [], []>} : vector<2x128xf32>, vector<128x512xf32>, vector<2x512xf32> -> vector<2x512xf32>
    %207 = arith.addf %205, %206 : vector<2x512xf32>
    %208 = vector.extract_strided_slice %207 {offsets = [0, 0], sizes = [2, 128], strides = [1, 1]} : vector<2x512xf32> to vector<2x128xf32>
    %209 = arith.negf %208 : vector<2x128xf32>
    %210 = math.exp %209 : vector<2x128xf32>
    %cst_38 = arith.constant 1.000000e+00 : f32
    %211 = vector.broadcast %cst_38 : f32 to vector<2x128xf32>
    %212 = arith.addf %211, %210 : vector<2x128xf32>
    %213 = arith.divf %211, %212 : vector<2x128xf32>
    %214 = vector.extract_strided_slice %207 {offsets = [0, 128], sizes = [2, 128], strides = [1, 1]} : vector<2x512xf32> to vector<2x128xf32>
    %215 = arith.negf %214 : vector<2x128xf32>
    %216 = math.exp %215 : vector<2x128xf32>
    %cst_39 = arith.constant 1.000000e+00 : f32
    %217 = vector.broadcast %cst_39 : f32 to vector<2x128xf32>
    %218 = arith.addf %217, %216 : vector<2x128xf32>
    %219 = arith.divf %217, %218 : vector<2x128xf32>
    %220 = vector.extract_strided_slice %207 {offsets = [0, 256], sizes = [2, 128], strides = [1, 1]} : vector<2x512xf32> to vector<2x128xf32>
    %221 = math.tanh %220 : vector<2x128xf32>
    %222 = vector.extract_strided_slice %207 {offsets = [0, 384], sizes = [2, 128], strides = [1, 1]} : vector<2x512xf32> to vector<2x128xf32>
    %223 = arith.negf %222 : vector<2x128xf32>
    %224 = math.exp %223 : vector<2x128xf32>
    %cst_40 = arith.constant 1.000000e+00 : f32
    %225 = vector.broadcast %cst_40 : f32 to vector<2x128xf32>
    %226 = arith.addf %225, %224 : vector<2x128xf32>
    %227 = arith.divf %225, %226 : vector<2x128xf32>
    %228 = arith.mulf %219, %202 : vector<2x128xf32>
    %229 = arith.mulf %213, %221 : vector<2x128xf32>
    %230 = arith.addf %228, %229 : vector<2x128xf32>
    %231 = math.tanh %230 : vector<2x128xf32>
    %232 = arith.mulf %227, %231 : vector<2x128xf32>
    %233 = tpu.concatenate %36, %64, %92, %120, %148, %176, %204, %232 in 0 : vector<2x128xf32>, vector<2x128xf32>, vector<2x128xf32>, vector<2x128xf32>, vector<2x128xf32>, vector<2x128xf32>, vector<2x128xf32>, vector<2x128xf32> -> vector<16x128xf32>
    %c0_41 = arith.constant 0 : index
    %c0_42 = arith.constant 0 : index
    %234 = vector.load %arg4[%c0_41, %c0_42] : memref<128x512xf32, #tpu.memory_space<vmem>>, vector<128x512xf32>
    %cst_43 = arith.constant dense<0.000000e+00> : vector<16x512xf32>
    %235 = tpu.matmul %233, %234, %cst_43 {dimension_numbers = #tpu.dot_dimension_numbers<[1], [0], [0], [1], [0, 0, 1, 1], [], []>} : vector<16x128xf32>, vector<128x512xf32>, vector<16x512xf32> -> vector<16x512xf32>
    %c0_44 = arith.constant 0 : index
    %c0_45 = arith.constant 0 : index
    %236 = vector.load %arg6[%c0_44, %c0_45] : memref<1x512xf32, #tpu.memory_space<vmem>>, vector<1x512xf32>
    %237 = vector.broadcast %236 : vector<1x512xf32> to vector<16x512xf32>
    %238 = arith.addf %235, %237 : vector<16x512xf32>
    %c0_46 = arith.constant 0 : index
    %c0_47 = arith.constant 0 : index
    %239 = vector.load %arg5[%c0_46, %c0_47] : memref<128x512xf32, #tpu.memory_space<vmem>>, vector<128x512xf32>
    %cst_48 = arith.constant 0.000000e+00 : f32
    %240 = vector.broadcast %cst_48 : f32 to vector<2x128xf32>
    %cst_49 = arith.constant 0.000000e+00 : f32
    %241 = vector.broadcast %cst_49 : f32 to vector<2x128xf32>
    %242 = vector.extract_strided_slice %238 {offsets = [0, 0], sizes = [2, 512], strides = [1, 1]} : vector<16x512xf32> to vector<2x512xf32>
    %cst_50 = arith.constant dense<0.000000e+00> : vector<2x512xf32>
    %243 = tpu.matmul %240, %239, %cst_50 {dimension_numbers = #tpu.dot_dimension_numbers<[1], [0], [0], [1], [0, 0, 1, 1], [], []>} : vector<2x128xf32>, vector<128x512xf32>, vector<2x512xf32> -> vector<2x512xf32>
    %244 = arith.addf %242, %243 : vector<2x512xf32>
    %245 = vector.extract_strided_slice %244 {offsets = [0, 0], sizes = [2, 128], strides = [1, 1]} : vector<2x512xf32> to vector<2x128xf32>
    %246 = arith.negf %245 : vector<2x128xf32>
    %247 = math.exp %246 : vector<2x128xf32>
    %cst_51 = arith.constant 1.000000e+00 : f32
    %248 = vector.broadcast %cst_51 : f32 to vector<2x128xf32>
    %249 = arith.addf %248, %247 : vector<2x128xf32>
    %250 = arith.divf %248, %249 : vector<2x128xf32>
    %251 = vector.extract_strided_slice %244 {offsets = [0, 128], sizes = [2, 128], strides = [1, 1]} : vector<2x512xf32> to vector<2x128xf32>
    %252 = arith.negf %251 : vector<2x128xf32>
    %253 = math.exp %252 : vector<2x128xf32>
    %cst_52 = arith.constant 1.000000e+00 : f32
    %254 = vector.broadcast %cst_52 : f32 to vector<2x128xf32>
    %255 = arith.addf %254, %253 : vector<2x128xf32>
    %256 = arith.divf %254, %255 : vector<2x128xf32>
    %257 = vector.extract_strided_slice %244 {offsets = [0, 256], sizes = [2, 128], strides = [1, 1]} : vector<2x512xf32> to vector<2x128xf32>
    %258 = math.tanh %257 : vector<2x128xf32>
    %259 = vector.extract_strided_slice %244 {offsets = [0, 384], sizes = [2, 128], strides = [1, 1]} : vector<2x512xf32> to vector<2x128xf32>
    %260 = arith.negf %259 : vector<2x128xf32>
    %261 = math.exp %260 : vector<2x128xf32>
    %cst_53 = arith.constant 1.000000e+00 : f32
    %262 = vector.broadcast %cst_53 : f32 to vector<2x128xf32>
    %263 = arith.addf %262, %261 : vector<2x128xf32>
    %264 = arith.divf %262, %263 : vector<2x128xf32>
    %265 = arith.mulf %256, %241 : vector<2x128xf32>
    %266 = arith.mulf %250, %258 : vector<2x128xf32>
    %267 = arith.addf %265, %266 : vector<2x128xf32>
    %268 = math.tanh %267 : vector<2x128xf32>
    %269 = arith.mulf %264, %268 : vector<2x128xf32>
    %270 = vector.extract_strided_slice %238 {offsets = [2, 0], sizes = [2, 512], strides = [1, 1]} : vector<16x512xf32> to vector<2x512xf32>
    %cst_54 = arith.constant dense<0.000000e+00> : vector<2x512xf32>
    %271 = tpu.matmul %269, %239, %cst_54 {dimension_numbers = #tpu.dot_dimension_numbers<[1], [0], [0], [1], [0, 0, 1, 1], [], []>} : vector<2x128xf32>, vector<128x512xf32>, vector<2x512xf32> -> vector<2x512xf32>
    %272 = arith.addf %270, %271 : vector<2x512xf32>
    %273 = vector.extract_strided_slice %272 {offsets = [0, 0], sizes = [2, 128], strides = [1, 1]} : vector<2x512xf32> to vector<2x128xf32>
    %274 = arith.negf %273 : vector<2x128xf32>
    %275 = math.exp %274 : vector<2x128xf32>
    %cst_55 = arith.constant 1.000000e+00 : f32
    %276 = vector.broadcast %cst_55 : f32 to vector<2x128xf32>
    %277 = arith.addf %276, %275 : vector<2x128xf32>
    %278 = arith.divf %276, %277 : vector<2x128xf32>
    %279 = vector.extract_strided_slice %272 {offsets = [0, 128], sizes = [2, 128], strides = [1, 1]} : vector<2x512xf32> to vector<2x128xf32>
    %280 = arith.negf %279 : vector<2x128xf32>
    %281 = math.exp %280 : vector<2x128xf32>
    %cst_56 = arith.constant 1.000000e+00 : f32
    %282 = vector.broadcast %cst_56 : f32 to vector<2x128xf32>
    %283 = arith.addf %282, %281 : vector<2x128xf32>
    %284 = arith.divf %282, %283 : vector<2x128xf32>
    %285 = vector.extract_strided_slice %272 {offsets = [0, 256], sizes = [2, 128], strides = [1, 1]} : vector<2x512xf32> to vector<2x128xf32>
    %286 = math.tanh %285 : vector<2x128xf32>
    %287 = vector.extract_strided_slice %272 {offsets = [0, 384], sizes = [2, 128], strides = [1, 1]} : vector<2x512xf32> to vector<2x128xf32>
    %288 = arith.negf %287 : vector<2x128xf32>
    %289 = math.exp %288 : vector<2x128xf32>
    %cst_57 = arith.constant 1.000000e+00 : f32
    %290 = vector.broadcast %cst_57 : f32 to vector<2x128xf32>
    %291 = arith.addf %290, %289 : vector<2x128xf32>
    %292 = arith.divf %290, %291 : vector<2x128xf32>
    %293 = arith.mulf %284, %267 : vector<2x128xf32>
    %294 = arith.mulf %278, %286 : vector<2x128xf32>
    %295 = arith.addf %293, %294 : vector<2x128xf32>
    %296 = math.tanh %295 : vector<2x128xf32>
    %297 = arith.mulf %292, %296 : vector<2x128xf32>
    %298 = vector.extract_strided_slice %238 {offsets = [4, 0], sizes = [2, 512], strides = [1, 1]} : vector<16x512xf32> to vector<2x512xf32>
    %cst_58 = arith.constant dense<0.000000e+00> : vector<2x512xf32>
    %299 = tpu.matmul %297, %239, %cst_58 {dimension_numbers = #tpu.dot_dimension_numbers<[1], [0], [0], [1], [0, 0, 1, 1], [], []>} : vector<2x128xf32>, vector<128x512xf32>, vector<2x512xf32> -> vector<2x512xf32>
    %300 = arith.addf %298, %299 : vector<2x512xf32>
    %301 = vector.extract_strided_slice %300 {offsets = [0, 0], sizes = [2, 128], strides = [1, 1]} : vector<2x512xf32> to vector<2x128xf32>
    %302 = arith.negf %301 : vector<2x128xf32>
    %303 = math.exp %302 : vector<2x128xf32>
    %cst_59 = arith.constant 1.000000e+00 : f32
    %304 = vector.broadcast %cst_59 : f32 to vector<2x128xf32>
    %305 = arith.addf %304, %303 : vector<2x128xf32>
    %306 = arith.divf %304, %305 : vector<2x128xf32>
    %307 = vector.extract_strided_slice %300 {offsets = [0, 128], sizes = [2, 128], strides = [1, 1]} : vector<2x512xf32> to vector<2x128xf32>
    %308 = arith.negf %307 : vector<2x128xf32>
    %309 = math.exp %308 : vector<2x128xf32>
    %cst_60 = arith.constant 1.000000e+00 : f32
    %310 = vector.broadcast %cst_60 : f32 to vector<2x128xf32>
    %311 = arith.addf %310, %309 : vector<2x128xf32>
    %312 = arith.divf %310, %311 : vector<2x128xf32>
    %313 = vector.extract_strided_slice %300 {offsets = [0, 256], sizes = [2, 128], strides = [1, 1]} : vector<2x512xf32> to vector<2x128xf32>
    %314 = math.tanh %313 : vector<2x128xf32>
    %315 = vector.extract_strided_slice %300 {offsets = [0, 384], sizes = [2, 128], strides = [1, 1]} : vector<2x512xf32> to vector<2x128xf32>
    %316 = arith.negf %315 : vector<2x128xf32>
    %317 = math.exp %316 : vector<2x128xf32>
    %cst_61 = arith.constant 1.000000e+00 : f32
    %318 = vector.broadcast %cst_61 : f32 to vector<2x128xf32>
    %319 = arith.addf %318, %317 : vector<2x128xf32>
    %320 = arith.divf %318, %319 : vector<2x128xf32>
    %321 = arith.mulf %312, %295 : vector<2x128xf32>
    %322 = arith.mulf %306, %314 : vector<2x128xf32>
    %323 = arith.addf %321, %322 : vector<2x128xf32>
    %324 = math.tanh %323 : vector<2x128xf32>
    %325 = arith.mulf %320, %324 : vector<2x128xf32>
    %326 = vector.extract_strided_slice %238 {offsets = [6, 0], sizes = [2, 512], strides = [1, 1]} : vector<16x512xf32> to vector<2x512xf32>
    %cst_62 = arith.constant dense<0.000000e+00> : vector<2x512xf32>
    %327 = tpu.matmul %325, %239, %cst_62 {dimension_numbers = #tpu.dot_dimension_numbers<[1], [0], [0], [1], [0, 0, 1, 1], [], []>} : vector<2x128xf32>, vector<128x512xf32>, vector<2x512xf32> -> vector<2x512xf32>
    %328 = arith.addf %326, %327 : vector<2x512xf32>
    %329 = vector.extract_strided_slice %328 {offsets = [0, 0], sizes = [2, 128], strides = [1, 1]} : vector<2x512xf32> to vector<2x128xf32>
    %330 = arith.negf %329 : vector<2x128xf32>
    %331 = math.exp %330 : vector<2x128xf32>
    %cst_63 = arith.constant 1.000000e+00 : f32
    %332 = vector.broadcast %cst_63 : f32 to vector<2x128xf32>
    %333 = arith.addf %332, %331 : vector<2x128xf32>
    %334 = arith.divf %332, %333 : vector<2x128xf32>
    %335 = vector.extract_strided_slice %328 {offsets = [0, 128], sizes = [2, 128], strides = [1, 1]} : vector<2x512xf32> to vector<2x128xf32>
    %336 = arith.negf %335 : vector<2x128xf32>
    %337 = math.exp %336 : vector<2x128xf32>
    %cst_64 = arith.constant 1.000000e+00 : f32
    %338 = vector.broadcast %cst_64 : f32 to vector<2x128xf32>
    %339 = arith.addf %338, %337 : vector<2x128xf32>
    %340 = arith.divf %338, %339 : vector<2x128xf32>
    %341 = vector.extract_strided_slice %328 {offsets = [0, 256], sizes = [2, 128], strides = [1, 1]} : vector<2x512xf32> to vector<2x128xf32>
    %342 = math.tanh %341 : vector<2x128xf32>
    %343 = vector.extract_strided_slice %328 {offsets = [0, 384], sizes = [2, 128], strides = [1, 1]} : vector<2x512xf32> to vector<2x128xf32>
    %344 = arith.negf %343 : vector<2x128xf32>
    %345 = math.exp %344 : vector<2x128xf32>
    %cst_65 = arith.constant 1.000000e+00 : f32
    %346 = vector.broadcast %cst_65 : f32 to vector<2x128xf32>
    %347 = arith.addf %346, %345 : vector<2x128xf32>
    %348 = arith.divf %346, %347 : vector<2x128xf32>
    %349 = arith.mulf %340, %323 : vector<2x128xf32>
    %350 = arith.mulf %334, %342 : vector<2x128xf32>
    %351 = arith.addf %349, %350 : vector<2x128xf32>
    %352 = math.tanh %351 : vector<2x128xf32>
    %353 = arith.mulf %348, %352 : vector<2x128xf32>
    %354 = vector.extract_strided_slice %238 {offsets = [8, 0], sizes = [2, 512], strides = [1, 1]} : vector<16x512xf32> to vector<2x512xf32>
    %cst_66 = arith.constant dense<0.000000e+00> : vector<2x512xf32>
    %355 = tpu.matmul %353, %239, %cst_66 {dimension_numbers = #tpu.dot_dimension_numbers<[1], [0], [0], [1], [0, 0, 1, 1], [], []>} : vector<2x128xf32>, vector<128x512xf32>, vector<2x512xf32> -> vector<2x512xf32>
    %356 = arith.addf %354, %355 : vector<2x512xf32>
    %357 = vector.extract_strided_slice %356 {offsets = [0, 0], sizes = [2, 128], strides = [1, 1]} : vector<2x512xf32> to vector<2x128xf32>
    %358 = arith.negf %357 : vector<2x128xf32>
    %359 = math.exp %358 : vector<2x128xf32>
    %cst_67 = arith.constant 1.000000e+00 : f32
    %360 = vector.broadcast %cst_67 : f32 to vector<2x128xf32>
    %361 = arith.addf %360, %359 : vector<2x128xf32>
    %362 = arith.divf %360, %361 : vector<2x128xf32>
    %363 = vector.extract_strided_slice %356 {offsets = [0, 128], sizes = [2, 128], strides = [1, 1]} : vector<2x512xf32> to vector<2x128xf32>
    %364 = arith.negf %363 : vector<2x128xf32>
    %365 = math.exp %364 : vector<2x128xf32>
    %cst_68 = arith.constant 1.000000e+00 : f32
    %366 = vector.broadcast %cst_68 : f32 to vector<2x128xf32>
    %367 = arith.addf %366, %365 : vector<2x128xf32>
    %368 = arith.divf %366, %367 : vector<2x128xf32>
    %369 = vector.extract_strided_slice %356 {offsets = [0, 256], sizes = [2, 128], strides = [1, 1]} : vector<2x512xf32> to vector<2x128xf32>
    %370 = math.tanh %369 : vector<2x128xf32>
    %371 = vector.extract_strided_slice %356 {offsets = [0, 384], sizes = [2, 128], strides = [1, 1]} : vector<2x512xf32> to vector<2x128xf32>
    %372 = arith.negf %371 : vector<2x128xf32>
    %373 = math.exp %372 : vector<2x128xf32>
    %cst_69 = arith.constant 1.000000e+00 : f32
    %374 = vector.broadcast %cst_69 : f32 to vector<2x128xf32>
    %375 = arith.addf %374, %373 : vector<2x128xf32>
    %376 = arith.divf %374, %375 : vector<2x128xf32>
    %377 = arith.mulf %368, %351 : vector<2x128xf32>
    %378 = arith.mulf %362, %370 : vector<2x128xf32>
    %379 = arith.addf %377, %378 : vector<2x128xf32>
    %380 = math.tanh %379 : vector<2x128xf32>
    %381 = arith.mulf %376, %380 : vector<2x128xf32>
    %382 = vector.extract_strided_slice %238 {offsets = [10, 0], sizes = [2, 512], strides = [1, 1]} : vector<16x512xf32> to vector<2x512xf32>
    %cst_70 = arith.constant dense<0.000000e+00> : vector<2x512xf32>
    %383 = tpu.matmul %381, %239, %cst_70 {dimension_numbers = #tpu.dot_dimension_numbers<[1], [0], [0], [1], [0, 0, 1, 1], [], []>} : vector<2x128xf32>, vector<128x512xf32>, vector<2x512xf32> -> vector<2x512xf32>
    %384 = arith.addf %382, %383 : vector<2x512xf32>
    %385 = vector.extract_strided_slice %384 {offsets = [0, 0], sizes = [2, 128], strides = [1, 1]} : vector<2x512xf32> to vector<2x128xf32>
    %386 = arith.negf %385 : vector<2x128xf32>
    %387 = math.exp %386 : vector<2x128xf32>
    %cst_71 = arith.constant 1.000000e+00 : f32
    %388 = vector.broadcast %cst_71 : f32 to vector<2x128xf32>
    %389 = arith.addf %388, %387 : vector<2x128xf32>
    %390 = arith.divf %388, %389 : vector<2x128xf32>
    %391 = vector.extract_strided_slice %384 {offsets = [0, 128], sizes = [2, 128], strides = [1, 1]} : vector<2x512xf32> to vector<2x128xf32>
    %392 = arith.negf %391 : vector<2x128xf32>
    %393 = math.exp %392 : vector<2x128xf32>
    %cst_72 = arith.constant 1.000000e+00 : f32
    %394 = vector.broadcast %cst_72 : f32 to vector<2x128xf32>
    %395 = arith.addf %394, %393 : vector<2x128xf32>
    %396 = arith.divf %394, %395 : vector<2x128xf32>
    %397 = vector.extract_strided_slice %384 {offsets = [0, 256], sizes = [2, 128], strides = [1, 1]} : vector<2x512xf32> to vector<2x128xf32>
    %398 = math.tanh %397 : vector<2x128xf32>
    %399 = vector.extract_strided_slice %384 {offsets = [0, 384], sizes = [2, 128], strides = [1, 1]} : vector<2x512xf32> to vector<2x128xf32>
    %400 = arith.negf %399 : vector<2x128xf32>
    %401 = math.exp %400 : vector<2x128xf32>
    %cst_73 = arith.constant 1.000000e+00 : f32
    %402 = vector.broadcast %cst_73 : f32 to vector<2x128xf32>
    %403 = arith.addf %402, %401 : vector<2x128xf32>
    %404 = arith.divf %402, %403 : vector<2x128xf32>
    %405 = arith.mulf %396, %379 : vector<2x128xf32>
    %406 = arith.mulf %390, %398 : vector<2x128xf32>
    %407 = arith.addf %405, %406 : vector<2x128xf32>
    %408 = math.tanh %407 : vector<2x128xf32>
    %409 = arith.mulf %404, %408 : vector<2x128xf32>
    %410 = vector.extract_strided_slice %238 {offsets = [12, 0], sizes = [2, 512], strides = [1, 1]} : vector<16x512xf32> to vector<2x512xf32>
    %cst_74 = arith.constant dense<0.000000e+00> : vector<2x512xf32>
    %411 = tpu.matmul %409, %239, %cst_74 {dimension_numbers = #tpu.dot_dimension_numbers<[1], [0], [0], [1], [0, 0, 1, 1], [], []>} : vector<2x128xf32>, vector<128x512xf32>, vector<2x512xf32> -> vector<2x512xf32>
    %412 = arith.addf %410, %411 : vector<2x512xf32>
    %413 = vector.extract_strided_slice %412 {offsets = [0, 0], sizes = [2, 128], strides = [1, 1]} : vector<2x512xf32> to vector<2x128xf32>
    %414 = arith.negf %413 : vector<2x128xf32>
    %415 = math.exp %414 : vector<2x128xf32>
    %cst_75 = arith.constant 1.000000e+00 : f32
    %416 = vector.broadcast %cst_75 : f32 to vector<2x128xf32>
    %417 = arith.addf %416, %415 : vector<2x128xf32>
    %418 = arith.divf %416, %417 : vector<2x128xf32>
    %419 = vector.extract_strided_slice %412 {offsets = [0, 128], sizes = [2, 128], strides = [1, 1]} : vector<2x512xf32> to vector<2x128xf32>
    %420 = arith.negf %419 : vector<2x128xf32>
    %421 = math.exp %420 : vector<2x128xf32>
    %cst_76 = arith.constant 1.000000e+00 : f32
    %422 = vector.broadcast %cst_76 : f32 to vector<2x128xf32>
    %423 = arith.addf %422, %421 : vector<2x128xf32>
    %424 = arith.divf %422, %423 : vector<2x128xf32>
    %425 = vector.extract_strided_slice %412 {offsets = [0, 256], sizes = [2, 128], strides = [1, 1]} : vector<2x512xf32> to vector<2x128xf32>
    %426 = math.tanh %425 : vector<2x128xf32>
    %427 = vector.extract_strided_slice %412 {offsets = [0, 384], sizes = [2, 128], strides = [1, 1]} : vector<2x512xf32> to vector<2x128xf32>
    %428 = arith.negf %427 : vector<2x128xf32>
    %429 = math.exp %428 : vector<2x128xf32>
    %cst_77 = arith.constant 1.000000e+00 : f32
    %430 = vector.broadcast %cst_77 : f32 to vector<2x128xf32>
    %431 = arith.addf %430, %429 : vector<2x128xf32>
    %432 = arith.divf %430, %431 : vector<2x128xf32>
    %433 = arith.mulf %424, %407 : vector<2x128xf32>
    %434 = arith.mulf %418, %426 : vector<2x128xf32>
    %435 = arith.addf %433, %434 : vector<2x128xf32>
    %436 = math.tanh %435 : vector<2x128xf32>
    %437 = arith.mulf %432, %436 : vector<2x128xf32>
    %438 = vector.extract_strided_slice %238 {offsets = [14, 0], sizes = [2, 512], strides = [1, 1]} : vector<16x512xf32> to vector<2x512xf32>
    %cst_78 = arith.constant dense<0.000000e+00> : vector<2x512xf32>
    %439 = tpu.matmul %437, %239, %cst_78 {dimension_numbers = #tpu.dot_dimension_numbers<[1], [0], [0], [1], [0, 0, 1, 1], [], []>} : vector<2x128xf32>, vector<128x512xf32>, vector<2x512xf32> -> vector<2x512xf32>
    %440 = arith.addf %438, %439 : vector<2x512xf32>
    %441 = vector.extract_strided_slice %440 {offsets = [0, 0], sizes = [2, 128], strides = [1, 1]} : vector<2x512xf32> to vector<2x128xf32>
    %442 = arith.negf %441 : vector<2x128xf32>
    %443 = math.exp %442 : vector<2x128xf32>
    %cst_79 = arith.constant 1.000000e+00 : f32
    %444 = vector.broadcast %cst_79 : f32 to vector<2x128xf32>
    %445 = arith.addf %444, %443 : vector<2x128xf32>
    %446 = arith.divf %444, %445 : vector<2x128xf32>
    %447 = vector.extract_strided_slice %440 {offsets = [0, 128], sizes = [2, 128], strides = [1, 1]} : vector<2x512xf32> to vector<2x128xf32>
    %448 = arith.negf %447 : vector<2x128xf32>
    %449 = math.exp %448 : vector<2x128xf32>
    %cst_80 = arith.constant 1.000000e+00 : f32
    %450 = vector.broadcast %cst_80 : f32 to vector<2x128xf32>
    %451 = arith.addf %450, %449 : vector<2x128xf32>
    %452 = arith.divf %450, %451 : vector<2x128xf32>
    %453 = vector.extract_strided_slice %440 {offsets = [0, 256], sizes = [2, 128], strides = [1, 1]} : vector<2x512xf32> to vector<2x128xf32>
    %454 = math.tanh %453 : vector<2x128xf32>
    %455 = vector.extract_strided_slice %440 {offsets = [0, 384], sizes = [2, 128], strides = [1, 1]} : vector<2x512xf32> to vector<2x128xf32>
    %456 = arith.negf %455 : vector<2x128xf32>
    %457 = math.exp %456 : vector<2x128xf32>
    %cst_81 = arith.constant 1.000000e+00 : f32
    %458 = vector.broadcast %cst_81 : f32 to vector<2x128xf32>
    %459 = arith.addf %458, %457 : vector<2x128xf32>
    %460 = arith.divf %458, %459 : vector<2x128xf32>
    %461 = arith.mulf %452, %435 : vector<2x128xf32>
    %462 = arith.mulf %446, %454 : vector<2x128xf32>
    %463 = arith.addf %461, %462 : vector<2x128xf32>
    %464 = math.tanh %463 : vector<2x128xf32>
    %465 = arith.mulf %460, %464 : vector<2x128xf32>
    %466 = tpu.concatenate %232, %465 in 0 : vector<2x128xf32>, vector<2x128xf32> -> vector<4x128xf32>
    %cst_82 = arith.constant 0.000000e+00 : f32
    %467 = vector.broadcast %cst_82 : f32 to vector<4x128xf32>
    %468 = arith.maximumf %466, %467 : vector<4x128xf32>
    %c0_83 = arith.constant 0 : index
    %c0_84 = arith.constant 0 : index
    %469 = vector.load %arg7[%c0_83, %c0_84] : memref<128x128xf32, #tpu.memory_space<vmem>>, vector<128x128xf32>
    %cst_85 = arith.constant dense<0.000000e+00> : vector<4x128xf32>
    %470 = tpu.matmul %468, %469, %cst_85 {dimension_numbers = #tpu.dot_dimension_numbers<[1], [0], [0], [1], [0, 0, 1, 1], [], []>} : vector<4x128xf32>, vector<128x128xf32>, vector<4x128xf32> -> vector<4x128xf32>
    %c0_86 = arith.constant 0 : index
    %c0_87 = arith.constant 0 : index
    %471 = vector.load %arg8[%c0_86, %c0_87] : memref<1x128xf32, #tpu.memory_space<vmem>>, vector<1x128xf32>
    %472 = vector.broadcast %471 : vector<1x128xf32> to vector<4x128xf32>
    %473 = arith.addf %470, %472 : vector<4x128xf32>
    %cst_88 = arith.constant 0.000000e+00 : f32
    %474 = vector.broadcast %cst_88 : f32 to vector<4x128xf32>
    %475 = arith.maximumf %473, %474 : vector<4x128xf32>
    %c0_89 = arith.constant 0 : index
    %c0_90 = arith.constant 0 : index
    %476 = vector.load %arg9[%c0_89, %c0_90] : memref<128x128xf32, #tpu.memory_space<vmem>>, vector<128x128xf32>
    %cst_91 = arith.constant dense<0.000000e+00> : vector<4x128xf32>
    %477 = tpu.matmul %475, %476, %cst_91 {dimension_numbers = #tpu.dot_dimension_numbers<[1], [0], [0], [1], [0, 0, 1, 1], [], []>} : vector<4x128xf32>, vector<128x128xf32>, vector<4x128xf32> -> vector<4x128xf32>
    %c0_92 = arith.constant 0 : index
    %c0_93 = arith.constant 0 : index
    %478 = vector.load %arg10[%c0_92, %c0_93] : memref<1x128xf32, #tpu.memory_space<vmem>>, vector<1x128xf32>
    %479 = vector.broadcast %478 : vector<1x128xf32> to vector<4x128xf32>
    %480 = arith.addf %477, %479 : vector<4x128xf32>
    %c0_94 = arith.constant 0 : index
    %c0_95 = arith.constant 0 : index
    %481 = vector.load %arg11[%c0_94, %c0_95] : memref<4x128xf32, #tpu.memory_space<vmem>>, vector<4x128xf32>
    tpu.vector_store %arg11[%c0_94, %c0_95], %480 {strides = array<i32>} : memref<4x128xf32, #tpu.memory_space<vmem>>, vector<4x128xf32>,
    return
  }
}

</mosaic_0001>

<bundles_post_ra>
// kernel: tpu_custom_call.1
= control target key start
LH: loop header
LB: loop body
LE: loop exit
PB: predicated region body
PF: predicated region fallthrough
CT: control target
= control target key end

     0   :  { %16 = vsyncpa [#allocation3], 0  ;;  %s6784_s0 = inlined_call_operand.hbm [shape: f32[16,16], index: 0, kind: input, shape index: {}]   ;;  %s6785_s1 = inlined_call_operand.hbm [shape: f32[16,512], index: 1, kind: input, shape index: {}]   ;;  %s6786_s2 = inlined_call_operand.hbm [shape: f32[128,512], index: 2, kind: input, shape index: {}]   ;;  %s6787_s3 = inlined_call_operand.vmem [shape: f32[1,512], index: 3, kind: input, shape index: {}]   ;;  %s6788_s4 = inlined_call_operand.hbm [shape: f32[128,512], index: 4, kind: input, shape index: {}]   ;;  %s6789_s5 = inlined_call_operand.hbm [shape: f32[128,512], index: 5, kind: input, shape index: {}]   ;;  %s6790_s6 = inlined_call_operand.vmem [shape: f32[1,512], index: 6, kind: input, shape index: {}]   ;;  %s6791_s7 = inlined_call_operand.hbm [shape: f32[128,128], index: 7, kind: input, shape index: {}]   ;;  %s6792_s8 = inlined_call_operand.vmem [shape: f32[1,128], index: 8, kind: input, shape index: {}]   ;;  %s6793_s9 = inlined_call_operand.hbm [shape: f32[128,128], index: 9, kind: input, shape index: {}]   ;;  %s6794_s10 = inlined_call_operand.vmem [shape: f32[1,128], index: 10, kind: input, shape index: {}]   ;;  %s6795_s11 = inlined_call_operand.hbm [shape: f32[4,128], index: 11, kind: output, shape index: {}]  }
   0x1   :  { %17 = vsyncpa [#allocation6], 0 }
   0x2   :  { %18 = vsyncpa [#allocation9], 0 }
   0x3   :  { %19 = vsyncpa [#allocation12], 0 }
   0x4   :  { %20 = vsyncpa [#allocation4], 0  ;;  %s5613_s17 = smov [#allocation5]   ;;  %s5427_s21 = scalar_lea.hbm %s6785_s1, 1024 }
   0x5   :  { %s38_s18 = sshll.u32 %s5613_s17, 4  ;;  %p5428_p0 = scmp.ne.s32.totalorder %s6785_s1, %s5427_s21  ;;  %s39_s18 = int_to_ptr.vmem [resolvable:$true] %s38_s18 }
   0x6   :  { %p5431_p1 = scmp.lt.u32.totalorder %s5427_s21, %s6785_s1 }
   0x8   :  { %p5433_p2 = pnand %p5431_p1, %p5428_p0 }
   0xa   :  { %5436 = shalt.err (!%p5433_p2)
}
   0xb   :  { %s5437_s26 = scalar_lea.vmem %s39_s18, 1024  ;;  %p5442_p4 = scmp.lt.s32.totalorder %s39_s18, %s39_s18 }
   0xc   :  { %p5438_p3 = scmp.ne.s32.totalorder %s39_s18, %s5437_s26  ;;  %p5443_p5 = scmp.lt.s32.totalorder %s5437_s26, %s5437_s26 }
   0xe   :  { %p5444_p6 = por %p5443_p5, %p5442_p4 }
  0x10   :  { %p5445_p7 = pnand %p5444_p6, %p5438_p3 }
  0x12   :  { %5448 = shalt.err (!%p5445_p7)
}
  0x13   :  { %s5614_s27 = smov 512   ;;  %s5615_s28 = smov 32  }
  0x14   :  { %44 = dma.hbm_to_vmem [thread:$0]  %s6785_s1, 1024, %s39_s18, [#allocation6], %s5614_s27, %s5614_s27, %s5615_s28  }
  0x15   :  { %s5616_s12 = smov [#allocation8]   ;;  %s5449_s16 = scalar_lea.hbm %s6788_s4, 8192 }
  0x16   :  { %s64_s13 = sshll.u32 %s5616_s12, 4  ;;  %p5450_p8 = scmp.ne.s32.totalorder %s6788_s4, %s5449_s16  ;;  %s65_s13 = int_to_ptr.vmem [resolvable:$true] %s64_s13 }
  0x17   :  { %p5453_p9 = scmp.lt.u32.totalorder %s5449_s16, %s6788_s4 }
  0x19   :  { %p5455_p10 = pnand %p5453_p9, %p5450_p8 }
  0x1b   :  { %5458 = shalt.err (!%p5455_p10)
}
  0x1c   :  { %s5459_s22 = scalar_lea.vmem %s65_s13, 8192  ;;  %p5464_p12 = scmp.lt.s32.totalorder %s65_s13, %s65_s13 }
  0x1d   :  { %p5460_p11 = scmp.ne.s32.totalorder %s65_s13, %s5459_s22  ;;  %p5465_p13 = scmp.lt.s32.totalorder %s5459_s22, %s5459_s22 }
  0x1f   :  { %p5466_p0 = por %p5465_p13, %p5464_p12 }
  0x21   :  { %p5467_p1 = pnand %p5466_p0, %p5460_p11 }
  0x23   :  { %5470 = shalt.err (!%p5467_p1)
}
  0x24   :  { %70 = dma.hbm_to_vmem [thread:$0]  %s6788_s4, 8192, %s65_s13, [#allocation9], %s5614_s27, %s5614_s27, %s5615_s28  }
  0x25   :  { %s5617_s23 = smov [#allocation11]   ;;  %s5618_s25 = smov [#allocation2]  }
  0x26   :  { %s90_s24 = sshll.u32 %s5617_s23, 4  ;;  %s26_s26 = sshll.u32 %s5618_s25, 4  ;;  %s91_s24 = int_to_ptr.vmem [resolvable:$true] %s90_s24  ;;  %s5718_s26 = int_to_ptr.vmem [resolvable:$true] %s26_s26 }
  0x27   :  { %s5471_s12 = scalar_lea.hbm %s6791_s7, 2048 }
  0x28   :  { %p5472_p2 = scmp.ne.s32.totalorder %s6791_s7, %s5471_s12  ;;  %p5475_p3 = scmp.lt.u32.totalorder %s5471_s12, %s6791_s7 }
  0x2a   :  { %p5477_p4 = pnand %p5475_p3, %p5472_p2 }
  0x2c   :  { %5480 = shalt.err (!%p5477_p4)
}
  0x2d   :  { %s5481_s4 = scalar_lea.vmem %s91_s24, 2048  ;;  %p5486_p6 = scmp.lt.s32.totalorder %s91_s24, %s91_s24 }
  0x2e   :  { %p5482_p5 = scmp.ne.s32.totalorder %s91_s24, %s5481_s4  ;;  %p5487_p7 = scmp.lt.s32.totalorder %s5481_s4, %s5481_s4 }
  0x30   :  { %p5488_p8 = por %p5487_p7, %p5486_p6 }
  0x32   :  { %p5489_p9 = pnand %p5488_p8, %p5482_p5 }
  0x34   :  { %5492 = shalt.err (!%p5489_p9)
}
  0x35   :  { %s5619_s13 = smov 128   ;;  %s5620_s19 = smov 8  }
  0x36   :  { %96 = dma.hbm_to_vmem [thread:$0]  %s6791_s7, 2048, %s91_s24, [#allocation12], %s5619_s13, %s5619_s13, %s5620_s19  }
  0x37   :  { %s5493_s18 = scalar_lea.hbm %s6784_s0, 256 }
  0x38   :  { %p5494_p10 = scmp.ne.s32.totalorder %s6784_s0, %s5493_s18  ;;  %p5497_p11 = scmp.lt.u32.totalorder %s5493_s18, %s6784_s0 }
  0x3a   :  { %p5499_p12 = pnand %p5497_p11, %p5494_p10 }
  0x3c   :  { %5502 = shalt.err (!%p5499_p12)
}
  0x3d   :  { %s5503_s12 = scalar_lea.vmem %s5718_s26, 256  ;;  %p5508_p0 = scmp.lt.s32.totalorder %s5718_s26, %s5718_s26 }
  0x3e   :  { %p5504_p13 = scmp.ne.s32.totalorder %s5718_s26, %s5503_s12  ;;  %p5509_p1 = scmp.lt.s32.totalorder %s5503_s12, %s5503_s12 }
  0x40   :  { %p5510_p2 = por %p5509_p1, %p5508_p0 }
  0x42   :  { %p5511_p3 = pnand %p5510_p2, %p5504_p13 }
  0x44   :  { %5514 = shalt.err (!%p5511_p3)
}
  0x45   :  { %32 = dma.hbm_to_vmem [thread:$0]  %s6784_s0, 256, %s5718_s26, [#allocation3], %s5619_s13, %s5619_s13, %s5620_s19  }
  0x46   :  { %s5621_s14 = smov [#allocation7]   ;;  %s5622_s16 = smov [#allocation10]  }
  0x47   :  { %s50_s15 = sshll.u32 %s5621_s14, 4  ;;  %s76_s17 = sshll.u32 %s5622_s16, 4  ;;  %s51_s15 = int_to_ptr.vmem [resolvable:$true] %s50_s15  ;;  %s5755_s17 = int_to_ptr.vmem [resolvable:$true] %s76_s17 }
  0x48   :  { %s5515_s21 = scalar_lea.hbm %s6786_s2, 8192 }
  0x49   :  { %p5516_p4 = scmp.ne.s32.totalorder %s6786_s2, %s5515_s21  ;;  %p5519_p5 = scmp.lt.u32.totalorder %s5515_s21, %s6786_s2 }
  0x4b   :  { %p5521_p6 = pnand %p5519_p5, %p5516_p4 }
  0x4d   :  { %5524 = shalt.err (!%p5521_p6)
}
  0x4e   :  { %s5525_s0 = scalar_lea.vmem %s51_s15, 8192  ;;  %p5530_p8 = scmp.lt.s32.totalorder %s51_s15, %s51_s15 }
  0x4f   :  { %p5526_p7 = scmp.ne.s32.totalorder %s51_s15, %s5525_s0  ;;  %p5531_p9 = scmp.lt.s32.totalorder %s5525_s0, %s5525_s0 }
  0x51   :  { %p5532_p10 = por %p5531_p9, %p5530_p8 }
  0x53   :  { %p5533_p11 = pnand %p5532_p10, %p5526_p7 }
  0x55   :  { %5536 = shalt.err (!%p5533_p11)
}
  0x56   :  { %56 = dma.hbm_to_vmem [thread:$0]  %s6786_s2, 8192, %s51_s15, [#allocation6], %s5614_s27, %s5614_s27, %s5615_s28  }
  0x57   :  { %s5537_s12 = scalar_lea.hbm %s6789_s5, 8192 }
  0x58   :  { %p5538_p12 = scmp.ne.s32.totalorder %s6789_s5, %s5537_s12  ;;  %p5541_p13 = scmp.lt.u32.totalorder %s5537_s12, %s6789_s5 }
  0x5a   :  { %p5543_p0 = pnand %p5541_p13, %p5538_p12 }
  0x5c   :  { %5546 = shalt.err (!%p5543_p0)
}
  0x5d   :  { %s5547_s4 = scalar_lea.vmem %s5755_s17, 8192  ;;  %p5552_p2 = scmp.lt.s32.totalorder %s5755_s17, %s5755_s17 }
  0x5e   :  { %p5548_p1 = scmp.ne.s32.totalorder %s5755_s17, %s5547_s4  ;;  %p5553_p3 = scmp.lt.s32.totalorder %s5547_s4, %s5547_s4 }
  0x60   :  { %p5554_p4 = por %p5553_p3, %p5552_p2 }
  0x62   :  { %p5555_p5 = pnand %p5554_p4, %p5548_p1 }
  0x64   :  { %5558 = shalt.err (!%p5555_p5)
}
  0x65   :  { %82 = dma.hbm_to_vmem [thread:$0]  %s6789_s5, 8192, %s5755_s17, [#allocation9], %s5614_s27, %s5614_s27, %s5615_s28  }
  0x66   :  { %s5623_s20 = smov [#allocation13]   ;;  %s5559_s18 = scalar_lea.hbm %s6793_s9, 2048 }
  0x67   :  { %s104_s21 = sshll.u32 %s5623_s20, 4  ;;  %p5560_p6 = scmp.ne.s32.totalorder %s6793_s9, %s5559_s18  ;;  %s105_s21 = int_to_ptr.vmem [resolvable:$true] %s104_s21 }
  0x68   :  { %p5563_p7 = scmp.lt.u32.totalorder %s5559_s18, %s6793_s9 }
  0x6a   :  { %p5565_p8 = pnand %p5563_p7, %p5560_p6 }
  0x6c   :  { %5568 = shalt.err (!%p5565_p8)
}
  0x6d   :  { %s5569_s29 = scalar_lea.vmem %s105_s21, 2048  ;;  %p5574_p10 = scmp.lt.s32.totalorder %s105_s21, %s105_s21 }
  0x6e   :  { %p5570_p9 = scmp.ne.s32.totalorder %s105_s21, %s5569_s29  ;;  %p5575_p11 = scmp.lt.s32.totalorder %s5569_s29, %s5569_s29 }
  0x70   :  { %p5576_p12 = por %p5575_p11, %p5574_p10 }
  0x72   :  { %p5577_p13 = pnand %p5576_p12, %p5570_p9 }
  0x74   :  { %5580 = shalt.err (!%p5577_p13)
}
  0x75   :  { %110 = dma.hbm_to_vmem [thread:$0]  %s6793_s9, 2048, %s105_s21, [#allocation12], %s5619_s13, %s5619_s13, %s5620_s19  }
  0x76   :  { %5603 = dma.done.wait [#allocation3], 256  }
  0x77   :  { %5604 = vsyncadd [#allocation3], 4294967040 }
  0x78   :  { %5605 = dma.done.wait [#allocation6], 9216  }
  0x79   :  { %5606 = vsyncadd [#allocation6], 4294958080 }
  0x7a   :  { %5607 = dma.done.wait [#allocation9], 16384  }
  0x7b   :  { %5608 = vsyncadd [#allocation9], 4294950912 }
  0x7c   :  { %5609 = dma.done.wait [#allocation12], 4096  }
  0x7d   :  { %5610 = vsyncadd [#allocation12], 4294963200  ;;  %v5624_v0 = vmov 0.0   ;;  %v137_v1 = vld [vmem:[#allocation5 + $0x8] sm:$0xff]  ;;  %v139_v3 = vld [vmem:[#allocation5 + $0x18] sm:$0xff]  ;;  %vm166_vm0 = vcmask 130048  }
  0x7e   :  { %237 = vmatprep.mubr.f32.mxu0 %v5624_v0  ;;  %314 = vmatprep.mubr.f32.mxu1 %v5624_v0  ;;  %v141_v2 = vld [vmem:[#allocation5 + $0x28] sm:$0xff]  ;;  %v143_v5 = vld [vmem:[#allocation5 + $0x38] sm:$0xff]  ;;  %v136_v6 = vld [vmem:[#allocation5] sm:$0xff]  ;;  %vm1859_vm1 = vcmask 1041408   ;;  %vm1861_vm2 = vcmask 1043456   ;;  %vm1863_vm3 = vcmask 1045504  }
  0x7f   :  { %v4012_v4 = vpack.c.bf16 %v141_v2, %v137_v1  ;;  %v140_v7 = vld [vmem:[#allocation5 + $0x20] sm:$0xff]  ;;  %v4016_v8 = vpack.c.bf16 %v143_v5, %v139_v3  ;;  %v138_v10 = vld [vmem:[#allocation5 + $0x10] sm:$0xff]  ;;  %v328_v14 = vld [vmem:[#allocation7 + $0x8] sm:$0xff]  ;;  %vm5626_vm4 = vmmov 0   ;;  %s5627_s12 = smov [#allocation14]  }
  0x80   :  { %v4014_v9 = vpack.c.bf16 %v140_v7, %v136_v6  ;;  %v142_v11 = vld [vmem:[#allocation5 + $0x30] sm:$0xff]  ;;  %v332_v15 = vld [vmem:[#allocation7 + $0x28] sm:$0xff]  ;;  %v330_v16 = vld [vmem:[#allocation7 + $0x18] sm:$0xff]  ;;  %s3842_s7 = sshll.u32 %s5627_s12, 4  ;;  %s3843_s7 = int_to_ptr.vmem [resolvable:$true] %s3842_s7 }
  0x81   :  { %v134_v12 = vld [vmem:[#allocation2] sm:$0xff]  ;;  %4013 = vmatprep.subr.bf16.mxu0 %v4012_v4  ;;  %v4018_v13 = vpack.c.bf16 %v142_v11, %v138_v10  ;;  %4017 = vmatprep.subr.bf16.mxu1 %v4016_v8  ;;  %v5809_v17 = vpack.c.bf16 %v332_v15, %v328_v14  ;;  %v334_v18 = vld [vmem:[#allocation7 + $0x38] sm:$0xff]  ;;  %v327_v19 = vld [vmem:[#allocation7] sm:$0xff]  ;;  %s5581_s24 = scalar_lea.vmem %s3843_s7, 64  ;;  %p5586_p1 = scmp.lt.s32.totalorder %s3843_s7, %s3843_s7 }
  0x82   :  { %4015 = vmatpush1.bf16.msra.mxu0 %v4014_v9  ;;  %v331_v20 = vld [vmem:[#allocation7 + $0x20] sm:$0xff]  ;;  %v5811_v21 = vpack.c.bf16 %v334_v18, %v330_v16  ;;  %v329_v23 = vld [vmem:[#allocation7 + $0x10] sm:$0xff]  ;;  %v336_v25 = vld [vmem:[#allocation7 + $0x48] sm:$0xff]  ;;  %p5582_p0 = scmp.ne.s32.totalorder %s3843_s7, %s5581_s24  ;;  %p5587_p2 = scmp.lt.s32.totalorder %s5581_s24, %s5581_s24 }
  0x83   :  { %4019 = vmatpush1.bf16.msra.mxu1 %v4018_v13  ;;  %v5813_v22 = vpack.c.bf16 %v331_v20, %v327_v19  ;;  %v333_v24 = vld [vmem:[#allocation7 + $0x30] sm:$0xff]  ;;  %4021 = vmatprep.subr.bf16.mxu0 %v5809_v17  ;;  %v340_v27 = vld [vmem:[#allocation7 + $0x68] sm:$0xff]  ;;  %v338_v28 = vld [vmem:[#allocation7 + $0x58] sm:$0xff] }
  0x84   :  { %v5816_v26 = vpack.c.bf16 %v333_v24, %v329_v23  ;;  %v342_v29 = vld [vmem:[#allocation7 + $0x78] sm:$0xff]  ;;  %4053 = vmatprep.subr.bf16.mxu1 %v5811_v21  ;;  %v5820_v30 = vpack.c.bf16 %v340_v27, %v336_v25  ;;  %v335_v32 = vld [vmem:[#allocation7 + $0x40] sm:$0xff]  ;;  %v337_v34 = vld [vmem:[#allocation7 + $0x50] sm:$0xff]  ;;  %p5588_p3 = por %p5587_p2, %p5586_p1 }
  0x85   :  { %3854 = vmatmul.mubr.msk.f32.vlgmr.msra.gmra.mrb[0].mxu0 %vm166_vm0, %v134_v12  ;;  %v5822_v31 = vpack.c.bf16 %v342_v29, %v338_v28  ;;  %v339_v33 = vld [vmem:[#allocation7 + $0x60] sm:$0xff]  ;;  %v341_v36 = vld [vmem:[#allocation7 + $0x70] sm:$0xff]  ;;  %v344_v37 = vld [vmem:[#allocation7 + $0x88] sm:$0xff] }
  0x86   :  { %3856 = vmatmul.mubr.msk.f32.vlgmr.msra.gmra.mrb[0].mxu1 %vm166_vm0, %v134_v12  ;;  %4023 = vmatpush1.bf16.msra.mxu0 %v5813_v22  ;;  %v5826_v35 = vpack.c.bf16 %v339_v33, %v335_v32  ;;  %v348_v38 = vld [vmem:[#allocation7 + $0xa8] sm:$0xff]  ;;  %v5830_v39 = vpack.c.bf16 %v341_v36, %v337_v34  ;;  %v346_v41 = vld [vmem:[#allocation7 + $0x98] sm:$0xff]  ;;  %v343_v43 = vld [vmem:[#allocation7 + $0x80] sm:$0xff]  ;;  %p5589_p4 = pnand %p5588_p3, %p5582_p0 }
  0x87   :  { %4055 = vmatpush1.bf16.msra.mxu1 %v5816_v26  ;;  %4025 = vmatprep.subr.bf16.mxu0 %v5820_v30  ;;  %v5832_v40 = vpack.c.bf16 %v348_v38, %v344_v37  ;;  %v350_v42 = vld [vmem:[#allocation7 + $0xb8] sm:$0xff]  ;;  %v347_v45 = vld [vmem:[#allocation7 + $0xa0] sm:$0xff]  ;;  %v345_v46 = vld [vmem:[#allocation7 + $0x90] sm:$0xff] }
  0x88   :  { %4057 = vmatprep.subr.bf16.mxu1 %v5822_v31  ;;  %v5835_v44 = vpack.c.bf16 %v350_v42, %v346_v41  ;;  %v349_v47 = vld [vmem:[#allocation7 + $0xb0] sm:$0xff]  ;;  %243 = vmatprep.mubr.f32.mxu0 %v5624_v0  ;;  %v352_v48 = vld [vmem:[#allocation7 + $0xc8] sm:$0xff]  ;;  %v354_v50 = vld [vmem:[#allocation7 + $0xd8] sm:$0xff]  ;;  %v5840_v51 = vpack.c.bf16 %v347_v45, %v343_v43 }
  0x89   :  { %v356_v49 = vld [vmem:[#allocation7 + $0xe8] sm:$0xff]  ;;  %320 = vmatprep.mubr.f32.mxu1 %v5624_v0  ;;  %v358_v52 = vld [vmem:[#allocation7 + $0xf8] sm:$0xff]  ;;  %v5844_v53 = vpack.c.bf16 %v349_v47, %v345_v46  ;;  %v351_v55 = vld [vmem:[#allocation7 + $0xc0] sm:$0xff] }
  0x8a   :  { %4027 = vmatpush1.bf16.msra.mxu0 %v5826_v35  ;;  %v5846_v54 = vpack.c.bf16 %v356_v49, %v352_v48  ;;  %v355_v56 = vld [vmem:[#allocation7 + $0xe0] sm:$0xff]  ;;  %v353_v57 = vld [vmem:[#allocation7 + $0xd0] sm:$0xff]  ;;  %v5849_v58 = vpack.c.bf16 %v358_v52, %v354_v50  ;;  %v360_v60 = vld [vmem:[#allocation7 + $0x108] sm:$0xff] }
  0x8b   :  { %4059 = vmatpush1.bf16.msra.mxu1 %v5830_v39  ;;  %4029 = vmatprep.subr.bf16.mxu0 %v5832_v40  ;;  %v357_v59 = vld [vmem:[#allocation7 + $0xf0] sm:$0xff]  ;;  %v364_v61 = vld [vmem:[#allocation7 + $0x128] sm:$0xff]  ;;  %v362_v62 = vld [vmem:[#allocation7 + $0x118] sm:$0xff]  ;;  %v5852_v1 = vpack.c.bf16 %v355_v56, %v351_v55 }
  0x8c   :  { %4061 = vmatprep.subr.bf16.mxu1 %v5835_v44  ;;  %v366_v63 = vld [vmem:[#allocation7 + $0x138] sm:$0xff]  ;;  %v5856_v2 = vpack.c.bf16 %v357_v59, %v353_v57  ;;  %v5858_v3 = vpack.c.bf16 %v364_v61, %v360_v60  ;;  %v359_v4 = vld [vmem:[#allocation7 + $0x100] sm:$0xff]  ;;  %v361_v6 = vld [vmem:[#allocation7 + $0x110] sm:$0xff] }
  0x8d   :  { %v363_v5 = vld [vmem:[#allocation7 + $0x120] sm:$0xff]  ;;  %v5861_v7 = vpack.c.bf16 %v366_v63, %v362_v62  ;;  %v365_v8 = vld [vmem:[#allocation7 + $0x130] sm:$0xff]  ;;  %v368_v9 = vld [vmem:[#allocation7 + $0x148] sm:$0xff] }
  0x8e   :  { %4031 = vmatpush1.bf16.msra.mxu0 %v5840_v51  ;;  %v372_v10 = vld [vmem:[#allocation7 + $0x168] sm:$0xff]  ;;  %v370_v11 = vld [vmem:[#allocation7 + $0x158] sm:$0xff]  ;;  %v5864_v13 = vpack.c.bf16 %v363_v5, %v359_v4  ;;  %v367_v14 = vld [vmem:[#allocation7 + $0x140] sm:$0xff]  ;;  %v5868_v15 = vpack.c.bf16 %v365_v8, %v361_v6  ;;  %v146_v5 = vlaneseq }
  0x8f   :  { %4063 = vmatpush1.bf16.msra.mxu1 %v5844_v53  ;;  %4033 = vmatprep.subr.bf16.mxu0 %v5846_v54  ;;  %v374_v12 = vld [vmem:[#allocation7 + $0x178] sm:$0xff]  ;;  %v5870_v16 = vpack.c.bf16 %v372_v10, %v368_v9  ;;  %v371_v18 = vld [vmem:[#allocation7 + $0x160] sm:$0xff]  ;;  %v369_v19 = vld [vmem:[#allocation7 + $0x150] sm:$0xff] }
  0x90   :  { %4065 = vmatprep.subr.bf16.mxu1 %v5849_v58  ;;  %v135_v20 = vld [vmem:[#allocation2 + $0x8] sm:$0xff]  ;;  %v5873_v23 = vpack.c.bf16 %v374_v12, %v370_v11  ;;  %v373_v24 = vld [vmem:[#allocation7 + $0x170] sm:$0xff]  ;;  %v376_v25 = vld [vmem:[#allocation7 + $0x188] sm:$0xff]  ;;  %v5879_v32 = vpack.c.bf16 %v371_v18, %v367_v14  ;;  %v5951_v8 = vshrl.u32 %v146_v5, 7 }
  0x91   :  { %v380_v27 = vld [vmem:[#allocation7 + $0x1a8] sm:$0xff]  ;;  %3855 = vmatmul.mubr.msk.f32.gmra.mrb[2].mxu0 %vm166_vm0, %v135_v20  ;;  %v378_v28 = vld [vmem:[#allocation7 + $0x198] sm:$0xff]  ;;  %3857 = vmatmul.mubr.msk.f32.gmra.mrb[2].mxu1 %vm166_vm0, %v135_v20  ;;  %v5884_v33 = vpack.c.bf16 %v373_v24, %v369_v19  ;;  %v375_v36 = vld [vmem:[#allocation7 + $0x180] sm:$0xff] }
  0x92   :  { %4035 = vmatpush1.bf16.msra.mxu0 %v5852_v1  ;;  %v382_v29 = vld [vmem:[#allocation7 + $0x1b8] sm:$0xff]  ;;  %455 = vmatprep.mubr.f32.mxu0 %v5624_v0  ;;  %v5886_v34 = vpack.c.bf16 %v380_v27, %v376_v25  ;;  %v379_v37 = vld [vmem:[#allocation7 + $0x1a0] sm:$0xff]  ;;  %v377_v38 = vld [vmem:[#allocation7 + $0x190] sm:$0xff]  ;;  %v148_v9 = vsub.s32 0, %v5951_v8  ;;  %v152_v11 = vsub.s32 1, %v5951_v8  ;;  %v6796_v12 = vsub.s32 2, %v5951_v8 }
  0x93   :  { %4067 = vmatpush1.bf16.msra.mxu1 %v5856_v2  ;;  %4037 = vmatprep.subr.bf16.mxu0 %v5858_v3  ;;  %v5889_v41 = vpack.c.bf16 %v382_v29, %v378_v28  ;;  %v381_v42 = vld [vmem:[#allocation7 + $0x1b0] sm:$0xff]  ;;  %v384_v43 = vld [vmem:[#allocation7 + $0x1c8] sm:$0xff]  ;;  %v386_v46 = vld [vmem:[#allocation7 + $0x1d8] sm:$0xff]  ;;  %v5892_v48 = vpack.c.bf16 %v379_v37, %v375_v36  ;;  %v6797_v14 = vsub.s32 3, %v5951_v8 }
  0x94   :  { %4069 = vmatprep.subr.bf16.mxu1 %v5861_v7  ;;  %526 = vmatprep.mubr.f32.mxu1 %v5624_v0  ;;  %v388_v45 = vld [vmem:[#allocation7 + $0x1e8] sm:$0xff]  ;;  %v390_v47 = vld [vmem:[#allocation7 + $0x1f8] sm:$0xff]  ;;  %v5896_v49 = vpack.c.bf16 %v381_v42, %v377_v38  ;;  %v383_v52 = vld [vmem:[#allocation7 + $0x1c0] sm:$0xff] }
  0x95   :  { %v5898_v50 = vpack.c.bf16 %v388_v45, %v384_v43  ;;  %v387_v55 = vld [vmem:[#allocation7 + $0x1e0] sm:$0xff]  ;;  %v5901_v56 = vpack.c.bf16 %v390_v47, %v386_v46  ;;  %v385_v57 = vld [vmem:[#allocation7 + $0x1d0] sm:$0xff] }
  0x96   :  { %4039 = vmatpush1.bf16.msra.mxu0 %v5864_v13  ;;  %v389_v59 = vld [vmem:[#allocation7 + $0x1f0] sm:$0xff]  ;;  %v5904_v60 = vpack.c.bf16 %v387_v55, %v383_v52 }
  0x97   :  { %4071 = vmatpush1.bf16.msra.mxu1 %v5868_v15  ;;  %4041 = vmatprep.subr.bf16.mxu0 %v5870_v16  ;;  %v5908_v61 = vpack.c.bf16 %v389_v59, %v385_v57  ;;  %v144_v10 = vld [vmem:[%s6787_s3] sm:$0xf] }
  0x98   :  { %4073 = vmatprep.subr.bf16.mxu1 %v5873_v23  ;;  %v149_v18 = vrot.slane %v144_v10, %v148_v9  ;;  %v153_v19 = vrot.slane %v144_v10, %v152_v11  ;;  %v157_v20 = vrot.slane %v144_v10, %v6796_v12  ;;  %v161_v25 = vrot.slane %v144_v10, %v6797_v14 }
  0x9a   :  { %4043 = vmatpush1.bf16.msra.mxu0 %v5879_v32 }
  0x9b   :  { %4075 = vmatpush1.bf16.msra.mxu1 %v5884_v33  ;;  %4045 = vmatprep.subr.bf16.mxu0 %v5886_v34 }
  0x9c   :  { %4077 = vmatprep.subr.bf16.mxu1 %v5889_v41 }
  0x9e   :  { %4047 = vmatpush1.bf16.msra.mxu0 %v5892_v48 }
  0x9f   :  { %4079 = vmatpush1.bf16.msra.mxu1 %v5896_v49  ;;  %4049 = vmatprep.subr.bf16.mxu0 %v5898_v50 }
  0xa0   :  { %4081 = vmatprep.subr.bf16.mxu1 %v5901_v56 }
  0xa2   :  { %4051 = vmatpush1.bf16.msra.mxu0 %v5904_v60 }
  0xa3   :  { %4083 = vmatpush1.bf16.msra.mxu1 %v5908_v61  ;;  %4085 = vmatprep.subr.bf16.mxu0 %v5809_v17 }
  0xa4   :  { %4117 = vmatprep.subr.bf16.mxu1 %v5811_v21 }
  0xa5   :  { %456 = vmatmul.mubr.f32.vlgmr.msra.gmra.mrb[4].mxu0 %v5624_v0 }
  0xa6   :  { %527 = vmatmul.mubr.f32.vlgmr.msra.gmra.mrb[4].mxu1 %v5624_v0  ;;  %4087 = vmatpush1.bf16.msra.mxu0 %v5813_v22 }
  0xa7   :  { %4119 = vmatpush1.bf16.msra.mxu1 %v5816_v26  ;;  %4089 = vmatprep.subr.bf16.mxu0 %v5820_v30 }
  0xa8   :  { %4121 = vmatprep.subr.bf16.mxu1 %v5822_v31  ;;  %625 = vmatprep.mubr.f32.mxu0 %v5624_v0 }
  0xa9   :  { %696 = vmatprep.mubr.f32.mxu1 %v5624_v0 }
  0xaa   :  { %4091 = vmatpush1.bf16.msra.mxu0 %v5826_v35 }
  0xab   :  { %4123 = vmatpush1.bf16.msra.mxu1 %v5830_v39  ;;  %4093 = vmatprep.subr.bf16.mxu0 %v5832_v40 }
  0xac   :  { %4125 = vmatprep.subr.bf16.mxu1 %v5835_v44 }
  0xae   :  { %4095 = vmatpush1.bf16.msra.mxu0 %v5840_v51 }
  0xaf   :  { %4127 = vmatpush1.bf16.msra.mxu1 %v5844_v53  ;;  %4097 = vmatprep.subr.bf16.mxu0 %v5846_v54 }
  0xb0   :  { %4129 = vmatprep.subr.bf16.mxu1 %v5849_v58 }
  0xb2   :  { %4099 = vmatpush1.bf16.msra.mxu0 %v5852_v1 }
  0xb3   :  { %4131 = vmatpush1.bf16.msra.mxu1 %v5856_v2  ;;  %4101 = vmatprep.subr.bf16.mxu0 %v5858_v3 }
  0xb4   :  { %4133 = vmatprep.subr.bf16.mxu1 %v5861_v7 }
  0xb6   :  { %4103 = vmatpush1.bf16.msra.mxu0 %v5864_v13 }
  0xb7   :  { %4135 = vmatpush1.bf16.msra.mxu1 %v5868_v15  ;;  %4105 = vmatprep.subr.bf16.mxu0 %v5870_v16 }
  0xb8   :  { %4137 = vmatprep.subr.bf16.mxu1 %v5873_v23 }
  0xba   :  { %4107 = vmatpush1.bf16.msra.mxu0 %v5879_v32 }
  0xbb   :  { %4139 = vmatpush1.bf16.msra.mxu1 %v5884_v33  ;;  %4109 = vmatprep.subr.bf16.mxu0 %v5886_v34 }
  0xbc   :  { %4141 = vmatprep.subr.bf16.mxu1 %v5889_v41 }
  0xbe   :  { %4111 = vmatpush1.bf16.msra.mxu0 %v5892_v48 }
  0xbf   :  { %4143 = vmatpush1.bf16.msra.mxu1 %v5896_v49  ;;  %4113 = vmatprep.subr.bf16.mxu0 %v5898_v50 }
  0xc0   :  { %4145 = vmatprep.subr.bf16.mxu1 %v5901_v56 }
  0xc2   :  { %4115 = vmatpush1.bf16.msra.mxu0 %v5904_v60 }
  0xc3   :  { %4147 = vmatpush1.bf16.msra.mxu1 %v5908_v61  ;;  %4149 = vmatprep.subr.bf16.mxu0 %v5809_v17 }
  0xc4   :  { %4181 = vmatprep.subr.bf16.mxu1 %v5811_v21 }
 0x158   :  { %v239_v62 = vpop.f32.mrb[0].mxu0 }
 0x159   :  { %v241_v63 = vpop.f32.mrb[1].mxu0  ;;  %v316_v4 = vpop.f32.mrb[0].mxu1  ;;  %v5976_v43 = vadd.f32 %v239_v62, %v149_v18 }
 0x15a   :  { %v318_v6 = vpop.f32.mrb[1].mxu1  ;;  %v5978_v45 = vadd.f32 %v241_v63, %v153_v19  ;;  %v5985_v62 = vadd.f32 %v316_v4, %v157_v20 }
 0x164   :  { %v245_v24 = vpop.f32.mrb[2].mxu0  ;;  %v322_v29 = vpop.f32.mrb[2].mxu1 }
 0x165   :  { %v5968_v27 = vadd.f32 %v245_v24, %v149_v18  ;;  %v247_v28 = vpop.f32.mrb[3].mxu0  ;;  %v5972_v37 = vadd.f32 %v322_v29, %v157_v20  ;;  %v324_v38 = vpop.f32.mrb[3].mxu1  ;;  %v5982_v24 = vadd.f32 %v318_v6, %v161_v25 }
 0x166   :  { %v5970_v36 = vadd.f32 %v247_v28, %v153_v19  ;;  %v5974_v42 = vadd.f32 %v324_v38, %v161_v25 }
 0x178   :  { %v457_v46 = vpop.f32.mrb[4].mxu0 }
 0x179   :  { %v533_v47 = vadd.f32 %v457_v46, %v5976_v43  ;;  %v528_v52 = vpop.f32.mrb[4].mxu1  ;;  %v459_v55 = vpop.f32.mrb[5].mxu0 }
 0x17a   :  { %v534_v57 = vadd.f32 %v459_v55, %v5978_v45  ;;  %v530_v59 = vpop.f32.mrb[5].mxu1  ;;  %v535_v18 = vadd.f32 %v528_v52, %v5985_v62 }
 0x17b   :  { %v3858_v5 = vmul.f32 -1.442695, %v533_v47  ;;  %v536_v28 = vadd.f32 %v530_v59, %v5982_v24 }
 0x17c   :  { %v3859_v10 = vmul.f32 -1.442695, %v534_v57 }
 0x17d   :  { %5171 = vpow2.f32 %v3858_v5  ;;  %v3860_v63 = vmul.f32 -1.442695, %v536_v28 }
 0x17e   :  { %5173 = vpow2.f32 %v3859_v10 }
 0x17f   :  { %5175 = vpow2.f32 %v3860_v63 }
 0x180   :  { %5177 = vtanh.f32 %v535_v18 }
 0x187   :  { %v5172_v19 = vpop.eup %5171 }
 0x188   :  { %v5174_v29 = vpop.eup %5173  ;;  %v540_v38 = vadd.f32 1.0, %v5172_v19 }
 0x189   :  { %v546_v46 = vadd.f32 1.0, %v5174_v29  ;;  %v5176_v47 = vpop.eup %5175 }
 0x18a   :  { %5179 = vrcp.f32 %v540_v38  ;;  %v5178_v55 = vpop.eup %5177  ;;  %v553_v5 = vadd.f32 1.0, %v5176_v47 }
 0x18b   :  { %5181 = vrcp.f32 %v546_v46 }
 0x18c   :  { %5183 = vrcp.f32 %v553_v5 }
 0x194   :  { %v5180_v6 = vpop.eup %5179 }
 0x195   :  { %v5182_v25 = vpop.eup %5181  ;;  %v557_v57 = vmul.f32 %v5180_v6, %v5178_v55 }
 0x196   :  { %v556_v59 = vmul.f32 0.0, %v5182_v25  ;;  %v5184_v20 = vpop.eup %5183 }
 0x198   :  { %v5988_v4 = vadd.f32 %v557_v57, %v556_v59 }
 0x19a   :  { %5185 = vtanh.f32 %v5988_v4 }
 0x1a4   :  { %v5186_v52 = vpop.eup %5185 }
 0x1a5   :  { %v5991_v10 = vmul.f32 %v5186_v52, %v5184_v20 }
 0x1a7   :  { %626 = vmatmul.mubr.f32.vlgmr.msra.gmra.mrb[6].mxu0 %v5991_v10  ;;  %697 = vmatmul.mubr.f32.vlgmr.msra.gmra.mrb[6].mxu1 %v5991_v10 }
 0x1a8   :  { %4151 = vmatpush1.bf16.msra.mxu0 %v5813_v22  ;;  %4183 = vmatpush1.bf16.msra.mxu1 %v5816_v26 }
 0x1a9   :  { %4153 = vmatprep.subr.bf16.mxu0 %v5820_v30  ;;  %4185 = vmatprep.subr.bf16.mxu1 %v5822_v31 }
 0x1aa   :  { %813 = vmatprep.mubr.f32.mxu0 %v5624_v0  ;;  %884 = vmatprep.mubr.f32.mxu1 %v5624_v0 }
 0x1ac   :  { %4155 = vmatpush1.bf16.msra.mxu0 %v5826_v35  ;;  %4187 = vmatpush1.bf16.msra.mxu1 %v5830_v39 }
 0x1ad   :  { %4157 = vmatprep.subr.bf16.mxu0 %v5832_v40  ;;  %4189 = vmatprep.subr.bf16.mxu1 %v5835_v44 }
 0x1b0   :  { %4159 = vmatpush1.bf16.msra.mxu0 %v5840_v51  ;;  %4191 = vmatpush1.bf16.msra.mxu1 %v5844_v53 }
 0x1b1   :  { %4161 = vmatprep.subr.bf16.mxu0 %v5846_v54  ;;  %4193 = vmatprep.subr.bf16.mxu1 %v5849_v58 }
 0x1b4   :  { %4163 = vmatpush1.bf16.msra.mxu0 %v5852_v1  ;;  %4195 = vmatpush1.bf16.msra.mxu1 %v5856_v2 }
 0x1b5   :  { %4165 = vmatprep.subr.bf16.mxu0 %v5858_v3  ;;  %4197 = vmatprep.subr.bf16.mxu1 %v5861_v7 }
 0x1b8   :  { %4167 = vmatpush1.bf16.msra.mxu0 %v5864_v13  ;;  %4199 = vmatpush1.bf16.msra.mxu1 %v5868_v15 }
 0x1b9   :  { %4169 = vmatprep.subr.bf16.mxu0 %v5870_v16  ;;  %4201 = vmatprep.subr.bf16.mxu1 %v5873_v23 }
 0x1bc   :  { %4171 = vmatpush1.bf16.msra.mxu0 %v5879_v32  ;;  %4203 = vmatpush1.bf16.msra.mxu1 %v5884_v33 }
 0x1bd   :  { %4173 = vmatprep.subr.bf16.mxu0 %v5886_v34  ;;  %4205 = vmatprep.subr.bf16.mxu1 %v5889_v41 }
 0x1c0   :  { %4175 = vmatpush1.bf16.msra.mxu0 %v5892_v48  ;;  %4207 = vmatpush1.bf16.msra.mxu1 %v5896_v49 }
 0x1c1   :  { %4177 = vmatprep.subr.bf16.mxu0 %v5898_v50  ;;  %4209 = vmatprep.subr.bf16.mxu1 %v5901_v56 }
 0x1c4   :  { %4179 = vmatpush1.bf16.msra.mxu0 %v5904_v60  ;;  %4211 = vmatpush1.bf16.msra.mxu1 %v5908_v61 }
 0x1c5   :  { %4213 = vmatprep.subr.bf16.mxu0 %v5809_v17  ;;  %4245 = vmatprep.subr.bf16.mxu1 %v5811_v21 }
 0x27a   :  { %v627_v28 = vpop.f32.mrb[6].mxu0  ;;  %v698_v63 = vpop.f32.mrb[6].mxu1 }
 0x27b   :  { %v707_v18 = vrot.slane %v627_v28, 6  ;;  %v629_v19 = vpop.f32.mrb[7].mxu0  ;;  %v700_v29 = vpop.f32.mrb[7].mxu1  ;;  %v709_v5 = vrot.slane %v698_v63, 6 }
 0x27c   :  { %v708_v38 = vrot.slane %v629_v19, 6  ;;  %v710_v25 = vrot.slane %v700_v29, 6  ;;  %v739_v29 = vrot.slane %v5988_v4, 6 }
 0x27d   :  { %v715_v46 = vadd.f32 %v707_v18, %v5976_v43  ;;  %v717_v20 = vadd.f32 %v709_v5, %v5985_v62 }
 0x27e   :  { %v716_v47 = vadd.f32 %v708_v38, %v5978_v45  ;;  %v718_v57 = vadd.f32 %v710_v25, %v5982_v24 }
 0x27f   :  { %v3861_v55 = vmul.f32 -1.442695, %v715_v46 }
 0x280   :  { %v3862_v6 = vmul.f32 -1.442695, %v716_v47  ;;  %v3863_v59 = vmul.f32 -1.442695, %v718_v57 }
 0x281   :  { %5187 = vpow2.f32 %v3861_v55 }
 0x282   :  { %5189 = vpow2.f32 %v3862_v6 }
 0x283   :  { %5191 = vpow2.f32 %v3863_v59 }
 0x284   :  { %5193 = vtanh.f32 %v717_v20 }
 0x28b   :  { %v5188_v52 = vpop.eup %5187 }
 0x28c   :  { %v5190_v28 = vpop.eup %5189  ;;  %v722_v12 = vadd.f32 1.0, %v5188_v52 }
 0x28d   :  { %v728_v19 = vadd.f32 1.0, %v5190_v28  ;;  %v5192_v18 = vpop.eup %5191 }
 0x28e   :  { %5195 = vrcp.f32 %v722_v12  ;;  %v5194_v38 = vpop.eup %5193  ;;  %v735_v6 = vadd.f32 1.0, %v5192_v18 }
 0x28f   :  { %5197 = vrcp.f32 %v728_v19 }
 0x290   :  { %5199 = vrcp.f32 %v735_v6 }
 0x298   :  { %v5196_v46 = vpop.eup %5195 }
 0x299   :  { %v5198_v47 = vpop.eup %5197  ;;  %v742_v55 = vmul.f32 %v5196_v46, %v5194_v38 }
 0x29a   :  { %v741_v63 = vmul.f32 %v5198_v47, %v739_v29  ;;  %v5200_v57 = vpop.eup %5199 }
 0x29c   :  { %v6034_v25 = vadd.f32 %v742_v55, %v741_v63 }
 0x29e   :  { %5201 = vtanh.f32 %v6034_v25 }
 0x2a8   :  { %v5202_v5 = vpop.eup %5201 }
 0x2a9   :  { %v6037_v59 = vmul.f32 %v5202_v5, %v5200_v57 }
 0x2ab   :  { %v747_v12 = vrot.slane %v6037_v59, 2 }
 0x2ad   :  { %814 = vmatmul.mubr.f32.vlgmr.msra.gmra.mrb[8].mxu0 %v747_v12  ;;  %885 = vmatmul.mubr.f32.vlgmr.msra.gmra.mrb[8].mxu1 %v747_v12 }
 0x2ae   :  { %4215 = vmatpush1.bf16.msra.mxu0 %v5813_v22  ;;  %4247 = vmatpush1.bf16.msra.mxu1 %v5816_v26 }
 0x2af   :  { %4217 = vmatprep.subr.bf16.mxu0 %v5820_v30  ;;  %4249 = vmatprep.subr.bf16.mxu1 %v5822_v31 }
 0x2b0   :  { %1001 = vmatprep.mubr.f32.mxu0 %v5624_v0  ;;  %1072 = vmatprep.mubr.f32.mxu1 %v5624_v0 }
 0x2b2   :  { %4219 = vmatpush1.bf16.msra.mxu0 %v5826_v35  ;;  %4251 = vmatpush1.bf16.msra.mxu1 %v5830_v39 }
 0x2b3   :  { %4221 = vmatprep.subr.bf16.mxu0 %v5832_v40  ;;  %4253 = vmatprep.subr.bf16.mxu1 %v5835_v44 }
 0x2b6   :  { %4223 = vmatpush1.bf16.msra.mxu0 %v5840_v51  ;;  %4255 = vmatpush1.bf16.msra.mxu1 %v5844_v53 }
 0x2b7   :  { %4225 = vmatprep.subr.bf16.mxu0 %v5846_v54  ;;  %4257 = vmatprep.subr.bf16.mxu1 %v5849_v58 }
 0x2ba   :  { %4227 = vmatpush1.bf16.msra.mxu0 %v5852_v1  ;;  %4259 = vmatpush1.bf16.msra.mxu1 %v5856_v2 }
 0x2bb   :  { %4229 = vmatprep.subr.bf16.mxu0 %v5858_v3  ;;  %4261 = vmatprep.subr.bf16.mxu1 %v5861_v7 }
 0x2be   :  { %4231 = vmatpush1.bf16.msra.mxu0 %v5864_v13  ;;  %4263 = vmatpush1.bf16.msra.mxu1 %v5868_v15 }
 0x2bf   :  { %4233 = vmatprep.subr.bf16.mxu0 %v5870_v16  ;;  %4265 = vmatprep.subr.bf16.mxu1 %v5873_v23 }
 0x2c2   :  { %4235 = vmatpush1.bf16.msra.mxu0 %v5879_v32  ;;  %4267 = vmatpush1.bf16.msra.mxu1 %v5884_v33 }
 0x2c3   :  { %4237 = vmatprep.subr.bf16.mxu0 %v5886_v34  ;;  %4269 = vmatprep.subr.bf16.mxu1 %v5889_v41 }
 0x2c6   :  { %4239 = vmatpush1.bf16.msra.mxu0 %v5892_v48  ;;  %4271 = vmatpush1.bf16.msra.mxu1 %v5896_v49 }
 0x2c7   :  { %4241 = vmatprep.subr.bf16.mxu0 %v5898_v50  ;;  %4273 = vmatprep.subr.bf16.mxu1 %v5901_v56 }
 0x2ca   :  { %4243 = vmatpush1.bf16.msra.mxu0 %v5904_v60  ;;  %4275 = vmatpush1.bf16.msra.mxu1 %v5908_v61 }
 0x2cb   :  { %4277 = vmatprep.subr.bf16.mxu0 %v5809_v17  ;;  %4309 = vmatprep.subr.bf16.mxu1 %v5811_v21 }
 0x380   :  { %v815_v4 = vpop.f32.mrb[8].mxu0  ;;  %v886_v20 = vpop.f32.mrb[8].mxu1 }
 0x381   :  { %v895_v52 = vrot.slane %v815_v4, 4  ;;  %v817_v28 = vpop.f32.mrb[9].mxu0  ;;  %v888_v19 = vpop.f32.mrb[9].mxu1  ;;  %v897_v63 = vrot.slane %v886_v20, 4 }
 0x382   :  { %v896_v18 = vrot.slane %v817_v28, 4  ;;  %v898_v55 = vrot.slane %v888_v19, 4  ;;  %v927_v19 = vrot.slane %v6034_v25, 6 }
 0x383   :  { %v903_v38 = vadd.f32 %v895_v52, %v5976_v43  ;;  %v905_v5 = vadd.f32 %v897_v63, %v5985_v62 }
 0x384   :  { %v904_v46 = vadd.f32 %v896_v18, %v5978_v45  ;;  %v906_v6 = vadd.f32 %v898_v55, %v5982_v24 }
 0x385   :  { %v3864_v29 = vmul.f32 -1.442695, %v903_v38 }
 0x386   :  { %v3865_v47 = vmul.f32 -1.442695, %v904_v46  ;;  %v3866_v57 = vmul.f32 -1.442695, %v906_v6 }
 0x387   :  { %5203 = vpow2.f32 %v3864_v29 }
 0x388   :  { %5205 = vpow2.f32 %v3865_v47 }
 0x389   :  { %5207 = vpow2.f32 %v3866_v57  ;;  %v1860_v57 = vsel %vm1859_vm1, %v5991_v10, %v6037_v59 }
 0x38a   :  { %5209 = vtanh.f32 %v905_v5 }
 0x391   :  { %v5204_v12 = vpop.eup %5203 }
 0x392   :  { %v5206_v4 = vpop.eup %5205  ;;  %v910_v14 = vadd.f32 1.0, %v5204_v12 }
 0x393   :  { %v916_v28 = vadd.f32 1.0, %v5206_v4  ;;  %v5208_v52 = vpop.eup %5207 }
 0x394   :  { %5211 = vrcp.f32 %v910_v14  ;;  %v5210_v18 = vpop.eup %5209  ;;  %v923_v47 = vadd.f32 1.0, %v5208_v52 }
 0x395   :  { %5213 = vrcp.f32 %v916_v28 }
 0x396   :  { %5215 = vrcp.f32 %v923_v47 }
 0x39e   :  { %v5212_v38 = vpop.eup %5211 }
 0x39f   :  { %v5214_v46 = vpop.eup %5213  ;;  %v930_v29 = vmul.f32 %v5212_v38, %v5210_v18 }
 0x3a0   :  { %v929_v20 = vmul.f32 %v5214_v46, %v927_v19  ;;  %v5216_v6 = vpop.eup %5215 }
 0x3a2   :  { %v6079_v55 = vadd.f32 %v930_v29, %v929_v20 }
 0x3a4   :  { %5217 = vtanh.f32 %v6079_v55 }
 0x3ae   :  { %v5218_v63 = vpop.eup %5217 }
 0x3af   :  { %v933_v14 = vmul.f32 %v5218_v63, %v5216_v6 }
 0x3b1   :  { %v935_v5 = vrot.slane %v933_v14, 4  ;;  %v6086_v25 = vsel %vm1861_vm2, %v1860_v57, %v933_v14 }
 0x3b3   :  { %1002 = vmatmul.mubr.f32.vlgmr.msra.gmra.mrb[10].mxu0 %v935_v5  ;;  %1073 = vmatmul.mubr.f32.vlgmr.msra.gmra.mrb[10].mxu1 %v935_v5 }
 0x3b4   :  { %4279 = vmatpush1.bf16.msra.mxu0 %v5813_v22  ;;  %4311 = vmatpush1.bf16.msra.mxu1 %v5816_v26 }
 0x3b5   :  { %4281 = vmatprep.subr.bf16.mxu0 %v5820_v30  ;;  %4313 = vmatprep.subr.bf16.mxu1 %v5822_v31 }
 0x3b6   :  { %1189 = vmatprep.mubr.f32.mxu0 %v5624_v0  ;;  %1260 = vmatprep.mubr.f32.mxu1 %v5624_v0 }
 0x3b8   :  { %4283 = vmatpush1.bf16.msra.mxu0 %v5826_v35  ;;  %4315 = vmatpush1.bf16.msra.mxu1 %v5830_v39 }
 0x3b9   :  { %4285 = vmatprep.subr.bf16.mxu0 %v5832_v40  ;;  %4317 = vmatprep.subr.bf16.mxu1 %v5835_v44 }
 0x3bc   :  { %4287 = vmatpush1.bf16.msra.mxu0 %v5840_v51  ;;  %4319 = vmatpush1.bf16.msra.mxu1 %v5844_v53 }
 0x3bd   :  { %4289 = vmatprep.subr.bf16.mxu0 %v5846_v54  ;;  %4321 = vmatprep.subr.bf16.mxu1 %v5849_v58 }
 0x3c0   :  { %4291 = vmatpush1.bf16.msra.mxu0 %v5852_v1  ;;  %4323 = vmatpush1.bf16.msra.mxu1 %v5856_v2 }
 0x3c1   :  { %4293 = vmatprep.subr.bf16.mxu0 %v5858_v3  ;;  %4325 = vmatprep.subr.bf16.mxu1 %v5861_v7 }
 0x3c4   :  { %4295 = vmatpush1.bf16.msra.mxu0 %v5864_v13  ;;  %4327 = vmatpush1.bf16.msra.mxu1 %v5868_v15 }
 0x3c5   :  { %4297 = vmatprep.subr.bf16.mxu0 %v5870_v16  ;;  %4329 = vmatprep.subr.bf16.mxu1 %v5873_v23 }
 0x3c8   :  { %4299 = vmatpush1.bf16.msra.mxu0 %v5879_v32  ;;  %4331 = vmatpush1.bf16.msra.mxu1 %v5884_v33 }
 0x3c9   :  { %4301 = vmatprep.subr.bf16.mxu0 %v5886_v34  ;;  %4333 = vmatprep.subr.bf16.mxu1 %v5889_v41 }
 0x3cc   :  { %4303 = vmatpush1.bf16.msra.mxu0 %v5892_v48  ;;  %4335 = vmatpush1.bf16.msra.mxu1 %v5896_v49 }
 0x3cd   :  { %4305 = vmatprep.subr.bf16.mxu0 %v5898_v50  ;;  %4337 = vmatprep.subr.bf16.mxu1 %v5901_v56 }
 0x3d0   :  { %4307 = vmatpush1.bf16.msra.mxu0 %v5904_v60  ;;  %4339 = vmatpush1.bf16.msra.mxu1 %v5908_v61 }
 0x3d1   :  { %4341 = vmatprep.subr.bf16.mxu0 %v5809_v17  ;;  %4373 = vmatprep.subr.bf16.mxu1 %v5811_v21 }
 0x486   :  { %v1003_v10 = vpop.f32.mrb[10].mxu0  ;;  %v1074_v59 = vpop.f32.mrb[10].mxu1 }
 0x487   :  { %v1083_v12 = vrot.slane %v1003_v10, 2  ;;  %v1005_v4 = vpop.f32.mrb[11].mxu0  ;;  %v1076_v28 = vpop.f32.mrb[11].mxu1  ;;  %v1085_v20 = vrot.slane %v1074_v59, 2 }
 0x488   :  { %v1084_v52 = vrot.slane %v1005_v4, 2  ;;  %v1086_v29 = vrot.slane %v1076_v28, 2  ;;  %v1115_v4 = vrot.slane %v6079_v55, 6 }
 0x489   :  { %v1091_v18 = vadd.f32 %v1083_v12, %v5976_v43  ;;  %v1093_v63 = vadd.f32 %v1085_v20, %v5985_v62 }
 0x48a   :  { %v1092_v38 = vadd.f32 %v1084_v52, %v5978_v45  ;;  %v1094_v47 = vadd.f32 %v1086_v29, %v5982_v24 }
 0x48b   :  { %v3867_v19 = vmul.f32 -1.442695, %v1091_v18 }
 0x48c   :  { %v3868_v46 = vmul.f32 -1.442695, %v1092_v38  ;;  %v3869_v6 = vmul.f32 -1.442695, %v1094_v47 }
 0x48d   :  { %5219 = vpow2.f32 %v3867_v19 }
 0x48e   :  { %5221 = vpow2.f32 %v3868_v46 }
 0x48f   :  { %5223 = vpow2.f32 %v3869_v6 }
 0x490   :  { %5225 = vtanh.f32 %v1093_v63 }
 0x497   :  { %v5220_v14 = vpop.eup %5219 }
 0x498   :  { %v5222_v57 = vpop.eup %5221  ;;  %v1098_v5 = vadd.f32 1.0, %v5220_v14 }
 0x499   :  { %v1104_v10 = vadd.f32 1.0, %v5222_v57  ;;  %v5224_v43 = vpop.eup %5223 }
 0x49a   :  { %5227 = vrcp.f32 %v1098_v5  ;;  %v5226_v45 = vpop.eup %5225  ;;  %v1111_v24 = vadd.f32 1.0, %v5224_v43 }
 0x49b   :  { %5229 = vrcp.f32 %v1104_v10 }
 0x49c   :  { %5231 = vrcp.f32 %v1111_v24 }
 0x4a4   :  { %v5228_v12 = vpop.eup %5227 }
 0x4a5   :  { %v5230_v28 = vpop.eup %5229  ;;  %v1118_v52 = vmul.f32 %v5228_v12, %v5226_v45 }
 0x4a6   :  { %v1117_v59 = vmul.f32 %v5230_v28, %v1115_v4  ;;  %v5232_v62 = vpop.eup %5231 }
 0x4a8   :  { %v6127_v18 = vadd.f32 %v1118_v52, %v1117_v59 }
 0x4aa   :  { %5233 = vtanh.f32 %v6127_v18 }
 0x4b4   :  { %v5234_v38 = vpop.eup %5233 }
 0x4b5   :  { %v1121_v19 = vmul.f32 %v5234_v38, %v5232_v62  ;;  %v1291_v62 = vrot.slane %v6127_v18, 6 }
 0x4b7   :  { %v1123_v46 = vrot.slane %v1121_v19, 6  ;;  %v6132_v29 = vsel %vm1863_vm3, %v6086_v25, %v1121_v19 }
 0x4b9   :  { %1190 = vmatmul.mubr.f32.vlgmr.msra.gmra.mrb[12].mxu0 %v1123_v46  ;;  %1261 = vmatmul.mubr.f32.vlgmr.msra.gmra.mrb[12].mxu1 %v1123_v46 }
 0x4ba   :  { %4343 = vmatpush1.bf16.msra.mxu0 %v5813_v22  ;;  %4375 = vmatpush1.bf16.msra.mxu1 %v5816_v26 }
 0x4bb   :  { %4345 = vmatprep.subr.bf16.mxu0 %v5820_v30  ;;  %4377 = vmatprep.subr.bf16.mxu1 %v5822_v31 }
 0x4bc   :  { %1362 = vmatprep.mubr.f32.mxu0 %v5624_v0  ;;  %1433 = vmatprep.mubr.f32.mxu1 %v5624_v0 }
 0x4be   :  { %4347 = vmatpush1.bf16.msra.mxu0 %v5826_v35  ;;  %4379 = vmatpush1.bf16.msra.mxu1 %v5830_v39 }
 0x4bf   :  { %4349 = vmatprep.subr.bf16.mxu0 %v5832_v40  ;;  %4381 = vmatprep.subr.bf16.mxu1 %v5835_v44 }
 0x4c2   :  { %4351 = vmatpush1.bf16.msra.mxu0 %v5840_v51  ;;  %4383 = vmatpush1.bf16.msra.mxu1 %v5844_v53 }
 0x4c3   :  { %4353 = vmatprep.subr.bf16.mxu0 %v5846_v54  ;;  %4385 = vmatprep.subr.bf16.mxu1 %v5849_v58 }
 0x4c6   :  { %4355 = vmatpush1.bf16.msra.mxu0 %v5852_v1  ;;  %4387 = vmatpush1.bf16.msra.mxu1 %v5856_v2 }
 0x4c7   :  { %4357 = vmatprep.subr.bf16.mxu0 %v5858_v3  ;;  %4389 = vmatprep.subr.bf16.mxu1 %v5861_v7 }
 0x4ca   :  { %4359 = vmatpush1.bf16.msra.mxu0 %v5864_v13  ;;  %4391 = vmatpush1.bf16.msra.mxu1 %v5868_v15 }
 0x4cb   :  { %4361 = vmatprep.subr.bf16.mxu0 %v5870_v16  ;;  %4393 = vmatprep.subr.bf16.mxu1 %v5873_v23 }
 0x4ce   :  { %4363 = vmatpush1.bf16.msra.mxu0 %v5879_v32  ;;  %4395 = vmatpush1.bf16.msra.mxu1 %v5884_v33 }
 0x4cf   :  { %4365 = vmatprep.subr.bf16.mxu0 %v5886_v34  ;;  %4397 = vmatprep.subr.bf16.mxu1 %v5889_v41 }
 0x4d2   :  { %4367 = vmatpush1.bf16.msra.mxu0 %v5892_v48  ;;  %4399 = vmatpush1.bf16.msra.mxu1 %v5896_v49 }
 0x4d3   :  { %4369 = vmatprep.subr.bf16.mxu0 %v5898_v50  ;;  %4401 = vmatprep.subr.bf16.mxu1 %v5901_v56 }
 0x4d6   :  { %4371 = vmatpush1.bf16.msra.mxu0 %v5904_v60  ;;  %4403 = vmatpush1.bf16.msra.mxu1 %v5908_v61 }
 0x4d7   :  { %4405 = vmatprep.subr.bf16.mxu0 %v5809_v17  ;;  %4437 = vmatprep.subr.bf16.mxu1 %v5811_v21 }
 0x58c   :  { %v1191_v55 = vpop.f32.mrb[12].mxu0  ;;  %v1262_v25 = vpop.f32.mrb[12].mxu1 }
 0x58d   :  { %v1267_v47 = vadd.f32 %v1191_v55, %v5968_v27  ;;  %v1193_v20 = vpop.f32.mrb[13].mxu0  ;;  %v1264_v6 = vpop.f32.mrb[13].mxu1  ;;  %v1269_v43 = vadd.f32 %v1262_v25, %v5972_v37 }
 0x58e   :  { %v1268_v63 = vadd.f32 %v1193_v20, %v5970_v36  ;;  %v1270_v5 = vadd.f32 %v1264_v6, %v5974_v42 }
 0x58f   :  { %v3870_v14 = vmul.f32 -1.442695, %v1267_v47 }
 0x590   :  { %v3871_v57 = vmul.f32 -1.442695, %v1268_v63  ;;  %v3872_v10 = vmul.f32 -1.442695, %v1270_v5 }
 0x591   :  { %5235 = vpow2.f32 %v3870_v14 }
 0x592   :  { %5237 = vpow2.f32 %v3871_v57 }
 0x593   :  { %5239 = vpow2.f32 %v3872_v10 }
 0x594   :  { %5241 = vtanh.f32 %v1269_v43 }
 0x59b   :  { %v5236_v45 = vpop.eup %5235 }
 0x59c   :  { %v5238_v12 = vpop.eup %5237  ;;  %v1274_v4 = vadd.f32 1.0, %v5236_v45 }
 0x59d   :  { %v1280_v28 = vadd.f32 1.0, %v5238_v12  ;;  %v5240_v52 = vpop.eup %5239 }
 0x59e   :  { %5243 = vrcp.f32 %v1274_v4  ;;  %v5242_v24 = vpop.eup %5241  ;;  %v1287_v46 = vadd.f32 1.0, %v5240_v52 }
 0x59f   :  { %5245 = vrcp.f32 %v1280_v28 }
 0x5a0   :  { %5247 = vrcp.f32 %v1287_v46 }
 0x5a8   :  { %v5244_v59 = vpop.eup %5243 }
 0x5a9   :  { %v5246_v38 = vpop.eup %5245  ;;  %v1294_v19 = vmul.f32 %v5244_v59, %v5242_v24 }
 0x5aa   :  { %v1293_v55 = vmul.f32 %v5246_v38, %v1291_v62  ;;  %v5248_v25 = vpop.eup %5247 }
 0x5ac   :  { %v6173_v47 = vadd.f32 %v1294_v19, %v1293_v55 }
 0x5ae   :  { %5249 = vtanh.f32 %v6173_v47 }
 0x5b8   :  { %v5250_v20 = vpop.eup %5249 }
 0x5b9   :  { %v6176_v6 = vmul.f32 %v5250_v20, %v5248_v25  ;;  %v1476_v20 = vrot.slane %v6173_v47, 6 }
 0x5bb   :  { %1363 = vmatmul.mubr.f32.vlgmr.msra.gmra.mrb[14].mxu0 %v6176_v6  ;;  %1434 = vmatmul.mubr.f32.vlgmr.msra.gmra.mrb[14].mxu1 %v6176_v6 }
 0x5bc   :  { %4407 = vmatpush1.bf16.msra.mxu0 %v5813_v22  ;;  %4439 = vmatpush1.bf16.msra.mxu1 %v5816_v26 }
 0x5bd   :  { %4409 = vmatprep.subr.bf16.mxu0 %v5820_v30  ;;  %4441 = vmatprep.subr.bf16.mxu1 %v5822_v31 }
 0x5be   :  { %1550 = vmatprep.mubr.f32.mxu0 %v5624_v0  ;;  %1621 = vmatprep.mubr.f32.mxu1 %v5624_v0 }
 0x5c0   :  { %4411 = vmatpush1.bf16.msra.mxu0 %v5826_v35  ;;  %4443 = vmatpush1.bf16.msra.mxu1 %v5830_v39 }
 0x5c1   :  { %4413 = vmatprep.subr.bf16.mxu0 %v5832_v40  ;;  %4445 = vmatprep.subr.bf16.mxu1 %v5835_v44 }
 0x5c4   :  { %4415 = vmatpush1.bf16.msra.mxu0 %v5840_v51  ;;  %4447 = vmatpush1.bf16.msra.mxu1 %v5844_v53 }
 0x5c5   :  { %4417 = vmatprep.subr.bf16.mxu0 %v5846_v54  ;;  %4449 = vmatprep.subr.bf16.mxu1 %v5849_v58 }
 0x5c8   :  { %4419 = vmatpush1.bf16.msra.mxu0 %v5852_v1  ;;  %4451 = vmatpush1.bf16.msra.mxu1 %v5856_v2 }
 0x5c9   :  { %4421 = vmatprep.subr.bf16.mxu0 %v5858_v3  ;;  %4453 = vmatprep.subr.bf16.mxu1 %v5861_v7 }
 0x5cc   :  { %4423 = vmatpush1.bf16.msra.mxu0 %v5864_v13  ;;  %4455 = vmatpush1.bf16.msra.mxu1 %v5868_v15 }
 0x5cd   :  { %4425 = vmatprep.subr.bf16.mxu0 %v5870_v16  ;;  %4457 = vmatprep.subr.bf16.mxu1 %v5873_v23 }
 0x5d0   :  { %4427 = vmatpush1.bf16.msra.mxu0 %v5879_v32  ;;  %4459 = vmatpush1.bf16.msra.mxu1 %v5884_v33 }
 0x5d1   :  { %4429 = vmatprep.subr.bf16.mxu0 %v5886_v34  ;;  %4461 = vmatprep.subr.bf16.mxu1 %v5889_v41 }
 0x5d4   :  { %4431 = vmatpush1.bf16.msra.mxu0 %v5892_v48  ;;  %4463 = vmatpush1.bf16.msra.mxu1 %v5896_v49 }
 0x5d5   :  { %4433 = vmatprep.subr.bf16.mxu0 %v5898_v50  ;;  %4465 = vmatprep.subr.bf16.mxu1 %v5901_v56 }
 0x5d8   :  { %4435 = vmatpush1.bf16.msra.mxu0 %v5904_v60  ;;  %4467 = vmatpush1.bf16.msra.mxu1 %v5908_v61 }
 0x5d9   :  { %4469 = vmatprep.subr.bf16.mxu0 %v5809_v17  ;;  %4501 = vmatprep.subr.bf16.mxu1 %v5811_v21 }
 0x68e   :  { %v1364_v18 = vpop.f32.mrb[14].mxu0  ;;  %v1435_v63 = vpop.f32.mrb[14].mxu1 }
 0x68f   :  { %v1444_v14 = vrot.slane %v1364_v18, 6  ;;  %v1366_v57 = vpop.f32.mrb[15].mxu0  ;;  %v1437_v5 = vpop.f32.mrb[15].mxu1  ;;  %v1446_v17 = vrot.slane %v1435_v63, 6 }
 0x690   :  { %v1445_v10 = vrot.slane %v1366_v57, 6  ;;  %v1447_v28 = vrot.slane %v1437_v5, 6 }
 0x691   :  { %v1452_v43 = vadd.f32 %v1444_v14, %v5968_v27  ;;  %v1454_v21 = vadd.f32 %v1446_v17, %v5972_v37  ;;  %v1868_v17 = vld [vmem:[#allocation8] sm:$0xff] }
 0x692   :  { %v1453_v45 = vadd.f32 %v1445_v10, %v5970_v36  ;;  %v1455_v52 = vadd.f32 %v1447_v28, %v5974_v42 }
 0x693   :  { %v3873_v12 = vmul.f32 -1.442695, %v1452_v43 }
 0x694   :  { %v3874_v4 = vmul.f32 -1.442695, %v1453_v45  ;;  %v3875_v24 = vmul.f32 -1.442695, %v1455_v52 }
 0x695   :  { %5251 = vpow2.f32 %v3873_v12 }
 0x696   :  { %5253 = vpow2.f32 %v3874_v4 }
 0x697   :  { %5255 = vpow2.f32 %v3875_v24  ;;  %v1872_v24 = vld [vmem:[#allocation8 + $0x20] sm:$0xff] }
 0x698   :  { %5257 = vtanh.f32 %v1454_v21 }
 0x69f   :  { %v5252_v59 = vpop.eup %5251 }
 0x6a0   :  { %v5254_v62 = vpop.eup %5253  ;;  %v1459_v38 = vadd.f32 1.0, %v5252_v59  ;;  %v1870_v59 = vld [vmem:[#allocation8 + $0x10] sm:$0xff] }
 0x6a1   :  { %v1465_v19 = vadd.f32 1.0, %v5254_v62  ;;  %v5256_v46 = vpop.eup %5255  ;;  %v1874_v62 = vld [vmem:[#allocation8 + $0x30] sm:$0xff] }
 0x6a2   :  { %5259 = vrcp.f32 %v1459_v38  ;;  %v5258_v55 = vpop.eup %5257  ;;  %v1472_v57 = vadd.f32 1.0, %v5256_v46  ;;  %v1877_v38 = vld [vmem:[#allocation8 + $0x48] sm:$0xff] }
 0x6a3   :  { %5261 = vrcp.f32 %v1465_v19  ;;  %v1881_v46 = vld [vmem:[#allocation8 + $0x68] sm:$0xff] }
 0x6a4   :  { %5263 = vrcp.f32 %v1472_v57  ;;  %v1876_v57 = vld [vmem:[#allocation8 + $0x40] sm:$0xff] }
 0x6ac   :  { %v5260_v25 = vpop.eup %5259 }
 0x6ad   :  { %v5262_v18 = vpop.eup %5261  ;;  %v1479_v14 = vmul.f32 %v5260_v25, %v5258_v55  ;;  %v1879_v55 = vld [vmem:[#allocation8 + $0x58] sm:$0xff] }
 0x6ae   :  { %v1478_v63 = vmul.f32 %v5262_v18, %v1476_v20  ;;  %v5264_v10 = vpop.eup %5263  ;;  %v1883_v25 = vld [vmem:[#allocation8 + $0x78] sm:$0xff]  ;;  %v4534_v18 = vpack.c.bf16 %v1872_v24, %v1868_v17 }
 0x6b0   :  { %v6219_v5 = vadd.f32 %v1479_v14, %v1478_v63  ;;  %v4566_v14 = vpack.c.bf16 %v1874_v62, %v1870_v59  ;;  %v1880_v63 = vld [vmem:[#allocation8 + $0x60] sm:$0xff]  ;;  %v1906_v59 = vld [vmem:[#allocation8 + $0x130] sm:$0xff]  ;;  %v1909_v62 = vld [vmem:[#allocation8 + $0x148] sm:$0xff] }
 0x6b2   :  { %5265 = vtanh.f32 %v6219_v5 }
 0x6bc   :  { %v5266_v43 = vpop.eup %5265 }
 0x6bd   :  { %v6222_v45 = vmul.f32 %v5266_v43, %v5264_v10  ;;  %v4536_v43 = vpack.c.bf16 %v1881_v46, %v1877_v38  ;;  %v1913_v38 = vld [vmem:[#allocation8 + $0x168] sm:$0xff]  ;;  %v1915_v46 = vld [vmem:[#allocation8 + $0x178] sm:$0xff] }
 0x6bf   :  { %v1484_v12 = vrot.slane %v6222_v45, 2 }
 0x6c1   :  { %1551 = vmatmul.mubr.f32.vlgmr.msra.gmra.mrb[16].mxu0 %v1484_v12  ;;  %1622 = vmatmul.mubr.f32.vlgmr.msra.gmra.mrb[16].mxu1 %v1484_v12  ;;  %v4568_v12 = vpack.c.bf16 %v1883_v25, %v1879_v55 }
 0x6c2   :  { %4471 = vmatpush1.bf16.msra.mxu0 %v5813_v22  ;;  %4503 = vmatpush1.bf16.msra.mxu1 %v5816_v26  ;;  %v1869_v22 = vld [vmem:[#allocation8 + $0x8] sm:$0xff] }
 0x6c3   :  { %4473 = vmatprep.subr.bf16.mxu0 %v5820_v30  ;;  %4505 = vmatprep.subr.bf16.mxu1 %v5822_v31  ;;  %v1873_v26 = vld [vmem:[#allocation8 + $0x28] sm:$0xff]  ;;  %v1871_v30 = vld [vmem:[#allocation8 + $0x18] sm:$0xff] }
 0x6c4   :  { %1738 = vmatprep.mubr.f32.mxu0 %v5624_v0  ;;  %1809 = vmatprep.mubr.f32.mxu1 %v5624_v0  ;;  %v4532_v31 = vpack.c.bf16 %v1873_v26, %v1869_v22  ;;  %v1878_v22 = vld [vmem:[#allocation8 + $0x50] sm:$0xff] }
 0x6c5   :  { %v1882_v26 = vld [vmem:[#allocation8 + $0x70] sm:$0xff] }
 0x6c6   :  { %4475 = vmatpush1.bf16.msra.mxu0 %v5826_v35  ;;  %4507 = vmatpush1.bf16.msra.mxu1 %v5830_v39  ;;  %v1875_v35 = vld [vmem:[#allocation8 + $0x38] sm:$0xff] }
 0x6c7   :  { %4477 = vmatprep.subr.bf16.mxu0 %v5832_v40  ;;  %4509 = vmatprep.subr.bf16.mxu1 %v5835_v44  ;;  %v4564_v39 = vpack.c.bf16 %v1875_v35, %v1871_v30  ;;  %v1885_v30 = vld [vmem:[#allocation8 + $0x88] sm:$0xff] }
 0x6c8   :  { %v1889_v35 = vld [vmem:[#allocation8 + $0xa8] sm:$0xff] }
 0x6ca   :  { %4479 = vmatpush1.bf16.msra.mxu0 %v5840_v51  ;;  %4511 = vmatpush1.bf16.msra.mxu1 %v5844_v53 }
 0x6cb   :  { %4481 = vmatprep.subr.bf16.mxu0 %v5846_v54  ;;  %4513 = vmatprep.subr.bf16.mxu1 %v5849_v58 }
 0x6ce   :  { %4483 = vmatpush1.bf16.msra.mxu0 %v5852_v1  ;;  %4515 = vmatpush1.bf16.msra.mxu1 %v5856_v2 }
 0x6cf   :  { %4485 = vmatprep.subr.bf16.mxu0 %v5858_v3  ;;  %4517 = vmatprep.subr.bf16.mxu1 %v5861_v7 }
 0x6d2   :  { %4487 = vmatpush1.bf16.msra.mxu0 %v5864_v13  ;;  %4519 = vmatpush1.bf16.msra.mxu1 %v5868_v15 }
 0x6d3   :  { %4489 = vmatprep.subr.bf16.mxu0 %v5870_v16  ;;  %4521 = vmatprep.subr.bf16.mxu1 %v5873_v23 }
 0x6d6   :  { %4491 = vmatpush1.bf16.msra.mxu0 %v5879_v32  ;;  %4523 = vmatpush1.bf16.msra.mxu1 %v5884_v33 }
 0x6d7   :  { %4493 = vmatprep.subr.bf16.mxu0 %v5886_v34  ;;  %4525 = vmatprep.subr.bf16.mxu1 %v5889_v41 }
 0x6da   :  { %4495 = vmatpush1.bf16.msra.mxu0 %v5892_v48  ;;  %4527 = vmatpush1.bf16.msra.mxu1 %v5896_v49 }
 0x6db   :  { %4497 = vmatprep.subr.bf16.mxu0 %v5898_v50  ;;  %4529 = vmatprep.subr.bf16.mxu1 %v5901_v56 }
 0x6de   :  { %4499 = vmatpush1.bf16.msra.mxu0 %v5904_v60  ;;  %4531 = vmatpush1.bf16.msra.mxu1 %v5908_v61  ;;  %v1664_v60 = vrot.slane %v6219_v5, 6  ;;  %v1865_v5 = vsel %vm1859_vm1, %v6176_v6, %v6222_v45  ;;  %v1888_v6 = vld [vmem:[#allocation8 + $0xa0] sm:$0xff]  ;;  %v4540_v45 = vpack.c.bf16 %v1889_v35, %v1885_v30 }
 0x6df   :  { %4533 = vmatprep.subr.bf16.mxu0 %v4532_v31  ;;  %4565 = vmatprep.subr.bf16.mxu1 %v4564_v39  ;;  %v1887_v39 = vld [vmem:[#allocation8 + $0x98] sm:$0xff]  ;;  %v1916_v35 = vld [vmem:[#allocation8 + $0x180] sm:$0xff] }
 0x794   :  { %v1552_v40 = vpop.f32.mrb[16].mxu0  ;;  %v1623_v44 = vpop.f32.mrb[16].mxu1 }
 0x795   :  { %v1632_v51 = vrot.slane %v1552_v40, 4  ;;  %v1554_v53 = vpop.f32.mrb[17].mxu0  ;;  %v1625_v54 = vpop.f32.mrb[17].mxu1  ;;  %v1634_v16 = vrot.slane %v1623_v44, 4  ;;  %v1891_v40 = vld [vmem:[#allocation8 + $0xb8] sm:$0xff]  ;;  %v4538_v44 = vpack.c.bf16 %v1880_v63, %v1876_v57  ;;  %v1910_v63 = vld [vmem:[#allocation8 + $0x150] sm:$0xff] }
 0x796   :  { %v1633_v58 = vrot.slane %v1554_v53, 4  ;;  %v1635_v13 = vrot.slane %v1625_v54, 4  ;;  %v1884_v53 = vld [vmem:[#allocation8 + $0x80] sm:$0xff]  ;;  %v4572_v54 = vpack.c.bf16 %v1891_v40, %v1887_v39 }
 0x797   :  { %v1640_v1 = vadd.f32 %v1632_v51, %v5968_v27  ;;  %v1642_v32 = vadd.f32 %v1634_v16, %v5972_v37  ;;  %v4570_v51 = vpack.c.bf16 %v1882_v26, %v1878_v22  ;;  %v1923_v22 = vld [vmem:[#allocation8 + $0x1b8] sm:$0xff]  ;;  %v1920_v39 = vld [vmem:[#allocation8 + $0x1a0] sm:$0xff] }
 0x798   :  { %v1641_v2 = vadd.f32 %v1633_v58, %v5970_v36  ;;  %v1643_v15 = vadd.f32 %v1635_v13, %v5974_v42  ;;  %v1886_v58 = vld [vmem:[#allocation8 + $0x90] sm:$0xff]  ;;  %v1899_v13 = vld [vmem:[#allocation8 + $0xf8] sm:$0xff] }
 0x799   :  { %v3876_v3 = vmul.f32 -1.442695, %v1640_v1  ;;  %v1890_v1 = vld [vmem:[#allocation8 + $0xb0] sm:$0xff] }
 0x79a   :  { %v3877_v7 = vmul.f32 -1.442695, %v1641_v2  ;;  %v3878_v23 = vmul.f32 -1.442695, %v1643_v15  ;;  %v1893_v2 = vld [vmem:[#allocation8 + $0xc8] sm:$0xff]  ;;  %v4542_v15 = vpack.c.bf16 %v1888_v6, %v1884_v53  ;;  %v4574_v16 = vpack.c.bf16 %v1890_v1, %v1886_v58  ;;  %v1922_v53 = vld [vmem:[#allocation8 + $0x1b0] sm:$0xff] }
 0x79b   :  { %5267 = vpow2.f32 %v3876_v3  ;;  %v1897_v3 = vld [vmem:[#allocation8 + $0xe8] sm:$0xff]  ;;  %v1931_v58 = vld [vmem:[#allocation8 + $0x1f8] sm:$0xff]  ;;  %v4558_v1 = vpack.c.bf16 %v1920_v39, %v1916_v35  ;;  %v2130_v35 = vld [vmem:[#allocation10 + $0xb0] sm:$0xff] }
 0x79c   :  { %5269 = vpow2.f32 %v3877_v7  ;;  %v1895_v7 = vld [vmem:[#allocation8 + $0xd8] sm:$0xff]  ;;  %v1925_v6 = vld [vmem:[#allocation8 + $0x1c8] sm:$0xff] }
 0x79d   :  { %5271 = vpow2.f32 %v3878_v23  ;;  %v1892_v23 = vld [vmem:[#allocation8 + $0xc0] sm:$0xff] }
 0x79e   :  { %5273 = vtanh.f32 %v1642_v32  ;;  %v1896_v32 = vld [vmem:[#allocation8 + $0xe0] sm:$0xff] }
 0x7a5   :  { %v5268_v33 = vpop.eup %5267 }
 0x7a6   :  { %v5270_v34 = vpop.eup %5269  ;;  %v1647_v41 = vadd.f32 1.0, %v5268_v33  ;;  %v4544_v33 = vpack.c.bf16 %v1897_v3, %v1893_v2  ;;  %v1924_v3 = vld [vmem:[#allocation8 + $0x1c0] sm:$0xff] }
 0x7a7   :  { %v1653_v48 = vadd.f32 1.0, %v5270_v34  ;;  %v5272_v49 = vpop.eup %5271  ;;  %v4576_v34 = vpack.c.bf16 %v1899_v13, %v1895_v7 }
 0x7a8   :  { %5275 = vrcp.f32 %v1647_v41  ;;  %v5274_v50 = vpop.eup %5273  ;;  %v1660_v4 = vadd.f32 1.0, %v5272_v49  ;;  %v1894_v41 = vld [vmem:[#allocation8 + $0xd0] sm:$0xff]  ;;  %v1901_v49 = vld [vmem:[#allocation8 + $0x108] sm:$0xff] }
 0x7a9   :  { %5277 = vrcp.f32 %v1653_v48  ;;  %v1898_v48 = vld [vmem:[#allocation8 + $0xf0] sm:$0xff] }
 0x7aa   :  { %5279 = vrcp.f32 %v1660_v4  ;;  %v1900_v4 = vld [vmem:[#allocation8 + $0x100] sm:$0xff] }
 0x7b2   :  { %v5276_v56 = vpop.eup %5275 }
 0x7b3   :  { %v5278_v61 = vpop.eup %5277  ;;  %v1667_v47 = vmul.f32 %v5276_v56, %v5274_v50  ;;  %v1905_v50 = vld [vmem:[#allocation8 + $0x128] sm:$0xff]  ;;  %v1903_v56 = vld [vmem:[#allocation8 + $0x118] sm:$0xff] }
 0x7b4   :  { %v1666_v28 = vmul.f32 %v5278_v61, %v1664_v60  ;;  %v5280_v21 = vpop.eup %5279  ;;  %v1907_v60 = vld [vmem:[#allocation8 + $0x138] sm:$0xff]  ;;  %v4546_v61 = vpack.c.bf16 %v1896_v32, %v1892_v23  ;;  %v4548_v17 = vpack.c.bf16 %v1905_v50, %v1901_v49  ;;  %v1930_v23 = vld [vmem:[#allocation8 + $0x1f0] sm:$0xff] }
 0x7b5   :  { %v4580_v24 = vpack.c.bf16 %v1907_v60, %v1903_v56  ;;  %v2115_v50 = vld [vmem:[#allocation10 + $0x38] sm:$0xff]  ;;  %v2108_v56 = vld [vmem:[#allocation10] sm:$0xff] }
 0x7b6   :  { %v6262_v52 = vadd.f32 %v1667_v47, %v1666_v28  ;;  %v4578_v47 = vpack.c.bf16 %v1898_v48, %v1894_v41  ;;  %v1904_v28 = vld [vmem:[#allocation8 + $0x120] sm:$0xff]  ;;  %v2113_v41 = vld [vmem:[#allocation10 + $0x28] sm:$0xff]  ;;  %v2111_v48 = vld [vmem:[#allocation10 + $0x18] sm:$0xff] }
 0x7b7   :  { %v4550_v55 = vpack.c.bf16 %v1904_v28, %v1900_v4  ;;  %v2112_v60 = vld [vmem:[#allocation10 + $0x20] sm:$0xff]  ;;  %v2110_v4 = vld [vmem:[#allocation10 + $0x10] sm:$0xff] }
 0x7b8   :  { %5281 = vtanh.f32 %v6262_v52  ;;  %v2114_v28 = vld [vmem:[#allocation10 + $0x30] sm:$0xff] }
 0x7c2   :  { %v5282_v19 = vpop.eup %5281 }
 0x7c3   :  { %v1670_v20 = vmul.f32 %v5282_v19, %v5280_v21  ;;  %v1902_v21 = vld [vmem:[#allocation8 + $0x110] sm:$0xff]  ;;  %v1911_v19 = vld [vmem:[#allocation8 + $0x158] sm:$0xff] }
 0x7c4   :  { %v4582_v25 = vpack.c.bf16 %v1906_v59, %v1902_v21  ;;  %v4584_v57 = vpack.c.bf16 %v1915_v46, %v1911_v19  ;;  %v2119_v21 = vld [vmem:[#allocation10 + $0x58] sm:$0xff]  ;;  %v2120_v19 = vld [vmem:[#allocation10 + $0x60] sm:$0xff] }
 0x7c5   :  { %v1672_v10 = vrot.slane %v1670_v20, 4  ;;  %v6269_v31 = vsel %vm1861_vm2, %v1865_v5, %v1670_v20  ;;  %v1908_v20 = vld [vmem:[#allocation8 + $0x140] sm:$0xff]  ;;  %v1914_v5 = vld [vmem:[#allocation8 + $0x170] sm:$0xff] }
 0x7c6   :  { %v4586_v30 = vpack.c.bf16 %v1914_v5, %v1910_v63  ;;  %v2127_v63 = vld [vmem:[#allocation10 + $0x98] sm:$0xff] }
 0x7c7   :  { %1739 = vmatmul.mubr.f32.vlgmr.msra.gmra.mrb[18].mxu0 %v1672_v10  ;;  %1810 = vmatmul.mubr.f32.vlgmr.msra.gmra.mrb[18].mxu1 %v1672_v10  ;;  %v1917_v10 = vld [vmem:[#allocation8 + $0x188] sm:$0xff] }
 0x7c8   :  { %4535 = vmatpush1.bf16.msra.mxu0 %v4534_v18  ;;  %4567 = vmatpush1.bf16.msra.mxu1 %v4566_v14  ;;  %v1912_v18 = vld [vmem:[#allocation8 + $0x160] sm:$0xff]  ;;  %v4552_v14 = vpack.c.bf16 %v1913_v38, %v1909_v62  ;;  %v2123_v62 = vld [vmem:[#allocation10 + $0x78] sm:$0xff] }
 0x7c9   :  { %4537 = vmatprep.subr.bf16.mxu0 %v4536_v43  ;;  %4569 = vmatprep.subr.bf16.mxu1 %v4568_v12  ;;  %v1921_v43 = vld [vmem:[#allocation8 + $0x1a8] sm:$0xff]  ;;  %v1919_v12 = vld [vmem:[#allocation8 + $0x198] sm:$0xff]  ;;  %v4554_v26 = vpack.c.bf16 %v1912_v18, %v1908_v20  ;;  %v2116_v38 = vld [vmem:[#allocation10 + $0x40] sm:$0xff]  ;;  %v6291_v46 = vpack.c.bf16 %v2123_v62, %v2119_v21 }
 0x7ca   :  { %2018 = vmatprep.mubr.f32.mxu0 %v5624_v0  ;;  %2095 = vmatprep.mubr.f32.mxu1 %v5624_v0  ;;  %v4556_v40 = vpack.c.bf16 %v1921_v43, %v1917_v10  ;;  %v2122_v20 = vld [vmem:[#allocation10 + $0x70] sm:$0xff]  ;;  %v2131_v10 = vld [vmem:[#allocation10 + $0xb8] sm:$0xff]  ;;  %v2124_v43 = vld [vmem:[#allocation10 + $0x80] sm:$0xff] }
 0x7cb   :  { %v2155_v21 = vld [vmem:[#allocation10 + $0x178] sm:$0xff]  ;;  %v2148_v62 = vld [vmem:[#allocation10 + $0x140] sm:$0xff] }
 0x7cc   :  { %4539 = vmatpush1.bf16.msra.mxu0 %v4538_v44  ;;  %4571 = vmatpush1.bf16.msra.mxu1 %v4570_v51  ;;  %v4588_v44 = vpack.c.bf16 %v1923_v22, %v1919_v12  ;;  %v1918_v51 = vld [vmem:[#allocation8 + $0x190] sm:$0xff]  ;;  %v2128_v12 = vld [vmem:[#allocation10 + $0xa0] sm:$0xff]  ;;  %v6303_v22 = vpack.c.bf16 %v2131_v10, %v2127_v63  ;;  %v2161_v63 = vld [vmem:[#allocation10 + $0x1a8] sm:$0xff] }
 0x7cd   :  { %4541 = vmatprep.subr.bf16.mxu0 %v4540_v45  ;;  %4573 = vmatprep.subr.bf16.mxu1 %v4572_v54  ;;  %v1929_v45 = vld [vmem:[#allocation8 + $0x1e8] sm:$0xff]  ;;  %v1927_v54 = vld [vmem:[#allocation8 + $0x1d8] sm:$0xff]  ;;  %v4590_v2 = vpack.c.bf16 %v1922_v53, %v1918_v51 }
 0x7ce   :  { %v4560_v7 = vpack.c.bf16 %v1929_v45, %v1925_v6  ;;  %v4592_v13 = vpack.c.bf16 %v1931_v58, %v1927_v54  ;;  %v2135_v51 = vld [vmem:[#allocation10 + $0xd8] sm:$0xff]  ;;  %v2132_v45 = vld [vmem:[#allocation10 + $0xc0] sm:$0xff] }
 0x7cf   :  { %v2139_v6 = vld [vmem:[#allocation10 + $0xf8] sm:$0xff]  ;;  %v2136_v54 = vld [vmem:[#allocation10 + $0xe0] sm:$0xff] }
 0x7d0   :  { %4543 = vmatpush1.bf16.msra.mxu0 %v4542_v15  ;;  %4575 = vmatpush1.bf16.msra.mxu1 %v4574_v16  ;;  %v1928_v15 = vld [vmem:[#allocation8 + $0x1e0] sm:$0xff]  ;;  %v1926_v16 = vld [vmem:[#allocation8 + $0x1d0] sm:$0xff]  ;;  %v6315_v58 = vpack.c.bf16 %v2139_v6, %v2135_v51  ;;  %v2159_v10 = vld [vmem:[#allocation10 + $0x198] sm:$0xff] }
 0x7d1   :  { %4545 = vmatprep.subr.bf16.mxu0 %v4544_v33  ;;  %4577 = vmatprep.subr.bf16.mxu1 %v4576_v34  ;;  %v4562_v32 = vpack.c.bf16 %v1928_v15, %v1924_v3  ;;  %v4594_v33 = vpack.c.bf16 %v1930_v23, %v1926_v16  ;;  %v2109_v34 = vld [vmem:[#allocation10 + $0x8] sm:$0xff]  ;;  %v2138_v3 = vld [vmem:[#allocation10 + $0xf0] sm:$0xff]  ;;  %v2143_v16 = vld [vmem:[#allocation10 + $0x118] sm:$0xff] }
 0x7d2   :  { %v6277_v49 = vpack.c.bf16 %v2113_v41, %v2109_v34  ;;  %v2145_v15 = vld [vmem:[#allocation10 + $0x128] sm:$0xff]  ;;  %v2147_v23 = vld [vmem:[#allocation10 + $0x138] sm:$0xff]  ;;  %v2140_v34 = vld [vmem:[#allocation10 + $0x100] sm:$0xff] }
 0x7d3   :  { %v2144_v41 = vld [vmem:[#allocation10 + $0x120] sm:$0xff]  ;;  %v2158_v51 = vld [vmem:[#allocation10 + $0x190] sm:$0xff] }
 0x7d4   :  { %4547 = vmatpush1.bf16.msra.mxu0 %v4546_v61  ;;  %4579 = vmatpush1.bf16.msra.mxu1 %v4578_v47  ;;  %v6279_v61 = vpack.c.bf16 %v2115_v50, %v2111_v48  ;;  %v6281_v47 = vpack.c.bf16 %v2112_v60, %v2108_v56  ;;  %v2142_v48 = vld [vmem:[#allocation10 + $0x110] sm:$0xff]  ;;  %v6329_v50 = vpack.c.bf16 %v2144_v41, %v2140_v34  ;;  %v2149_v60 = vld [vmem:[#allocation10 + $0x148] sm:$0xff]  ;;  %v2168_v34 = vld [vmem:[#allocation10 + $0x1e0] sm:$0xff] }
 0x7d5   :  { %4549 = vmatprep.subr.bf16.mxu0 %v4548_v17  ;;  %4581 = vmatprep.subr.bf16.mxu1 %v4580_v24  ;;  %v2117_v17 = vld [vmem:[#allocation10 + $0x48] sm:$0xff]  ;;  %v2146_v56 = vld [vmem:[#allocation10 + $0x130] sm:$0xff] }
 0x7d6   :  { %v2121_v24 = vld [vmem:[#allocation10 + $0x68] sm:$0xff]  ;;  %v2162_v6 = vld [vmem:[#allocation10 + $0x1b0] sm:$0xff] }
 0x7d7   :  { %v6289_v59 = vpack.c.bf16 %v2121_v24, %v2117_v17  ;;  %v2151_v24 = vld [vmem:[#allocation10 + $0x158] sm:$0xff] }
 0x7d8   :  { %4551 = vmatpush1.bf16.msra.mxu0 %v4550_v55  ;;  %4583 = vmatpush1.bf16.msra.mxu1 %v4582_v25  ;;  %v6293_v55 = vpack.c.bf16 %v2120_v19, %v2116_v38  ;;  %v2118_v25 = vld [vmem:[#allocation10 + $0x50] sm:$0xff]  ;;  %v6337_v38 = vpack.c.bf16 %v2155_v21, %v2151_v24  ;;  %v2152_v19 = vld [vmem:[#allocation10 + $0x160] sm:$0xff] }
 0x7d9   :  { %4553 = vmatprep.subr.bf16.mxu0 %v4552_v14  ;;  %4585 = vmatprep.subr.bf16.mxu1 %v4584_v57  ;;  %v6296_v18 = vpack.c.bf16 %v2122_v20, %v2118_v25  ;;  %v2125_v14 = vld [vmem:[#allocation10 + $0x88] sm:$0xff]  ;;  %v2150_v25 = vld [vmem:[#allocation10 + $0x150] sm:$0xff] }
 0x7da   :  { %v2129_v57 = vld [vmem:[#allocation10 + $0xa8] sm:$0xff]  ;;  %v2154_v20 = vld [vmem:[#allocation10 + $0x170] sm:$0xff] }
 0x7db   :  { %v6301_v5 = vpack.c.bf16 %v2129_v57, %v2125_v14  ;;  %v6340_v14 = vpack.c.bf16 %v2152_v19, %v2148_v62  ;;  %v2157_v57 = vld [vmem:[#allocation10 + $0x188] sm:$0xff] }
 0x7dc   :  { %4555 = vmatpush1.bf16.msra.mxu0 %v4554_v26  ;;  %4587 = vmatpush1.bf16.msra.mxu1 %v4586_v30  ;;  %v6305_v26 = vpack.c.bf16 %v2128_v12, %v2124_v43  ;;  %v2126_v30 = vld [vmem:[#allocation10 + $0x90] sm:$0xff]  ;;  %v6344_v43 = vpack.c.bf16 %v2154_v20, %v2150_v25  ;;  %v6346_v12 = vpack.c.bf16 %v2161_v63, %v2157_v57 }
 0x7dd   :  { %4557 = vmatprep.subr.bf16.mxu0 %v4556_v40  ;;  %4589 = vmatprep.subr.bf16.mxu1 %v4588_v44  ;;  %v6308_v39 = vpack.c.bf16 %v2130_v35, %v2126_v30  ;;  %v2133_v40 = vld [vmem:[#allocation10 + $0xc8] sm:$0xff]  ;;  %v2163_v30 = vld [vmem:[#allocation10 + $0x1b8] sm:$0xff]  ;;  %v2156_v35 = vld [vmem:[#allocation10 + $0x180] sm:$0xff] }
 0x7de   :  { %v2137_v44 = vld [vmem:[#allocation10 + $0xe8] sm:$0xff] }
 0x7df   :  { %v6313_v53 = vpack.c.bf16 %v2137_v44, %v2133_v40  ;;  %v2160_v40 = vld [vmem:[#allocation10 + $0x1a0] sm:$0xff]  ;;  %v6349_v44 = vpack.c.bf16 %v2163_v30, %v2159_v10 }
 0x7e0   :  { %4559 = vmatpush1.bf16.msra.mxu0 %v4558_v1  ;;  %4591 = vmatpush1.bf16.msra.mxu1 %v4590_v2  ;;  %v6317_v1 = vpack.c.bf16 %v2136_v54, %v2132_v45  ;;  %v2134_v2 = vld [vmem:[#allocation10 + $0xd0] sm:$0xff]  ;;  %v6352_v45 = vpack.c.bf16 %v2160_v40, %v2156_v35  ;;  %v6356_v54 = vpack.c.bf16 %v2162_v6, %v2158_v51 }
 0x7e1   :  { %4561 = vmatprep.subr.bf16.mxu0 %v4560_v7  ;;  %4593 = vmatprep.subr.bf16.mxu1 %v4592_v13  ;;  %v2141_v7 = vld [vmem:[#allocation10 + $0x108] sm:$0xff]  ;;  %v6320_v13 = vpack.c.bf16 %v2138_v3, %v2134_v2 }
 0x7e2   :  { %v2165_v2 = vld [vmem:[#allocation10 + $0x1c8] sm:$0xff] }
 0x7e3   :  { %v2169_v3 = vld [vmem:[#allocation10 + $0x1e8] sm:$0xff] }
 0x7e4   :  { %4563 = vmatpush1.bf16.msra.mxu0 %v4562_v32  ;;  %4595 = vmatpush1.bf16.msra.mxu1 %v4594_v33  ;;  %v6324_v32 = vpack.c.bf16 %v2145_v15, %v2141_v7  ;;  %v6326_v33 = vpack.c.bf16 %v2147_v23, %v2143_v16  ;;  %v2167_v7 = vld [vmem:[#allocation10 + $0x1d8] sm:$0xff]  ;;  %v6361_v15 = vpack.c.bf16 %v2169_v3, %v2165_v2  ;;  %v2164_v23 = vld [vmem:[#allocation10 + $0x1c0] sm:$0xff] }
 0x7e5   :  { %4597 = vmatprep.subr.bf16.mxu0 %v6277_v49  ;;  %4629 = vmatprep.subr.bf16.mxu1 %v6279_v61  ;;  %v2171_v16 = vld [vmem:[#allocation10 + $0x1f8] sm:$0xff] }
 0x7e6   :  { %v6363_v41 = vpack.c.bf16 %v2171_v16, %v2167_v7 }
 0x7e7   :  { %2019 = vmatmul.mubr.f32.vlgmr.msra.gmra.mrb[20].mxu0 %v6132_v29  ;;  %2096 = vmatmul.mubr.f32.vlgmr.msra.gmra.mrb[20].mxu1 %v6132_v29  ;;  %v6284_v29 = vpack.c.bf16 %v2114_v28, %v2110_v4  ;;  %v2153_v4 = vld [vmem:[#allocation10 + $0x168] sm:$0xff]  ;;  %v6333_v28 = vpack.c.bf16 %v2146_v56, %v2142_v48  ;;  %v6365_v48 = vpack.c.bf16 %v2168_v34, %v2164_v23  ;;  %v2166_v56 = vld [vmem:[#allocation10 + $0x1d0] sm:$0xff] }
 0x7e8   :  { %2024 = vmatprep.mubr.f32.mxu0 %v5624_v0  ;;  %2101 = vmatprep.mubr.f32.mxu1 %v5624_v0  ;;  %v6335_v17 = vpack.c.bf16 %v2153_v4, %v2149_v60  ;;  %v2170_v60 = vld [vmem:[#allocation10 + $0x1f0] sm:$0xff] }
 0x7e9   :  { %4599 = vmatpush1.bf16.msra.mxu0 %v6281_v47  ;;  %4631 = vmatpush1.bf16.msra.mxu1 %v6284_v29  ;;  %v6368_v4 = vpack.c.bf16 %v2170_v60, %v2166_v56  ;;  %v1852_v56 = vrot.slane %v6262_v52, 6 }
 0x7ea   :  { %4601 = vmatprep.subr.bf16.mxu0 %v6289_v59  ;;  %4633 = vmatprep.subr.bf16.mxu1 %v6291_v46 }
 0x7ed   :  { %4603 = vmatpush1.bf16.msra.mxu0 %v6293_v55  ;;  %4635 = vmatpush1.bf16.msra.mxu1 %v6296_v18 }
 0x7ee   :  { %4605 = vmatprep.subr.bf16.mxu0 %v6301_v5  ;;  %4637 = vmatprep.subr.bf16.mxu1 %v6303_v22 }
 0x7f1   :  { %4607 = vmatpush1.bf16.msra.mxu0 %v6305_v26  ;;  %4639 = vmatpush1.bf16.msra.mxu1 %v6308_v39 }
 0x7f2   :  { %4609 = vmatprep.subr.bf16.mxu0 %v6313_v53  ;;  %4641 = vmatprep.subr.bf16.mxu1 %v6315_v58 }
 0x7f5   :  { %4611 = vmatpush1.bf16.msra.mxu0 %v6317_v1  ;;  %4643 = vmatpush1.bf16.msra.mxu1 %v6320_v13 }
 0x7f6   :  { %4613 = vmatprep.subr.bf16.mxu0 %v6324_v32  ;;  %4645 = vmatprep.subr.bf16.mxu1 %v6326_v33 }
 0x7f9   :  { %4615 = vmatpush1.bf16.msra.mxu0 %v6329_v50  ;;  %4647 = vmatpush1.bf16.msra.mxu1 %v6333_v28 }
 0x7fa   :  { %4617 = vmatprep.subr.bf16.mxu0 %v6335_v17  ;;  %4649 = vmatprep.subr.bf16.mxu1 %v6337_v38 }
 0x7fd   :  { %4619 = vmatpush1.bf16.msra.mxu0 %v6340_v14  ;;  %4651 = vmatpush1.bf16.msra.mxu1 %v6344_v43 }
 0x7fe   :  { %4621 = vmatprep.subr.bf16.mxu0 %v6346_v12  ;;  %4653 = vmatprep.subr.bf16.mxu1 %v6349_v44 }
 0x801   :  { %4623 = vmatpush1.bf16.msra.mxu0 %v6352_v45  ;;  %4655 = vmatpush1.bf16.msra.mxu1 %v6356_v54 }
 0x802   :  { %4625 = vmatprep.subr.bf16.mxu0 %v6361_v15  ;;  %4657 = vmatprep.subr.bf16.mxu1 %v6363_v41 }
 0x805   :  { %4627 = vmatpush1.bf16.msra.mxu0 %v6365_v48  ;;  %4659 = vmatpush1.bf16.msra.mxu1 %v6368_v4 }
 0x806   :  { %4661 = vmatprep.subr.bf16.mxu0 %v6277_v49  ;;  %4693 = vmatprep.subr.bf16.mxu1 %v6279_v61 }
 0x89a   :  { %v1740_v24 = vpop.f32.mrb[18].mxu0  ;;  %v1811_v21 = vpop.f32.mrb[18].mxu1 }
 0x89b   :  { %v1820_v62 = vrot.slane %v1740_v24, 2  ;;  %v1742_v19 = vpop.f32.mrb[19].mxu0  ;;  %v1813_v25 = vpop.f32.mrb[19].mxu1  ;;  %v1822_v51 = vrot.slane %v1811_v21, 2 }
 0x89c   :  { %v1821_v20 = vrot.slane %v1742_v19, 2  ;;  %v1823_v35 = vrot.slane %v1813_v25, 2 }
 0x89d   :  { %v1828_v57 = vadd.f32 %v1820_v62, %v5968_v27  ;;  %v1830_v2 = vadd.f32 %v1822_v51, %v5972_v37 }
 0x89e   :  { %v1829_v63 = vadd.f32 %v1821_v20, %v5970_v36  ;;  %v1831_v40 = vadd.f32 %v1823_v35, %v5974_v42 }
 0x89f   :  { %v3879_v10 = vmul.f32 -1.442695, %v1828_v57 }
 0x8a0   :  { %v3880_v30 = vmul.f32 -1.442695, %v1829_v63  ;;  %v3881_v6 = vmul.f32 -1.442695, %v1831_v40 }
 0x8a1   :  { %5283 = vpow2.f32 %v3879_v10 }
 0x8a2   :  { %5285 = vpow2.f32 %v3880_v30 }
 0x8a3   :  { %5287 = vpow2.f32 %v3881_v6 }
 0x8a4   :  { %5289 = vtanh.f32 %v1830_v2 }
 0x8ab   :  { %v5284_v3 = vpop.eup %5283 }
 0x8ac   :  { %v5286_v7 = vpop.eup %5285  ;;  %v1835_v16 = vadd.f32 1.0, %v5284_v3 }
 0x8ad   :  { %v1841_v23 = vadd.f32 1.0, %v5286_v7  ;;  %v5288_v27 = vpop.eup %5287 }
 0x8ae   :  { %5291 = vrcp.f32 %v1835_v16  ;;  %v5290_v36 = vpop.eup %5289  ;;  %v1848_v42 = vadd.f32 1.0, %v5288_v27 }
 0x8af   :  { %5293 = vrcp.f32 %v1841_v23 }
 0x8b0   :  { %5295 = vrcp.f32 %v1848_v42 }
 0x8b8   :  { %v5292_v34 = vpop.eup %5291 }
 0x8b9   :  { %v5294_v60 = vpop.eup %5293  ;;  %v1855_v24 = vmul.f32 %v5292_v34, %v5290_v36  ;;  %v6798_v36 = vsub.s32 3, %v5951_v8 }
 0x8ba   :  { %v1854_v21 = vmul.f32 %v5294_v60, %v1852_v56  ;;  %v2020_v62 = vpop.f32.mrb[20].mxu0  ;;  %v6380_v19 = vpop.f32.mrb[20].mxu1 }
 0x8bb   :  { %v2022_v37 = vpop.f32.mrb[21].mxu0  ;;  %v6382_v25 = vpop.f32.mrb[21].mxu1 }
 0x8bc   :  { %v1856_v20 = vadd.f32 %v1855_v24, %v1854_v21  ;;  %v5296_v57 = vpop.eup %5295  ;;  %v6799_v21 = vsub.s32 2, %v5951_v8 }
 0x8be   :  { %5297 = vtanh.f32 %v1856_v20 }
 0x8c8   :  { %v5298_v63 = vpop.eup %5297 }
 0x8c9   :  { %v6384_v10 = vmul.f32 %v5298_v63, %v5296_v57 }
 0x8cb   :  { %v1867_v52 = vsel %vm1863_vm3, %v6269_v31, %v6384_v10  ;;  %v1932_v31 = vld [vmem:[%s6790_s6] sm:$0xf] }
 0x8cc   :  { %2025 = vmatmul.mubr.f32.gmra.mrb[22].mxu0 %v1867_v52  ;;  %2102 = vmatmul.mubr.f32.gmra.mrb[22].mxu1 %v1867_v52  ;;  %v6432_v30 = vrot.slane %v1932_v31, %v148_v9  ;;  %v6436_v35 = vrot.slane %v1932_v31, %v152_v11  ;;  %v6455_v34 = vrot.slane %v1932_v31, %v6798_v36 }
 0x8cd   :  { %2236 = vmatprep.mubr.f32.mxu0 %v5624_v0  ;;  %2307 = vmatprep.mubr.f32.mxu1 %v5624_v0 }
 0x8ce   :  { %v6447_v3 = vadd.f32 %v2020_v62, %v6432_v30  ;;  %v6450_v7 = vadd.f32 %v2022_v37, %v6436_v35  ;;  %v6460_v42 = vadd.f32 %v6382_v25, %v6455_v34  ;;  %v6464_v62 = vrot.slane %v1932_v31, %v6799_v21 }
 0x8d0   :  { %2237 = vmatmul.mubr.f32.vlgmr.msra.gmra.mrb[24].mxu0 %v5624_v0  ;;  %2308 = vmatmul.mubr.f32.vlgmr.msra.gmra.mrb[24].mxu1 %v5624_v0  ;;  %v6469_v20 = vadd.f32 %v6380_v19, %v6464_v62 }
 0x8d1   :  { %4663 = vmatpush1.bf16.msra.mxu0 %v6281_v47  ;;  %4695 = vmatpush1.bf16.msra.mxu1 %v6284_v29 }
 0x8d2   :  { %4665 = vmatprep.subr.bf16.mxu0 %v6289_v59  ;;  %4697 = vmatprep.subr.bf16.mxu1 %v6291_v46 }
 0x8d3   :  { %2406 = vmatprep.mubr.f32.mxu0 %v5624_v0  ;;  %2477 = vmatprep.mubr.f32.mxu1 %v5624_v0 }
 0x8d5   :  { %4667 = vmatpush1.bf16.msra.mxu0 %v6293_v55  ;;  %4699 = vmatpush1.bf16.msra.mxu1 %v6296_v18 }
 0x8d6   :  { %4669 = vmatprep.subr.bf16.mxu0 %v6301_v5  ;;  %4701 = vmatprep.subr.bf16.mxu1 %v6303_v22 }
 0x8d9   :  { %4671 = vmatpush1.bf16.msra.mxu0 %v6305_v26  ;;  %4703 = vmatpush1.bf16.msra.mxu1 %v6308_v39 }
 0x8da   :  { %4673 = vmatprep.subr.bf16.mxu0 %v6313_v53  ;;  %4705 = vmatprep.subr.bf16.mxu1 %v6315_v58 }
 0x8dd   :  { %4675 = vmatpush1.bf16.msra.mxu0 %v6317_v1  ;;  %4707 = vmatpush1.bf16.msra.mxu1 %v6320_v13 }
 0x8de   :  { %4677 = vmatprep.subr.bf16.mxu0 %v6324_v32  ;;  %4709 = vmatprep.subr.bf16.mxu1 %v6326_v33 }
 0x8e1   :  { %4679 = vmatpush1.bf16.msra.mxu0 %v6329_v50  ;;  %4711 = vmatpush1.bf16.msra.mxu1 %v6333_v28 }
 0x8e2   :  { %4681 = vmatprep.subr.bf16.mxu0 %v6335_v17  ;;  %4713 = vmatprep.subr.bf16.mxu1 %v6337_v38 }
 0x8e5   :  { %4683 = vmatpush1.bf16.msra.mxu0 %v6340_v14  ;;  %4715 = vmatpush1.bf16.msra.mxu1 %v6344_v43 }
 0x8e6   :  { %4685 = vmatprep.subr.bf16.mxu0 %v6346_v12  ;;  %4717 = vmatprep.subr.bf16.mxu1 %v6349_v44 }
 0x8e9   :  { %4687 = vmatpush1.bf16.msra.mxu0 %v6352_v45  ;;  %4719 = vmatpush1.bf16.msra.mxu1 %v6356_v54 }
 0x8ea   :  { %4689 = vmatprep.subr.bf16.mxu0 %v6361_v15  ;;  %4721 = vmatprep.subr.bf16.mxu1 %v6363_v41 }
 0x8ed   :  { %4691 = vmatpush1.bf16.msra.mxu0 %v6365_v48  ;;  %4723 = vmatpush1.bf16.msra.mxu1 %v6368_v4 }
 0x8ee   :  { %4725 = vmatprep.subr.bf16.mxu0 %v6277_v49  ;;  %4757 = vmatprep.subr.bf16.mxu1 %v6279_v61 }
 0x99f   :  { %v6438_v40 = vpop.f32.mrb[22].mxu0  ;;  %v6440_v51 = vpop.f32.mrb[22].mxu1 }
 0x9a0   :  { %v6442_v6 = vpop.f32.mrb[23].mxu0  ;;  %v6444_v2 = vpop.f32.mrb[23].mxu1 }
 0x9a3   :  { %v2238_v9 = vpop.f32.mrb[24].mxu0  ;;  %v2309_v16 = vpop.f32.mrb[24].mxu1 }
 0x9a4   :  { %v2314_v23 = vadd.f32 %v2238_v9, %v6447_v3  ;;  %v2240_v11 = vpop.f32.mrb[25].mxu0  ;;  %v2311_v27 = vpop.f32.mrb[25].mxu1  ;;  %v2316_v63 = vadd.f32 %v2309_v16, %v6469_v20 }
 0x9a5   :  { %v2315_v56 = vadd.f32 %v2240_v11, %v6450_v7  ;;  %v2317_v37 = vadd.f32 %v2311_v27, %v6460_v42 }
 0x9a6   :  { %v3882_v60 = vmul.f32 -1.442695, %v2314_v23 }
 0x9a7   :  { %v3883_v24 = vmul.f32 -1.442695, %v2315_v56  ;;  %v3884_v57 = vmul.f32 -1.442695, %v2317_v37 }
 0x9a8   :  { %5299 = vpow2.f32 %v3882_v60 }
 0x9a9   :  { %5301 = vpow2.f32 %v3883_v24 }
 0x9aa   :  { %5303 = vpow2.f32 %v3884_v57 }
 0x9ab   :  { %5305 = vtanh.f32 %v2316_v63 }
 0x9b2   :  { %v5300_v52 = vpop.eup %5299 }
 0x9b3   :  { %v5302_v9 = vpop.eup %5301  ;;  %v2321_v23 = vadd.f32 1.0, %v5300_v52 }
 0x9b4   :  { %v2327_v25 = vadd.f32 1.0, %v5302_v9  ;;  %v5304_v8 = vpop.eup %5303 }
 0x9b5   :  { %5307 = vrcp.f32 %v2321_v23  ;;  %v5306_v31 = vpop.eup %5305  ;;  %v2334_v56 = vadd.f32 1.0, %v5304_v8 }
 0x9b6   :  { %5309 = vrcp.f32 %v2327_v25 }
 0x9b7   :  { %5311 = vrcp.f32 %v2334_v56 }
 0x9bf   :  { %v5308_v11 = vpop.eup %5307 }
 0x9c0   :  { %v5310_v36 = vpop.eup %5309  ;;  %v2338_v27 = vmul.f32 %v5308_v11, %v5306_v31 }
 0x9c1   :  { %v2337_v60 = vmul.f32 0.0, %v5310_v36  ;;  %v5312_v16 = vpop.eup %5311 }
 0x9c3   :  { %v6472_v19 = vadd.f32 %v2338_v27, %v2337_v60 }
 0x9c5   :  { %5313 = vtanh.f32 %v6472_v19 }
 0x9cf   :  { %v5314_v24 = vpop.eup %5313 }
 0x9d0   :  { %v2341_v21 = vmul.f32 %v5314_v24, %v5312_v16 }
 0x9d2   :  { %2407 = vmatmul.mubr.f32.vlgmr.msra.gmra.mrb[26].mxu0 %v2341_v21  ;;  %2478 = vmatmul.mubr.f32.vlgmr.msra.gmra.mrb[26].mxu1 %v2341_v21 }
 0x9d3   :  { %4727 = vmatpush1.bf16.msra.mxu0 %v6281_v47  ;;  %4759 = vmatpush1.bf16.msra.mxu1 %v6284_v29 }
 0x9d4   :  { %4729 = vmatprep.subr.bf16.mxu0 %v6289_v59  ;;  %4761 = vmatprep.subr.bf16.mxu1 %v6291_v46 }
 0x9d5   :  { %2594 = vmatprep.mubr.f32.mxu0 %v5624_v0  ;;  %2665 = vmatprep.mubr.f32.mxu1 %v5624_v0 }
 0x9d7   :  { %4731 = vmatpush1.bf16.msra.mxu0 %v6293_v55  ;;  %4763 = vmatpush1.bf16.msra.mxu1 %v6296_v18 }
 0x9d8   :  { %4733 = vmatprep.subr.bf16.mxu0 %v6301_v5  ;;  %4765 = vmatprep.subr.bf16.mxu1 %v6303_v22 }
 0x9db   :  { %4735 = vmatpush1.bf16.msra.mxu0 %v6305_v26  ;;  %4767 = vmatpush1.bf16.msra.mxu1 %v6308_v39 }
 0x9dc   :  { %4737 = vmatprep.subr.bf16.mxu0 %v6313_v53  ;;  %4769 = vmatprep.subr.bf16.mxu1 %v6315_v58 }
 0x9df   :  { %4739 = vmatpush1.bf16.msra.mxu0 %v6317_v1  ;;  %4771 = vmatpush1.bf16.msra.mxu1 %v6320_v13 }
 0x9e0   :  { %4741 = vmatprep.subr.bf16.mxu0 %v6324_v32  ;;  %4773 = vmatprep.subr.bf16.mxu1 %v6326_v33 }
 0x9e3   :  { %4743 = vmatpush1.bf16.msra.mxu0 %v6329_v50  ;;  %4775 = vmatpush1.bf16.msra.mxu1 %v6333_v28 }
 0x9e4   :  { %4745 = vmatprep.subr.bf16.mxu0 %v6335_v17  ;;  %4777 = vmatprep.subr.bf16.mxu1 %v6337_v38 }
 0x9e7   :  { %4747 = vmatpush1.bf16.msra.mxu0 %v6340_v14  ;;  %4779 = vmatpush1.bf16.msra.mxu1 %v6344_v43 }
 0x9e8   :  { %4749 = vmatprep.subr.bf16.mxu0 %v6346_v12  ;;  %4781 = vmatprep.subr.bf16.mxu1 %v6349_v44 }
 0x9eb   :  { %4751 = vmatpush1.bf16.msra.mxu0 %v6352_v45  ;;  %4783 = vmatpush1.bf16.msra.mxu1 %v6356_v54 }
 0x9ec   :  { %4753 = vmatprep.subr.bf16.mxu0 %v6361_v15  ;;  %4785 = vmatprep.subr.bf16.mxu1 %v6363_v41 }
 0x9ef   :  { %4755 = vmatpush1.bf16.msra.mxu0 %v6365_v48  ;;  %4787 = vmatpush1.bf16.msra.mxu1 %v6368_v4 }
 0x9f0   :  { %4789 = vmatprep.subr.bf16.mxu0 %v6277_v49  ;;  %4821 = vmatprep.subr.bf16.mxu1 %v6279_v61 }
 0xaa5   :  { %v2408_v37 = vpop.f32.mrb[26].mxu0  ;;  %v2479_v57 = vpop.f32.mrb[26].mxu1 }
 0xaa6   :  { %v2488_v63 = vrot.slane %v2408_v37, 6  ;;  %v2410_v52 = vpop.f32.mrb[27].mxu0  ;;  %v2481_v9 = vpop.f32.mrb[27].mxu1  ;;  %v2490_v56 = vrot.slane %v2479_v57, 6 }
 0xaa7   :  { %v2489_v23 = vrot.slane %v2410_v52, 6  ;;  %v2491_v36 = vrot.slane %v2481_v9, 6  ;;  %v2520_v9 = vrot.slane %v6472_v19, 6 }
 0xaa8   :  { %v2496_v25 = vadd.f32 %v2488_v63, %v6447_v3  ;;  %v2498_v16 = vadd.f32 %v2490_v56, %v6469_v20 }
 0xaa9   :  { %v2497_v8 = vadd.f32 %v2489_v23, %v6450_v7  ;;  %v2499_v27 = vadd.f32 %v2491_v36, %v6460_v42 }
 0xaaa   :  { %v3885_v31 = vmul.f32 -1.442695, %v2496_v25 }
 0xaab   :  { %v3886_v11 = vmul.f32 -1.442695, %v2497_v8  ;;  %v3887_v60 = vmul.f32 -1.442695, %v2499_v27 }
 0xaac   :  { %5315 = vpow2.f32 %v3885_v31 }
 0xaad   :  { %5317 = vpow2.f32 %v3886_v11 }
 0xaae   :  { %5319 = vpow2.f32 %v3887_v60 }
 0xaaf   :  { %5321 = vtanh.f32 %v2498_v16 }
 0xab6   :  { %v5316_v24 = vpop.eup %5315 }
 0xab7   :  { %v5318_v21 = vpop.eup %5317  ;;  %v2503_v37 = vadd.f32 1.0, %v5316_v24 }
 0xab8   :  { %v2509_v52 = vadd.f32 1.0, %v5318_v21  ;;  %v5320_v63 = vpop.eup %5319 }
 0xab9   :  { %5323 = vrcp.f32 %v2503_v37  ;;  %v5322_v23 = vpop.eup %5321  ;;  %v2516_v11 = vadd.f32 1.0, %v5320_v63 }
 0xaba   :  { %5325 = vrcp.f32 %v2509_v52 }
 0xabb   :  { %5327 = vrcp.f32 %v2516_v11 }
 0xac3   :  { %v5324_v25 = vpop.eup %5323 }
 0xac4   :  { %v5326_v8 = vpop.eup %5325  ;;  %v2523_v31 = vmul.f32 %v5324_v25, %v5322_v23 }
 0xac5   :  { %v2522_v57 = vmul.f32 %v5326_v8, %v2520_v9  ;;  %v5328_v27 = vpop.eup %5327 }
 0xac7   :  { %v6514_v36 = vadd.f32 %v2523_v31, %v2522_v57 }
 0xac9   :  { %5329 = vtanh.f32 %v6514_v36 }
 0xad3   :  { %v5330_v56 = vpop.eup %5329 }
 0xad4   :  { %v2526_v60 = vmul.f32 %v5330_v56, %v5328_v27 }
 0xad6   :  { %v2528_v16 = vrot.slane %v2526_v60, 2 }
 0xad8   :  { %2595 = vmatmul.mubr.f32.vlgmr.msra.gmra.mrb[28].mxu0 %v2528_v16  ;;  %2666 = vmatmul.mubr.f32.vlgmr.msra.gmra.mrb[28].mxu1 %v2528_v16 }
 0xad9   :  { %4791 = vmatpush1.bf16.msra.mxu0 %v6281_v47  ;;  %4823 = vmatpush1.bf16.msra.mxu1 %v6284_v29 }
 0xada   :  { %4793 = vmatprep.subr.bf16.mxu0 %v6289_v59  ;;  %4825 = vmatprep.subr.bf16.mxu1 %v6291_v46 }
 0xadb   :  { %2782 = vmatprep.mubr.f32.mxu0 %v5624_v0  ;;  %2853 = vmatprep.mubr.f32.mxu1 %v5624_v0 }
 0xadd   :  { %4795 = vmatpush1.bf16.msra.mxu0 %v6293_v55  ;;  %4827 = vmatpush1.bf16.msra.mxu1 %v6296_v18 }
 0xade   :  { %4797 = vmatprep.subr.bf16.mxu0 %v6301_v5  ;;  %4829 = vmatprep.subr.bf16.mxu1 %v6303_v22 }
 0xae1   :  { %4799 = vmatpush1.bf16.msra.mxu0 %v6305_v26  ;;  %4831 = vmatpush1.bf16.msra.mxu1 %v6308_v39 }
 0xae2   :  { %4801 = vmatprep.subr.bf16.mxu0 %v6313_v53  ;;  %4833 = vmatprep.subr.bf16.mxu1 %v6315_v58 }
 0xae5   :  { %4803 = vmatpush1.bf16.msra.mxu0 %v6317_v1  ;;  %4835 = vmatpush1.bf16.msra.mxu1 %v6320_v13 }
 0xae6   :  { %4805 = vmatprep.subr.bf16.mxu0 %v6324_v32  ;;  %4837 = vmatprep.subr.bf16.mxu1 %v6326_v33 }
 0xae9   :  { %4807 = vmatpush1.bf16.msra.mxu0 %v6329_v50  ;;  %4839 = vmatpush1.bf16.msra.mxu1 %v6333_v28 }
 0xaea   :  { %4809 = vmatprep.subr.bf16.mxu0 %v6335_v17  ;;  %4841 = vmatprep.subr.bf16.mxu1 %v6337_v38 }
 0xaed   :  { %4811 = vmatpush1.bf16.msra.mxu0 %v6340_v14  ;;  %4843 = vmatpush1.bf16.msra.mxu1 %v6344_v43 }
 0xaee   :  { %4813 = vmatprep.subr.bf16.mxu0 %v6346_v12  ;;  %4845 = vmatprep.subr.bf16.mxu1 %v6349_v44 }
 0xaf1   :  { %4815 = vmatpush1.bf16.msra.mxu0 %v6352_v45  ;;  %4847 = vmatpush1.bf16.msra.mxu1 %v6356_v54 }
 0xaf2   :  { %4817 = vmatprep.subr.bf16.mxu0 %v6361_v15  ;;  %4849 = vmatprep.subr.bf16.mxu1 %v6363_v41 }
 0xaf5   :  { %4819 = vmatpush1.bf16.msra.mxu0 %v6365_v48  ;;  %4851 = vmatpush1.bf16.msra.mxu1 %v6368_v4 }
 0xaf6   :  { %4853 = vmatprep.subr.bf16.mxu0 %v6277_v49  ;;  %4885 = vmatprep.subr.bf16.mxu1 %v6279_v61 }
 0xbab   :  { %v2596_v19 = vpop.f32.mrb[28].mxu0  ;;  %v2667_v24 = vpop.f32.mrb[28].mxu1 }
 0xbac   :  { %v2676_v21 = vrot.slane %v2596_v19, 4  ;;  %v2598_v37 = vpop.f32.mrb[29].mxu0  ;;  %v2669_v52 = vpop.f32.mrb[29].mxu1  ;;  %v2678_v57 = vrot.slane %v2667_v24, 4 }
 0xbad   :  { %v2677_v63 = vrot.slane %v2598_v37, 4  ;;  %v2679_v31 = vrot.slane %v2669_v52, 4  ;;  %v2708_v52 = vrot.slane %v6514_v36, 6 }
 0xbae   :  { %v2684_v23 = vadd.f32 %v2676_v21, %v6447_v3  ;;  %v2686_v56 = vadd.f32 %v2678_v57, %v6469_v20 }
 0xbaf   :  { %v2685_v25 = vadd.f32 %v2677_v63, %v6450_v7  ;;  %v2687_v11 = vadd.f32 %v2679_v31, %v6460_v42 }
 0xbb0   :  { %v3888_v9 = vmul.f32 -1.442695, %v2684_v23 }
 0xbb1   :  { %v3889_v8 = vmul.f32 -1.442695, %v2685_v25  ;;  %v3890_v27 = vmul.f32 -1.442695, %v2687_v11 }
 0xbb2   :  { %5331 = vpow2.f32 %v3888_v9 }
 0xbb3   :  { %5333 = vpow2.f32 %v3889_v8 }
 0xbb4   :  { %5335 = vpow2.f32 %v3890_v27 }
 0xbb5   :  { %5337 = vtanh.f32 %v2686_v56 }
 0xbbc   :  { %v5332_v60 = vpop.eup %5331 }
 0xbbd   :  { %v5334_v16 = vpop.eup %5333  ;;  %v2691_v19 = vadd.f32 1.0, %v5332_v60 }
 0xbbe   :  { %v2697_v37 = vadd.f32 1.0, %v5334_v16  ;;  %v5336_v21 = vpop.eup %5335 }
 0xbbf   :  { %5339 = vrcp.f32 %v2691_v19  ;;  %v5338_v63 = vpop.eup %5337  ;;  %v2704_v8 = vadd.f32 1.0, %v5336_v21 }
 0xbc0   :  { %5341 = vrcp.f32 %v2697_v37 }
 0xbc1   :  { %5343 = vrcp.f32 %v2704_v8 }
 0xbc9   :  { %v5340_v23 = vpop.eup %5339 }
 0xbca   :  { %v5342_v25 = vpop.eup %5341  ;;  %v2711_v9 = vmul.f32 %v5340_v23, %v5338_v63 }
 0xbcb   :  { %v2710_v24 = vmul.f32 %v5342_v25, %v2708_v52  ;;  %v5344_v11 = vpop.eup %5343 }
 0xbcd   :  { %v6556_v31 = vadd.f32 %v2711_v9, %v2710_v24 }
 0xbcf   :  { %5345 = vtanh.f32 %v6556_v31 }
 0xbd9   :  { %v5346_v57 = vpop.eup %5345 }
 0xbda   :  { %v2714_v27 = vmul.f32 %v5346_v57, %v5344_v11 }
 0xbdc   :  { %v2716_v56 = vrot.slane %v2714_v27, 4 }
 0xbde   :  { %2783 = vmatmul.mubr.f32.vlgmr.msra.gmra.mrb[30].mxu0 %v2716_v56  ;;  %2854 = vmatmul.mubr.f32.vlgmr.msra.gmra.mrb[30].mxu1 %v2716_v56 }
 0xbdf   :  { %4855 = vmatpush1.bf16.msra.mxu0 %v6281_v47  ;;  %4887 = vmatpush1.bf16.msra.mxu1 %v6284_v29 }
 0xbe0   :  { %4857 = vmatprep.subr.bf16.mxu0 %v6289_v59  ;;  %4889 = vmatprep.subr.bf16.mxu1 %v6291_v46 }
 0xbe1   :  { %2970 = vmatprep.mubr.f32.mxu0 %v5624_v0  ;;  %3041 = vmatprep.mubr.f32.mxu1 %v5624_v0 }
 0xbe3   :  { %4859 = vmatpush1.bf16.msra.mxu0 %v6293_v55  ;;  %4891 = vmatpush1.bf16.msra.mxu1 %v6296_v18 }
 0xbe4   :  { %4861 = vmatprep.subr.bf16.mxu0 %v6301_v5  ;;  %4893 = vmatprep.subr.bf16.mxu1 %v6303_v22 }
 0xbe7   :  { %4863 = vmatpush1.bf16.msra.mxu0 %v6305_v26  ;;  %4895 = vmatpush1.bf16.msra.mxu1 %v6308_v39 }
 0xbe8   :  { %4865 = vmatprep.subr.bf16.mxu0 %v6313_v53  ;;  %4897 = vmatprep.subr.bf16.mxu1 %v6315_v58 }
 0xbeb   :  { %4867 = vmatpush1.bf16.msra.mxu0 %v6317_v1  ;;  %4899 = vmatpush1.bf16.msra.mxu1 %v6320_v13 }
 0xbec   :  { %4869 = vmatprep.subr.bf16.mxu0 %v6324_v32  ;;  %4901 = vmatprep.subr.bf16.mxu1 %v6326_v33 }
 0xbef   :  { %4871 = vmatpush1.bf16.msra.mxu0 %v6329_v50  ;;  %4903 = vmatpush1.bf16.msra.mxu1 %v6333_v28 }
 0xbf0   :  { %4873 = vmatprep.subr.bf16.mxu0 %v6335_v17  ;;  %4905 = vmatprep.subr.bf16.mxu1 %v6337_v38 }
 0xbf3   :  { %4875 = vmatpush1.bf16.msra.mxu0 %v6340_v14  ;;  %4907 = vmatpush1.bf16.msra.mxu1 %v6344_v43 }
 0xbf4   :  { %4877 = vmatprep.subr.bf16.mxu0 %v6346_v12  ;;  %4909 = vmatprep.subr.bf16.mxu1 %v6349_v44 }
 0xbf7   :  { %4879 = vmatpush1.bf16.msra.mxu0 %v6352_v45  ;;  %4911 = vmatpush1.bf16.msra.mxu1 %v6356_v54 }
 0xbf8   :  { %4881 = vmatprep.subr.bf16.mxu0 %v6361_v15  ;;  %4913 = vmatprep.subr.bf16.mxu1 %v6363_v41 }
 0xbfb   :  { %4883 = vmatpush1.bf16.msra.mxu0 %v6365_v48  ;;  %4915 = vmatpush1.bf16.msra.mxu1 %v6368_v4 }
 0xbfc   :  { %4917 = vmatprep.subr.bf16.mxu0 %v6277_v49  ;;  %4949 = vmatprep.subr.bf16.mxu1 %v6279_v61 }
 0xcb1   :  { %v2784_v36 = vpop.f32.mrb[30].mxu0  ;;  %v2855_v60 = vpop.f32.mrb[30].mxu1 }
 0xcb2   :  { %v2864_v16 = vrot.slane %v2784_v36, 2  ;;  %v2786_v19 = vpop.f32.mrb[31].mxu0  ;;  %v2857_v37 = vpop.f32.mrb[31].mxu1  ;;  %v2866_v24 = vrot.slane %v2855_v60, 2 }
 0xcb3   :  { %v2865_v21 = vrot.slane %v2786_v19, 2  ;;  %v2867_v9 = vrot.slane %v2857_v37, 2  ;;  %v2896_v37 = vrot.slane %v6556_v31, 6  ;;  %v6637_v31 = vadd.f32 %v6438_v40, %v6432_v30 }
 0xcb4   :  { %v2872_v63 = vadd.f32 %v2864_v16, %v6447_v3  ;;  %v2874_v57 = vadd.f32 %v2866_v24, %v6469_v20 }
 0xcb5   :  { %v2873_v23 = vadd.f32 %v2865_v21, %v6450_v7  ;;  %v2875_v8 = vadd.f32 %v2867_v9, %v6460_v42 }
 0xcb6   :  { %v3891_v52 = vmul.f32 -1.442695, %v2872_v63 }
 0xcb7   :  { %v3892_v25 = vmul.f32 -1.442695, %v2873_v23  ;;  %v3893_v11 = vmul.f32 -1.442695, %v2875_v8  ;;  %v6641_v8 = vadd.f32 %v6442_v6, %v6436_v35  ;;  %v6652_v35 = vadd.f32 %v6440_v51, %v6464_v62 }
 0xcb8   :  { %5347 = vpow2.f32 %v3891_v52 }
 0xcb9   :  { %5349 = vpow2.f32 %v3892_v25 }
 0xcba   :  { %5351 = vpow2.f32 %v3893_v11 }
 0xcbb   :  { %5353 = vtanh.f32 %v2874_v57 }
 0xcc2   :  { %v5348_v27 = vpop.eup %5347 }
 0xcc3   :  { %v5350_v56 = vpop.eup %5349  ;;  %v2879_v36 = vadd.f32 1.0, %v5348_v27 }
 0xcc4   :  { %v2885_v19 = vadd.f32 1.0, %v5350_v56  ;;  %v5352_v3 = vpop.eup %5351 }
 0xcc5   :  { %5355 = vrcp.f32 %v2879_v36  ;;  %v5354_v7 = vpop.eup %5353  ;;  %v2892_v42 = vadd.f32 1.0, %v5352_v3 }
 0xcc6   :  { %5357 = vrcp.f32 %v2885_v19 }
 0xcc7   :  { %5359 = vrcp.f32 %v2892_v42 }
 0xccf   :  { %v5356_v16 = vpop.eup %5355 }
 0xcd0   :  { %v5358_v21 = vpop.eup %5357  ;;  %v2899_v63 = vmul.f32 %v5356_v16, %v5354_v7  ;;  %v6647_v7 = vadd.f32 %v6444_v2, %v6455_v34 }
 0xcd1   :  { %v2898_v60 = vmul.f32 %v5358_v21, %v2896_v37  ;;  %v5360_v20 = vpop.eup %5359 }
 0xcd3   :  { %v6598_v23 = vadd.f32 %v2899_v63, %v2898_v60 }
 0xcd5   :  { %5361 = vtanh.f32 %v6598_v23  ;;  %v3072_v60 = vrot.slane %v6598_v23, 6 }
 0xcdf   :  { %v5362_v52 = vpop.eup %5361 }
 0xce0   :  { %v2902_v25 = vmul.f32 %v5362_v52, %v5360_v20 }
 0xce2   :  { %v2904_v9 = vrot.slane %v2902_v25, 6 }
 0xce4   :  { %2971 = vmatmul.mubr.f32.vlgmr.msra.gmra.mrb[32].mxu0 %v2904_v9  ;;  %3042 = vmatmul.mubr.f32.vlgmr.msra.gmra.mrb[32].mxu1 %v2904_v9 }
 0xce5   :  { %4919 = vmatpush1.bf16.msra.mxu0 %v6281_v47  ;;  %4951 = vmatpush1.bf16.msra.mxu1 %v6284_v29 }
 0xce6   :  { %4921 = vmatprep.subr.bf16.mxu0 %v6289_v59  ;;  %4953 = vmatprep.subr.bf16.mxu1 %v6291_v46 }
 0xce7   :  { %3143 = vmatprep.mubr.f32.mxu0 %v5624_v0  ;;  %3214 = vmatprep.mubr.f32.mxu1 %v5624_v0 }
 0xce9   :  { %4923 = vmatpush1.bf16.msra.mxu0 %v6293_v55  ;;  %4955 = vmatpush1.bf16.msra.mxu1 %v6296_v18 }
 0xcea   :  { %4925 = vmatprep.subr.bf16.mxu0 %v6301_v5  ;;  %4957 = vmatprep.subr.bf16.mxu1 %v6303_v22 }
 0xced   :  { %4927 = vmatpush1.bf16.msra.mxu0 %v6305_v26  ;;  %4959 = vmatpush1.bf16.msra.mxu1 %v6308_v39 }
 0xcee   :  { %4929 = vmatprep.subr.bf16.mxu0 %v6313_v53  ;;  %4961 = vmatprep.subr.bf16.mxu1 %v6315_v58 }
 0xcf1   :  { %4931 = vmatpush1.bf16.msra.mxu0 %v6317_v1  ;;  %4963 = vmatpush1.bf16.msra.mxu1 %v6320_v13 }
 0xcf2   :  { %4933 = vmatprep.subr.bf16.mxu0 %v6324_v32  ;;  %4965 = vmatprep.subr.bf16.mxu1 %v6326_v33 }
 0xcf5   :  { %4935 = vmatpush1.bf16.msra.mxu0 %v6329_v50  ;;  %4967 = vmatpush1.bf16.msra.mxu1 %v6333_v28 }
 0xcf6   :  { %4937 = vmatprep.subr.bf16.mxu0 %v6335_v17  ;;  %4969 = vmatprep.subr.bf16.mxu1 %v6337_v38 }
 0xcf9   :  { %4939 = vmatpush1.bf16.msra.mxu0 %v6340_v14  ;;  %4971 = vmatpush1.bf16.msra.mxu1 %v6344_v43 }
 0xcfa   :  { %4941 = vmatprep.subr.bf16.mxu0 %v6346_v12  ;;  %4973 = vmatprep.subr.bf16.mxu1 %v6349_v44 }
 0xcfd   :  { %4943 = vmatpush1.bf16.msra.mxu0 %v6352_v45  ;;  %4975 = vmatpush1.bf16.msra.mxu1 %v6356_v54 }
 0xcfe   :  { %4945 = vmatprep.subr.bf16.mxu0 %v6361_v15  ;;  %4977 = vmatprep.subr.bf16.mxu1 %v6363_v41 }
 0xd01   :  { %4947 = vmatpush1.bf16.msra.mxu0 %v6365_v48  ;;  %4979 = vmatpush1.bf16.msra.mxu1 %v6368_v4 }
 0xd02   :  { %4981 = vmatprep.subr.bf16.mxu0 %v6277_v49  ;;  %5013 = vmatprep.subr.bf16.mxu1 %v6279_v61 }
 0xdb7   :  { %v2972_v24 = vpop.f32.mrb[32].mxu0  ;;  %v3043_v11 = vpop.f32.mrb[32].mxu1 }
 0xdb8   :  { %v3048_v57 = vadd.f32 %v2972_v24, %v6637_v31  ;;  %v2974_v27 = vpop.f32.mrb[33].mxu0  ;;  %v3045_v56 = vpop.f32.mrb[33].mxu1  ;;  %v3050_v6 = vadd.f32 %v3043_v11, %v6652_v35 }
 0xdb9   :  { %v3049_v36 = vadd.f32 %v2974_v27, %v6641_v8  ;;  %v3051_v30 = vadd.f32 %v3045_v56, %v6647_v7 }
 0xdba   :  { %v3894_v19 = vmul.f32 -1.442695, %v3048_v57 }
 0xdbb   :  { %v3895_v3 = vmul.f32 -1.442695, %v3049_v36  ;;  %v3896_v40 = vmul.f32 -1.442695, %v3051_v30 }
 0xdbc   :  { %5363 = vpow2.f32 %v3894_v19 }
 0xdbd   :  { %5365 = vpow2.f32 %v3895_v3 }
 0xdbe   :  { %5367 = vpow2.f32 %v3896_v40 }
 0xdbf   :  { %5369 = vtanh.f32 %v3050_v6 }
 0xdc6   :  { %v5364_v16 = vpop.eup %5363 }
 0xdc7   :  { %v5366_v37 = vpop.eup %5365  ;;  %v3055_v21 = vadd.f32 1.0, %v5364_v16 }
 0xdc8   :  { %v3061_v63 = vadd.f32 1.0, %v5366_v37  ;;  %v5368_v2 = vpop.eup %5367 }
 0xdc9   :  { %5371 = vrcp.f32 %v3055_v21  ;;  %v5370_v34 = vpop.eup %5369  ;;  %v3068_v51 = vadd.f32 1.0, %v5368_v2 }
 0xdca   :  { %5373 = vrcp.f32 %v3061_v63 }
 0xdcb   :  { %5375 = vrcp.f32 %v3068_v51 }
 0xdd3   :  { %v5372_v42 = vpop.eup %5371 }
 0xdd4   :  { %v5374_v20 = vpop.eup %5373  ;;  %v3075_v52 = vmul.f32 %v5372_v42, %v5370_v34 }
 0xdd5   :  { %v3074_v62 = vmul.f32 %v5374_v20, %v3072_v60  ;;  %v5376_v9 = vpop.eup %5375 }
 0xdd7   :  { %v6656_v25 = vadd.f32 %v3075_v52, %v3074_v62 }
 0xdd9   :  { %5377 = vtanh.f32 %v6656_v25  ;;  %v3257_v51 = vrot.slane %v6656_v25, 6 }
 0xde3   :  { %v5378_v24 = vpop.eup %5377 }
 0xde4   :  { %v3078_v11 = vmul.f32 %v5378_v24, %v5376_v9 }
 0xde6   :  { %3144 = vmatmul.mubr.f32.vlgmr.msra.gmra.mrb[34].mxu0 %v3078_v11  ;;  %3215 = vmatmul.mubr.f32.vlgmr.msra.gmra.mrb[34].mxu1 %v3078_v11 }
 0xde7   :  { %4983 = vmatpush1.bf16.msra.mxu0 %v6281_v47  ;;  %5015 = vmatpush1.bf16.msra.mxu1 %v6284_v29 }
 0xde8   :  { %4985 = vmatprep.subr.bf16.mxu0 %v6289_v59  ;;  %5017 = vmatprep.subr.bf16.mxu1 %v6291_v46 }
 0xde9   :  { %3331 = vmatprep.mubr.f32.mxu0 %v5624_v0  ;;  %3402 = vmatprep.mubr.f32.mxu1 %v5624_v0 }
 0xdeb   :  { %4987 = vmatpush1.bf16.msra.mxu0 %v6293_v55  ;;  %5019 = vmatpush1.bf16.msra.mxu1 %v6296_v18 }
 0xdec   :  { %4989 = vmatprep.subr.bf16.mxu0 %v6301_v5  ;;  %5021 = vmatprep.subr.bf16.mxu1 %v6303_v22 }
 0xdef   :  { %4991 = vmatpush1.bf16.msra.mxu0 %v6305_v26  ;;  %5023 = vmatpush1.bf16.msra.mxu1 %v6308_v39 }
 0xdf0   :  { %4993 = vmatprep.subr.bf16.mxu0 %v6313_v53  ;;  %5025 = vmatprep.subr.bf16.mxu1 %v6315_v58 }
 0xdf3   :  { %4995 = vmatpush1.bf16.msra.mxu0 %v6317_v1  ;;  %5027 = vmatpush1.bf16.msra.mxu1 %v6320_v13 }
 0xdf4   :  { %4997 = vmatprep.subr.bf16.mxu0 %v6324_v32  ;;  %5029 = vmatprep.subr.bf16.mxu1 %v6326_v33 }
 0xdf7   :  { %4999 = vmatpush1.bf16.msra.mxu0 %v6329_v50  ;;  %5031 = vmatpush1.bf16.msra.mxu1 %v6333_v28 }
 0xdf8   :  { %5001 = vmatprep.subr.bf16.mxu0 %v6335_v17  ;;  %5033 = vmatprep.subr.bf16.mxu1 %v6337_v38 }
 0xdfb   :  { %5003 = vmatpush1.bf16.msra.mxu0 %v6340_v14  ;;  %5035 = vmatpush1.bf16.msra.mxu1 %v6344_v43 }
 0xdfc   :  { %5005 = vmatprep.subr.bf16.mxu0 %v6346_v12  ;;  %5037 = vmatprep.subr.bf16.mxu1 %v6349_v44 }
 0xdff   :  { %5007 = vmatpush1.bf16.msra.mxu0 %v6352_v45  ;;  %5039 = vmatpush1.bf16.msra.mxu1 %v6356_v54 }
 0xe00   :  { %5009 = vmatprep.subr.bf16.mxu0 %v6361_v15  ;;  %5041 = vmatprep.subr.bf16.mxu1 %v6363_v41 }
 0xe03   :  { %5011 = vmatpush1.bf16.msra.mxu0 %v6365_v48  ;;  %5043 = vmatpush1.bf16.msra.mxu1 %v6368_v4 }
 0xe04   :  { %5045 = vmatprep.subr.bf16.mxu0 %v6277_v49  ;;  %5077 = vmatprep.subr.bf16.mxu1 %v6279_v61 }
 0xeb9   :  { %v3145_v23 = vpop.f32.mrb[34].mxu0  ;;  %v3216_v57 = vpop.f32.mrb[34].mxu1 }
 0xeba   :  { %v3225_v27 = vrot.slane %v3145_v23, 6  ;;  %v3147_v56 = vpop.f32.mrb[35].mxu0  ;;  %v3218_v36 = vpop.f32.mrb[35].mxu1  ;;  %v3227_v49 = vrot.slane %v3216_v57, 6 }
 0xebb   :  { %v3226_v19 = vrot.slane %v3147_v56, 6  ;;  %v3228_v16 = vrot.slane %v3218_v36, 6 }
 0xebc   :  { %v3233_v3 = vadd.f32 %v3225_v27, %v6637_v31  ;;  %v3235_v61 = vadd.f32 %v3227_v49, %v6652_v35 }
 0xebd   :  { %v3234_v30 = vadd.f32 %v3226_v19, %v6641_v8  ;;  %v3236_v37 = vadd.f32 %v3228_v16, %v6647_v7  ;;  %v3650_v16 = vld [vmem:[#allocation11 + $0x10] sm:$0xff] }
 0xebe   :  { %v3897_v40 = vmul.f32 -1.442695, %v3233_v3  ;;  %v3648_v3 = vld [vmem:[#allocation11] sm:$0xff] }
 0xebf   :  { %v3898_v6 = vmul.f32 -1.442695, %v3234_v30  ;;  %v3899_v21 = vmul.f32 -1.442695, %v3236_v37  ;;  %v3649_v30 = vld [vmem:[#allocation11 + $0x8] sm:$0xff]  ;;  %v3651_v37 = vld [vmem:[#allocation11 + $0x18] sm:$0xff] }
 0xec0   :  { %5379 = vpow2.f32 %v3897_v40  ;;  %v5109_v40 = vpack.c.bf16 %v3649_v30, %v3648_v3  ;;  %v5112_v49 = vpack.c.bf16 %v3651_v37, %v3650_v16 }
 0xec1   :  { %5381 = vpow2.f32 %v3898_v6  ;;  %v5625_v6 = vmov 0.0|0.0  }
 0xec2   :  { %5383 = vpow2.f32 %v3899_v21  ;;  %v3652_v21 = vld [vmem:[#allocation11 + $0x20] sm:$0xff] }
 0xec3   :  { %5385 = vtanh.f32 %v3235_v61  ;;  %v3653_v61 = vld [vmem:[#allocation11 + $0x28] sm:$0xff] }
 0xeca   :  { %v5380_v63 = vpop.eup %5379 }
 0xecb   :  { %v5382_v2 = vpop.eup %5381  ;;  %v3240_v34 = vadd.f32 1.0, %v5380_v63  ;;  %v5115_v63 = vpack.c.bf16 %v3653_v61, %v3652_v21 }
 0xecc   :  { %v3246_v42 = vadd.f32 1.0, %v5382_v2  ;;  %v5384_v60 = vpop.eup %5383  ;;  %v3654_v2 = vld [vmem:[#allocation11 + $0x30] sm:$0xff] }
 0xecd   :  { %5387 = vrcp.f32 %v3240_v34  ;;  %v5386_v20 = vpop.eup %5385  ;;  %v3253_v24 = vadd.f32 1.0, %v5384_v60  ;;  %v3655_v34 = vld [vmem:[#allocation11 + $0x38] sm:$0xff]  ;;  %v3656_v60 = vld [vmem:[#allocation11 + $0x40] sm:$0xff] }
 0xece   :  { %5389 = vrcp.f32 %v3246_v42  ;;  %v5118_v42 = vpack.c.bf16 %v3655_v34, %v3654_v2 }
 0xecf   :  { %5391 = vrcp.f32 %v3253_v24  ;;  %v3660_v24 = vld [vmem:[#allocation11 + $0x60] sm:$0xff] }
 0xed7   :  { %v5388_v52 = vpop.eup %5387 }
 0xed8   :  { %v5390_v62 = vpop.eup %5389  ;;  %v3260_v9 = vmul.f32 %v5388_v52, %v5386_v20  ;;  %v3657_v20 = vld [vmem:[#allocation11 + $0x48] sm:$0xff] }
 0xed9   :  { %v3259_v11 = vmul.f32 %v5390_v62, %v3257_v51  ;;  %v5392_v57 = vpop.eup %5391  ;;  %v5121_v52 = vpack.c.bf16 %v3657_v20, %v3656_v60  ;;  %v3658_v51 = vld [vmem:[#allocation11 + $0x50] sm:$0xff]  ;;  %v3659_v62 = vld [vmem:[#allocation11 + $0x58] sm:$0xff] }
 0xedb   :  { %v6698_v23 = vadd.f32 %v3260_v9, %v3259_v11  ;;  %v5124_v9 = vpack.c.bf16 %v3659_v62, %v3658_v51  ;;  %v3661_v11 = vld [vmem:[#allocation11 + $0x68] sm:$0xff] }
 0xedd   :  { %5393 = vtanh.f32 %v6698_v23 }
 0xee7   :  { %v5394_v27 = vpop.eup %5393 }
 0xee8   :  { %v3263_v56 = vmul.f32 %v5394_v27, %v5392_v57  ;;  %v3662_v57 = vld [vmem:[#allocation11 + $0x70] sm:$0xff]  ;;  %v3663_v27 = vld [vmem:[#allocation11 + $0x78] sm:$0xff] }
 0xeea   :  { %v3265_v36 = vrot.slane %v3263_v56, 2  ;;  %v5130_v56 = vpack.c.bf16 %v3663_v27, %v3662_v57 }
 0xeec   :  { %3332 = vmatmul.mubr.f32.vlgmr.msra.gmra.mrb[36].mxu0 %v3265_v36  ;;  %3403 = vmatmul.mubr.f32.vlgmr.msra.gmra.mrb[36].mxu1 %v3265_v36  ;;  %v3742_v36 = vld [vmem:[#allocation13] sm:$0xff] }
 0xeed   :  { %5047 = vmatpush1.bf16.msra.mxu0 %v6281_v47  ;;  %5079 = vmatpush1.bf16.msra.mxu1 %v6284_v29 }
 0xeee   :  { %5049 = vmatprep.subr.bf16.mxu0 %v6289_v59  ;;  %5081 = vmatprep.subr.bf16.mxu1 %v6291_v46 }
 0xeef   :  { %3519 = vmatprep.mubr.f32.mxu0 %v5624_v0  ;;  %3590 = vmatprep.mubr.f32.mxu1 %v5624_v0 }
 0xef1   :  { %5051 = vmatpush1.bf16.msra.mxu0 %v6293_v55  ;;  %5083 = vmatpush1.bf16.msra.mxu1 %v6296_v18 }
 0xef2   :  { %5053 = vmatprep.subr.bf16.mxu0 %v6301_v5  ;;  %5085 = vmatprep.subr.bf16.mxu1 %v6303_v22 }
 0xef5   :  { %5055 = vmatpush1.bf16.msra.mxu0 %v6305_v26  ;;  %5087 = vmatpush1.bf16.msra.mxu1 %v6308_v39 }
 0xef6   :  { %5057 = vmatprep.subr.bf16.mxu0 %v6313_v53  ;;  %5089 = vmatprep.subr.bf16.mxu1 %v6315_v58 }
 0xef9   :  { %5059 = vmatpush1.bf16.msra.mxu0 %v6317_v1  ;;  %5091 = vmatpush1.bf16.msra.mxu1 %v6320_v13 }
 0xefa   :  { %5061 = vmatprep.subr.bf16.mxu0 %v6324_v32  ;;  %5093 = vmatprep.subr.bf16.mxu1 %v6326_v33 }
 0xefd   :  { %5063 = vmatpush1.bf16.msra.mxu0 %v6329_v50  ;;  %5095 = vmatpush1.bf16.msra.mxu1 %v6333_v28 }
 0xefe   :  { %5065 = vmatprep.subr.bf16.mxu0 %v6335_v17  ;;  %5097 = vmatprep.subr.bf16.mxu1 %v6337_v38 }
 0xf01   :  { %5067 = vmatpush1.bf16.msra.mxu0 %v6340_v14  ;;  %5099 = vmatpush1.bf16.msra.mxu1 %v6344_v43 }
 0xf02   :  { %5069 = vmatprep.subr.bf16.mxu0 %v6346_v12  ;;  %5101 = vmatprep.subr.bf16.mxu1 %v6349_v44  ;;  %v3445_v12 = vrot.slane %v6698_v23, 6  ;;  %v5127_v23 = vpack.c.bf16 %v3661_v11, %v3660_v24  ;;  %v3756_v24 = vld [vmem:[#allocation13 + $0x70] sm:$0xff]  ;;  %v3757_v11 = vld [vmem:[#allocation13 + $0x78] sm:$0xff] }
 0xf05   :  { %5071 = vmatpush1.bf16.msra.mxu0 %v6352_v45  ;;  %5103 = vmatpush1.bf16.msra.mxu1 %v6356_v54 }
 0xf06   :  { %5073 = vmatprep.subr.bf16.mxu0 %v6361_v15  ;;  %5105 = vmatprep.subr.bf16.mxu1 %v6363_v41 }
 0xf09   :  { %5075 = vmatpush1.bf16.msra.mxu0 %v6365_v48  ;;  %5107 = vmatpush1.bf16.msra.mxu1 %v6368_v4 }
 0xf0a   :  { %5108 = vmatprep.subr.bf16.mxu0 %v5625_v6  ;;  %5132 = vmatprep.subr.bf16.mxu1 %v5625_v6 }
 0xfbf   :  { %v3333_v47 = vpop.f32.mrb[36].mxu0  ;;  %v3404_v29 = vpop.f32.mrb[36].mxu1 }
 0xfc0   :  { %v3413_v59 = vrot.slane %v3333_v47, 4  ;;  %v3335_v46 = vpop.f32.mrb[37].mxu0  ;;  %v3406_v55 = vpop.f32.mrb[37].mxu1  ;;  %v3415_v1 = vrot.slane %v3404_v29, 4  ;;  %v3743_v47 = vld [vmem:[#allocation13 + $0x8] sm:$0xff] }
 0xfc1   :  { %v3414_v18 = vrot.slane %v3335_v46, 4  ;;  %v3416_v53 = vrot.slane %v3406_v55, 4  ;;  %v5133_v29 = vpack.c.bf16 %v3743_v47, %v3742_v36  ;;  %v3746_v55 = vld [vmem:[#allocation13 + $0x20] sm:$0xff] }
 0xfc2   :  { %v3421_v5 = vadd.f32 %v3413_v59, %v6637_v31  ;;  %v3423_v32 = vadd.f32 %v3415_v1, %v6652_v35  ;;  %v3745_v59 = vld [vmem:[#allocation13 + $0x18] sm:$0xff] }
 0xfc3   :  { %v3422_v22 = vadd.f32 %v3414_v18, %v6641_v8  ;;  %v3424_v58 = vadd.f32 %v3416_v53, %v6647_v7  ;;  %v3747_v18 = vld [vmem:[#allocation13 + $0x28] sm:$0xff]  ;;  %v3750_v53 = vld [vmem:[#allocation13 + $0x40] sm:$0xff] }
 0xfc4   :  { %v3900_v26 = vmul.f32 -1.442695, %v3421_v5  ;;  %v5139_v5 = vpack.c.bf16 %v3747_v18, %v3746_v55 }
 0xfc5   :  { %v3901_v39 = vmul.f32 -1.442695, %v3422_v22  ;;  %v3902_v13 = vmul.f32 -1.442695, %v3424_v58  ;;  %v3748_v22 = vld [vmem:[#allocation13 + $0x30] sm:$0xff]  ;;  %v3751_v58 = vld [vmem:[#allocation13 + $0x48] sm:$0xff] }
 0xfc6   :  { %5395 = vpow2.f32 %v3900_v26  ;;  %v3749_v26 = vld [vmem:[#allocation13 + $0x38] sm:$0xff]  ;;  %v5145_v1 = vpack.c.bf16 %v3751_v58, %v3750_v53 }
 0xfc7   :  { %5397 = vpow2.f32 %v3901_v39  ;;  %v5142_v39 = vpack.c.bf16 %v3749_v26, %v3748_v22 }
 0xfc8   :  { %5399 = vpow2.f32 %v3902_v13  ;;  %v3752_v13 = vld [vmem:[#allocation13 + $0x50] sm:$0xff] }
 0xfc9   :  { %5401 = vtanh.f32 %v3423_v32  ;;  %v3753_v32 = vld [vmem:[#allocation13 + $0x58] sm:$0xff] }
 0xfd0   :  { %v5396_v33 = vpop.eup %5395 }
 0xfd1   :  { %v5398_v50 = vpop.eup %5397  ;;  %v3428_v28 = vadd.f32 1.0, %v5396_v33  ;;  %v5148_v33 = vpack.c.bf16 %v3753_v32, %v3752_v13 }
 0xfd2   :  { %v3434_v17 = vadd.f32 1.0, %v5398_v50  ;;  %v5400_v38 = vpop.eup %5399  ;;  %v3754_v50 = vld [vmem:[#allocation13 + $0x60] sm:$0xff] }
 0xfd3   :  { %5403 = vrcp.f32 %v3428_v28  ;;  %v5402_v14 = vpop.eup %5401  ;;  %v3441_v54 = vadd.f32 1.0, %v5400_v38  ;;  %v3755_v28 = vld [vmem:[#allocation13 + $0x68] sm:$0xff] }
 0xfd4   :  { %5405 = vrcp.f32 %v3434_v17  ;;  %v5151_v17 = vpack.c.bf16 %v3755_v28, %v3754_v50 }
 0xfd5   :  { %5407 = vrcp.f32 %v3441_v54 }
 0xfdd   :  { %v5404_v43 = vpop.eup %5403 }
 0xfde   :  { %v5406_v44 = vpop.eup %5405  ;;  %v3448_v45 = vmul.f32 %v5404_v43, %v5402_v14 }
 0xfdf   :  { %v3447_v15 = vmul.f32 %v5406_v44, %v3445_v12  ;;  %v5408_v48 = vpop.eup %5407 }
 0xfe1   :  { %v6738_v41 = vadd.f32 %v3448_v45, %v3447_v15 }
 0xfe3   :  { %5409 = vtanh.f32 %v6738_v41  ;;  %v3633_v61 = vrot.slane %v6738_v41, 6  ;;  %v5154_v41 = vpack.c.bf16 %v3757_v11, %v3756_v24 }
 0xfed   :  { %v5410_v4 = vpop.eup %5409 }
 0xfee   :  { %v3451_v25 = vmul.f32 %v5410_v4, %v5408_v48 }
 0xff0   :  { %v3453_v19 = vrot.slane %v3451_v25, 4 }
 0xff2   :  { %3520 = vmatmul.mubr.f32.vlgmr.msra.gmra.mrb[38].mxu0 %v3453_v19  ;;  %3591 = vmatmul.mubr.f32.vlgmr.msra.gmra.mrb[38].mxu1 %v3453_v19 }
 0xff3   :  { %5110 = vmatpush3.bf16.msra.mxu0 %v5109_v40  ;;  %3974 = vmatprep.mubr.msk.f32.mxu0 %vm5626_vm4, %v5624_v0 }
 0xff4   :  { %5111 = vmatprep.subr.bf16.mxu0 %v5625_v6  ;;  %4009 = vmatprep.mubr.msk.f32.mxu1 %vm5626_vm4, %v5624_v0  ;;  %v3744_v0 = vld [vmem:[#allocation13 + $0x10] sm:$0xff] }
 0xff5   :  { %5134 = vmatpush3.bf16.msra.mxu1 %v5133_v29  ;;  %v5136_v46 = vpack.c.bf16 %v3745_v59, %v3744_v0 }
 0xff6   :  { %5135 = vmatprep.subr.bf16.mxu1 %v5625_v6 }
 0xff7   :  { %5113 = vmatpush3.bf16.msra.mxu0 %v5112_v49 }
 0xff8   :  { %5114 = vmatprep.subr.bf16.mxu0 %v5625_v6 }
 0xff9   :  { %5137 = vmatpush3.bf16.msra.mxu1 %v5136_v46 }
 0xffa   :  { %5138 = vmatprep.subr.bf16.mxu1 %v5625_v6 }
 0xffb   :  { %5116 = vmatpush3.bf16.msra.mxu0 %v5115_v63 }
 0xffc   :  { %5117 = vmatprep.subr.bf16.mxu0 %v5625_v6 }
 0xffd   :  { %5140 = vmatpush3.bf16.msra.mxu1 %v5139_v5 }
 0xffe   :  { %5141 = vmatprep.subr.bf16.mxu1 %v5625_v6 }
 0xfff   :  { %5119 = vmatpush3.bf16.msra.mxu0 %v5118_v42 }
0x1000   :  { %5120 = vmatprep.subr.bf16.mxu0 %v5625_v6 }
0x1001   :  { %5143 = vmatpush3.bf16.msra.mxu1 %v5142_v39 }
0x1002   :  { %5144 = vmatprep.subr.bf16.mxu1 %v5625_v6 }
0x1003   :  { %5122 = vmatpush3.bf16.msra.mxu0 %v5121_v52  ;;  %v3641_v52 = vrot.slane %v6384_v10, 6  ;;  %v3907_v10 = vld [vmem:[%s6794_s10] ss:$0 sm:$0xff] }
0x1004   :  { %5123 = vmatprep.subr.bf16.mxu0 %v5625_v6 }
0x1005   :  { %5146 = vmatpush3.bf16.msra.mxu1 %v5145_v1 }
0x1006   :  { %5147 = vmatprep.subr.bf16.mxu1 %v5625_v6 }
0x1007   :  { %5125 = vmatpush3.bf16.msra.mxu0 %v5124_v9 }
0x1008   :  { %5126 = vmatprep.subr.bf16.mxu0 %v5625_v6 }
0x1009   :  { %5149 = vmatpush3.bf16.msra.mxu1 %v5148_v33 }
0x100a   :  { %5150 = vmatprep.subr.bf16.mxu1 %v5625_v6 }
0x100b   :  { %5128 = vmatpush3.bf16.msra.mxu0 %v5127_v23  ;;  %v3906_v23 = vld [vmem:[%s6792_s8] ss:$0 sm:$0xff] }
0x100c   :  { %5129 = vmatprep.subr.bf16.mxu0 %v5625_v6 }
0x100d   :  { %5152 = vmatpush3.bf16.msra.mxu1 %v5151_v17 }
0x100e   :  { %5153 = vmatprep.subr.bf16.mxu1 %v5625_v6 }
0x100f   :  { %5131 = vmatpush3.bf16.msra.mxu0 %v5130_v56 }
0x1011   :  { %5155 = vmatpush3.bf16.msra.mxu1 %v5154_v41 }
0x10c5   :  { %v3521_v38 = vpop.f32.mrb[38].mxu0  ;;  %v3592_v14 = vpop.f32.mrb[38].mxu1 }
0x10c6   :  { %v3601_v43 = vrot.slane %v3521_v38, 2  ;;  %v3523_v12 = vpop.f32.mrb[39].mxu0  ;;  %v3594_v44 = vpop.f32.mrb[39].mxu1  ;;  %v3603_v3 = vrot.slane %v3592_v14, 2 }
0x10c7   :  { %v3602_v45 = vrot.slane %v3523_v12, 2  ;;  %v3604_v25 = vrot.slane %v3594_v44, 2 }
0x10c8   :  { %v3609_v54 = vadd.f32 %v3601_v43, %v6637_v31  ;;  %v3611_v40 = vadd.f32 %v3603_v3, %v6652_v35 }
0x10c9   :  { %v3610_v15 = vadd.f32 %v3602_v45, %v6641_v8  ;;  %v3612_v19 = vadd.f32 %v3604_v25, %v6647_v7 }
0x10ca   :  { %v3903_v48 = vmul.f32 -1.442695, %v3609_v54 }
0x10cb   :  { %v3904_v4 = vmul.f32 -1.442695, %v3610_v15  ;;  %v3905_v30 = vmul.f32 -1.442695, %v3612_v19 }
0x10cc   :  { %5411 = vpow2.f32 %v3903_v48 }
0x10cd   :  { %5413 = vpow2.f32 %v3904_v4 }
0x10ce   :  { %5415 = vpow2.f32 %v3905_v30 }
0x10cf   :  { %5417 = vtanh.f32 %v3611_v40 }
0x10d6   :  { %v5412_v6 = vpop.eup %5411 }
0x10d7   :  { %v5414_v16 = vpop.eup %5413  ;;  %v3616_v37 = vadd.f32 1.0, %v5412_v6 }
0x10d8   :  { %v3622_v49 = vadd.f32 1.0, %v5414_v16  ;;  %v5416_v31 = vpop.eup %5415 }
0x10d9   :  { %5419 = vrcp.f32 %v3616_v37  ;;  %v5418_v8 = vpop.eup %5417  ;;  %v3629_v7 = vadd.f32 1.0, %v5416_v31 }
0x10da   :  { %5421 = vrcp.f32 %v3622_v49 }
0x10db   :  { %5423 = vrcp.f32 %v3629_v7 }
0x10e3   :  { %v5420_v21 = vpop.eup %5419 }
0x10e4   :  { %v5422_v63 = vpop.eup %5421  ;;  %v3636_v2 = vmul.f32 %v5420_v21, %v5418_v8 }
0x10e5   :  { %v3635_v34 = vmul.f32 %v5422_v63, %v3633_v61  ;;  %v5424_v35 = vpop.eup %5423 }
0x10e7   :  { %v3637_v42 = vadd.f32 %v3636_v2, %v3635_v34 }
0x10e9   :  { %5425 = vtanh.f32 %v3637_v42 }
0x10f3   :  { %v5426_v60 = vpop.eup %5425 }
0x10f4   :  { %v3639_v20 = vmul.f32 %v5426_v60, %v5424_v35 }
0x10f6   :  { %v3644_v51 = vrot.slane %v3639_v20, 4 }
0x10f8   :  { %v3646_v62 = vsel %vm1859_vm1, %v3641_v52, %v3644_v51 }
0x10f9   :  { %v3647_v9 = vmax.f32 %v3646_v62, 0.0 }
0x10fb   :  { %3975 = vmatmul.mubr.f32.vlgmr.msra.gmra.mrb[40].mxu0 %v3647_v9 }
0x11ce   :  { %v3737_v57 = vpop.f32.mrb[40].mxu0 }
0x11cf   :  { %v3738_v27 = vadd.f32 %v3906_v23, %v3737_v57  ;;  %v3976_v56 = vpop.f32.mrb[41].mxu0 }
0x11d1   :  { %v3741_v36 = vmax.f32 %v3738_v27, 0.0 }
0x11d3   :  { %4010 = vmatmul.mubr.f32.vlgmr.msra.gmra.mrb[40].mxu1 %v3741_v36 }
0x12a6   :  { %v3831_v47 = vpop.f32.mrb[40].mxu1 }
0x12a7   :  { %v3832_v0 = vadd.f32 %v3907_v10, %v3831_v47  ;;  %v4011_v29 = vpop.f32.mrb[41].mxu1 }
0x12a9   :  { %3835 = vst [vmem:[#allocation14] sm:$0xf] %v3832_v0 }
0x12aa   :  { %5592 = shalt.err (!%p5589_p4)
}
0x12ab   :  { %s5593_s16 = scalar_lea.hbm %s6795_s11, 64 }
0x12ac   :  { %p5594_p5 = scmp.ne.s32.totalorder %s6795_s11, %s5593_s16  ;;  %p5597_p6 = scmp.lt.u32.totalorder %s5593_s16, %s6795_s11 }
0x12ae   :  { %p5599_p7 = pnand %p5597_p6, %p5594_p5 }
0x12b0   :  { %5602 = shalt.err (!%p5599_p7)
}
0x12b1   :  { %3845 = dma.vmem_to_hbm [thread:$0]  %s3843_s7, 64, %s6795_s11, [#allocation4]  }
0x12b2   :  { %5611 = dma.done.wait [#allocation4], 64  }
0x12b3   :  { %5612 = vsyncadd [#allocation4], 4294967232 }
0x12b4   :  { %3849 = vsyncpa [#allocation3], 1 }
0x12b5   :  { %3850 = vsyncpa [#allocation6], 1 }
0x12b6   :  { %3851 = vsyncpa [#allocation9], 1 }
0x12b7   :  { %3852 = vsyncpa [#allocation12], 1 }
0x12b8   :  { %3853 = vsyncpa [#allocation4], 1 }

</bundles_post_ra>
